<compile_context>
chip_gen: v5e
topology: v5e:2x2
jax: 0.10.0
libtpu: 0.0.40
codegen_flags: <defaults>
</compile_context>

<pallas_src>
import math
import numpy as np
import jax
import jax.numpy as jnp
from jax.experimental import pallas as pl
from jax.experimental.pallas import tpu as pltpu

_SQRT_2_INV = 1.0 / math.sqrt(2.0)


def _erf(z):
    # Abramowitz & Stegun 7.1.26 polynomial (|err| < 1.5e-7); exp + reciprocal
    # run on the EUP slot (approx reciprocal trades a tiny extra error for
    # removing the divide from the VALU critical chain).
    a1, a2, a3, a4, a5 = 0.254829592, -0.284496736, 1.421413741, -1.453152027, 1.061405429
    p = 0.3275911
    s = jnp.where(z < 0.0, -1.0, 1.0)
    az = jnp.abs(z)
    t = pl.reciprocal(1.0 + p * az, approx=True)
    poly = ((((a5 * t + a4) * t + a3) * t + a2) * t + a1) * t
    return s * (1.0 - poly * jnp.exp(-az * az))


def _gelu_exact(x):
    # matches PyTorch nn.GELU() (erf based)
    return 0.5 * x * (1.0 + _erf(x * _SQRT_2_INV))


# ----------------------------- Pallas kernel --------------------------------

def _make_conv_ln_kernel(cin, h, w, cout, *, gelu, has_residual, has_w2):
    """Fused 3x3 conv (as one K=9*Cin matmul) + channel LayerNorm
    [+ GELU] [+ residual] [+ fused 1x1 conv], all channel-major / lane = H*W."""
    hw = h * w

    def kernel(*refs):
        refs = list(refs)
        x_ref = refs.pop(0)                               # (cin, (h+2)*w + 2)
        w_ref = refs.pop(0)                               # (cout, 9*cin)
        g_ref = refs.pop(0)                               # (cout, 1)
        b_ref = refs.pop(0)                               # (cout, 1)
        r_ref = refs.pop(0) if has_residual else None     # (cout, hw)
        w2_ref = refs.pop(0) if has_w2 else None          # (cfinal, cout)
        o_ref = refs.pop(0)                               # (cfinal, hw)

        xf = x_ref[...]                                   # H-padded, flat, +/-1 lane guard
        colmod = jax.lax.broadcasted_iota(jnp.int32, (1, hw), 1) % w

        # in-VMEM im2col: 9 statically shifted lane slices of the padded image;
        # the columns that would wrap across image rows are masked to zero.
        taps = []
        for ky in range(3):
            for kx in range(3):
                t = xf[:, ky * w + kx: ky * w + kx + hw]
                if kx == 0:
                    t = jnp.where(colmod == 0, 0.0, t)
                elif kx == 2:
                    t = jnp.where(colmod == w - 1, 0.0, t)
                taps.append(t)
        x_col = jnp.concatenate(taps, axis=0)             # (9*cin, hw)

        # single folded MXU matmul; result is channel-major (lane dim = hw)
        y = jnp.dot(w_ref[...], x_col, preferred_element_type=jnp.float32)

        # LayerNorm over channels (axis 0), eps = 1e-5, affine
        mean = jnp.mean(y, axis=0, keepdims=True)
        var = jnp.mean((y - mean) ** 2, axis=0, keepdims=True)
        y = (y - mean) * jax.lax.rsqrt(var + 1e-5)
        y = y * g_ref[...] + b_ref[...]
        if gelu:
            y = _gelu_exact(y)
        if has_residual:
            y = y + r_ref[...]
        if has_w2:                                        # fused trailing 1x1 conv
            y = jnp.dot(w2_ref[...], y, preferred_element_type=jnp.float32)
        o_ref[...] = y.astype(o_ref.dtype)

    return kernel


# ----------------------------- kernel wrapper --------------------------------

def conv3x3_ln(x, params, *, gelu, residual=None, w2=None):
    """ConvLn: 3x3 conv (stride 1, pad 1, no bias) + LayerNorm(channels)
    [+ GELU] [+ residual] [+ fused 1x1 conv].  x: (N, C, H, W) NCHW."""
    n, cin, h, w = x.shape
    wgt = params["w"]                                     # (3, 3, cin, cout)
    cout = wgt.shape[-1]
    hw = h * w
    lp = (h + 2) * w + 2                                  # H zero-pad + 1-lane guard each side

    # single padded+flattened copy of the input (1x HBM traffic; taps built in-kernel)
    xp = jnp.pad(x, ((0, 0), (0, 0), (1, 1), (0, 0))).reshape(n, cin, (h + 2) * w)
    xp = jnp.pad(xp, ((0, 0), (0, 0), (1, 1)))

    w_t = wgt.reshape(9 * cin, cout).T                    # (cout, 9*cin)
    gamma = params["gamma"].reshape(cout, 1)
    beta = params["beta"].reshape(cout, 1)

    args = [xp, w_t, gamma, beta]
    in_specs = [
        pl.BlockSpec((None, cin, lp), lambda i: (i, 0, 0)),
        pl.BlockSpec((cout, 9 * cin), lambda i: (0, 0)),
        pl.BlockSpec((cout, 1), lambda i: (0, 0)),
        pl.BlockSpec((cout, 1), lambda i: (0, 0)),
    ]
    if residual is not None:
        args.append(residual.reshape(n, cout, hw))
        in_specs.append(pl.BlockSpec((None, cout, hw), lambda i: (i, 0, 0)))
    cfinal = cout if w2 is None else w2.shape[0]
    if w2 is not None:
        args.append(w2)
        in_specs.append(pl.BlockSpec(w2.shape, lambda i: (0, 0)))

    kernel = _make_conv_ln_kernel(cin, h, w, cout, gelu=gelu,
                                  has_residual=residual is not None,
                                  has_w2=w2 is not None)
    out = pl.pallas_call(
        kernel,
        out_shape=jax.ShapeDtypeStruct((n, cfinal, hw), x.dtype),
        grid=(n,),
        in_specs=in_specs,
        out_specs=pl.BlockSpec((None, cfinal, hw), lambda i: (i, 0, 0)),
        compiler_params=pltpu.CompilerParams(
            dimension_semantics=("parallel",),          # batch -> both TCs on v7x
            vmem_limit_bytes=32 * 1024 * 1024),         # safe on v5e/v6e/v7x
    )(*args)
    return out.reshape(n, cfinal, h, w)


# --------------------------- plain-JAX glue ops -------------------------------

def avg_pool(x, p):
    # nn.AvgPool2d(kernel=p, stride=p), ceil_mode=False; NCHW
    n, c, h, w = x.shape
    ho, wo = h // p, w // p
    x = x[:, :, :ho * p, :wo * p]
    return x.reshape(n, c, ho, p, wo, p).mean(axis=(3, 5))


def _interp_matrix(out_size, in_size):
    # 1-D linear interpolation matrix, align_corners=True semantics.
    if in_size == 1:
        return jnp.ones((out_size, 1), jnp.float32)
    m = np.zeros((out_size, in_size), np.float32)
    if out_size == 1:
        m[0, 0] = 1.0
        return jnp.asarray(m)
    for i in range(out_size):
        c = i * (in_size - 1) / (out_size - 1)
        lo = min(int(math.floor(c)), in_size - 2)
        frac = c - lo
        m[i, lo] += 1.0 - frac
        m[i, lo + 1] += frac
    return jnp.asarray(m)


def bilinear_resize_align_corners(x, out_h, out_w):
    # F.interpolate(..., mode='bilinear', align_corners=True) as separable matmuls.
    n, c, h, w = x.shape
    if (h, w) == (out_h, out_w):
        return x
    my = _interp_matrix(out_h, h)
    mx = _interp_matrix(out_w, w)
    return jnp.einsum("Hh,nchw,Ww->ncHW", my, x, mx)


def pad_before_pool(x, pool0):
    h, w = x.shape[2], x.shape[3]
    bottom = math.ceil(pool0 - h) if h - pool0 < 0 else 0
    right = math.ceil(pool0 - w) if w - pool0 < 0 else 0
    if bottom > 0 or right > 0:
        x = jnp.pad(x, ((0, 0), (0, 0), (0, bottom), (0, right)))
    return x


# ----------------------------- parameter init --------------------------------

def _init_convln(key, cin, cout):
    w = jax.random.normal(key, (3, 3, cin, cout), jnp.float32) / math.sqrt(9 * cin)
    return {"w": w,
            "gamma": jnp.ones((cout,), jnp.float32),
            "beta": jnp.zeros((cout,), jnp.float32)}


def init_params(key, in_dim):
    c, b = in_dim, 2 * in_dim
    keys = iter(jax.random.split(key, 32))
    p = {"fc1": _init_convln(next(keys), c, c),
         "fc2": _init_convln(next(keys), c, b)}

    def basic_block():
        return {"conv1": _init_convln(next(keys), b, b),
                "conv2": _init_convln(next(keys), b, b)}

    p["layer1"] = [basic_block()]
    p["layer2"] = [basic_block(), basic_block()]
    p["layer3"] = [basic_block(), basic_block()]
    # NOTE: layer4 exists in the PyTorch module but is never used in forward().
    p["branches"] = [_init_convln(next(keys), b, b) for _ in range(4)]
    p["last1"] = _init_convln(next(keys), 5 * b, 2 * b)
    # PyTorch Conv2d(2b, in_dim, kernel=1, bias=False) weight -> (in_dim, 2b)
    p["last2_w"] = jax.random.normal(next(keys), (in_dim, 2 * b), jnp.float32) / math.sqrt(2 * b)
    return p


# ------------------------------- forward --------------------------------------

def pyramid_layer_forward(x, params, pool_sizes):
    # x: (N, C, H, W) NCHW, same as PyTorch.
    # firstconv
    x = conv3x3_ln(x, params["fc1"], gelu=True)
    x = conv3x3_ln(x, params["fc2"], gelu=True)
    # layer1 / layer2 / layer3 (stride 1, channels match -> no downsample)
    for blk in params["layer1"] + params["layer2"] + params["layer3"]:
        out = conv3x3_ln(x, blk["conv1"], gelu=True)
        x = conv3x3_ln(out, blk["conv2"], gelu=False, residual=x)
    # spatial pyramid branches
    x = pad_before_pool(x, pool_sizes[0])
    h, w = x.shape[2], x.shape[3]
    branches = []
    for i in range(4):
        xb = avg_pool(x, pool_sizes[i])
        xb = conv3x3_ln(xb, params["branches"][i], gelu=True)
        xb = bilinear_resize_align_corners(xb, h, w)
        branches.append(xb)
    xx = jnp.concatenate([x] + branches, axis=1)          # (N, 10*in_dim, H, W)
    # lastconv: ConvLn(5b->2b) + GELU + 1x1 conv(2b->in_dim), fused in one kernel
    y = conv3x3_ln(xx, params["last1"], gelu=True, w2=params["last2_w"])
    return y


# --------------------------------- main ---------------------------------------

if __name__ == "__main__":
    key = jax.random.PRNGKey(0)
    k_params, k_x = jax.random.split(key)

    in_dim = 4
    pool_sizes = (2, 4, 8, 16)
    N, H, W = 2, 16, 16

    params = init_params(k_params, in_dim)
    x = jax.random.normal(k_x, (N, in_dim, H, W), jnp.float32)   # NCHW like PyTorch

    fwd = jax.jit(lambda xx, pp: pyramid_layer_forward(xx, pp, pool_sizes))
    out = jax.block_until_ready(fwd(x, params))

    assert out.shape == (N, in_dim, H, W), out.shape
    assert bool(jnp.all(jnp.isfinite(out)))
    print("KERNEL_OK")
</pallas_src>

<mosaic_0001>
module attributes {stable_mosaic.version = 11 : i64} {
  func.func @kernel(%arg0: i32, %arg1: memref<1x4x290xf32, #tpu.memory_space<vmem>>, %arg2: memref<8x36xf32, #tpu.memory_space<vmem>>, %arg3: memref<8x1xf32, #tpu.memory_space<vmem>>, %arg4: memref<8x1xf32, #tpu.memory_space<vmem>>, %arg5: memref<1x8x256xf32, #tpu.memory_space<vmem>>) attributes {dimension_semantics = [#tpu.dimension_semantics<parallel>], iteration_bounds = array<i64: 2>, scalar_prefetch = 0 : i64, scratch_operands = 0 : i64, tpu.core_type = #tpu.core_type<tc>, window_params = [{transform_indices = @transform_0, window_bounds = array<i64: 1, 4, 290>}, {pipeline_mode = #tpu.pipeline_mode<synchronous>, transform_indices = @transform_1, window_bounds = array<i64: 8, 36>}, {pipeline_mode = #tpu.pipeline_mode<synchronous>, transform_indices = @transform_2, window_bounds = array<i64: 8, 1>}, {pipeline_mode = #tpu.pipeline_mode<synchronous>, transform_indices = @transform_3, window_bounds = array<i64: 8, 1>}, {transform_indices = @transform_4, window_bounds = array<i64: 1, 8, 256>}]} {
    %c0 = arith.constant 0 : index
    %c0_0 = arith.constant 0 : index
    %c0_1 = arith.constant 0 : index
    %0 = vector.load %arg1[%c0, %c0_0, %c0_1] : memref<1x4x290xf32, #tpu.memory_space<vmem>>, vector<1x4x290xf32>
    %1 = vector.shape_cast %0 : vector<1x4x290xf32> to vector<4x290xf32>
    %2 = tpu.iota {dimensions = array<i32: 1>} : vector<1x256xi32>
    %c16_i32 = arith.constant 16 : i32
    %c0_i32 = arith.constant 0 : i32
    %3 = arith.cmpi eq, %c16_i32, %c0_i32 : i32
    %c1_i32 = arith.constant 1 : i32
    %4 = arith.select %3, %c1_i32, %c16_i32 : i32
    %5 = vector.broadcast %4 : i32 to vector<1x256xi32>
    %6 = arith.remsi %2, %5 : vector<1x256xi32>
    %c0_i32_2 = arith.constant 0 : i32
    %7 = vector.broadcast %c0_i32_2 : i32 to vector<1x256xi32>
    %8 = arith.cmpi ne, %6, %7 : vector<1x256xi32>
    %c0_i32_3 = arith.constant 0 : i32
    %9 = vector.broadcast %c0_i32_3 : i32 to vector<1x256xi32>
    %10 = arith.cmpi slt, %6, %9 : vector<1x256xi32>
    %c0_i32_4 = arith.constant 0 : i32
    %11 = arith.cmpi slt, %4, %c0_i32_4 : i32
    %12 = vector.broadcast %11 : i1 to vector<1x256xi1>
    %13 = vector.broadcast %12 : vector<1x256xi1> to vector<1x256xi1>
    %14 = arith.xori %10, %13 : vector<1x256xi1>
    %15 = arith.andi %14, %8 : vector<1x256xi1>
    %16 = vector.broadcast %4 : i32 to vector<1x256xi32>
    %17 = arith.addi %6, %16 : vector<1x256xi32>
    %18 = arith.select %15, %17, %6 : vector<1x256xi1>, vector<1x256xi32>
    %19 = vector.extract_strided_slice %1 {offsets = [0, 0], sizes = [4, 256], strides = [1, 1]} : vector<4x290xf32> to vector<4x256xf32>
    %c0_i32_5 = arith.constant 0 : i32
    %20 = vector.broadcast %c0_i32_5 : i32 to vector<1x256xi32>
    %21 = arith.cmpi eq, %18, %20 : vector<1x256xi32>
    %cst = arith.constant 0.000000e+00 : f32
    %22 = vector.shape_cast %21 : vector<1x256xi1> to vector<1x256xi1>
    %23 = vector.broadcast %22 : vector<1x256xi1> to vector<4x256xi1>
    %24 = vector.broadcast %cst : f32 to vector<4x256xf32>
    %25 = arith.select %23, %24, %19 : vector<4x256xi1>, vector<4x256xf32>
    %26 = vector.extract_strided_slice %1 {offsets = [0, 1], sizes = [4, 256], strides = [1, 1]} : vector<4x290xf32> to vector<4x256xf32>
    %27 = vector.extract_strided_slice %1 {offsets = [0, 2], sizes = [4, 256], strides = [1, 1]} : vector<4x290xf32> to vector<4x256xf32>
    %c15_i32 = arith.constant 15 : i32
    %28 = vector.broadcast %c15_i32 : i32 to vector<1x256xi32>
    %29 = arith.cmpi eq, %18, %28 : vector<1x256xi32>
    %cst_6 = arith.constant 0.000000e+00 : f32
    %30 = vector.shape_cast %29 : vector<1x256xi1> to vector<1x256xi1>
    %31 = vector.broadcast %30 : vector<1x256xi1> to vector<4x256xi1>
    %32 = vector.broadcast %cst_6 : f32 to vector<4x256xf32>
    %33 = arith.select %31, %32, %27 : vector<4x256xi1>, vector<4x256xf32>
    %34 = vector.extract_strided_slice %1 {offsets = [0, 16], sizes = [4, 256], strides = [1, 1]} : vector<4x290xf32> to vector<4x256xf32>
    %c0_i32_7 = arith.constant 0 : i32
    %35 = vector.broadcast %c0_i32_7 : i32 to vector<1x256xi32>
    %36 = arith.cmpi eq, %18, %35 : vector<1x256xi32>
    %cst_8 = arith.constant 0.000000e+00 : f32
    %37 = vector.shape_cast %36 : vector<1x256xi1> to vector<1x256xi1>
    %38 = vector.broadcast %37 : vector<1x256xi1> to vector<4x256xi1>
    %39 = vector.broadcast %cst_8 : f32 to vector<4x256xf32>
    %40 = arith.select %38, %39, %34 : vector<4x256xi1>, vector<4x256xf32>
    %41 = vector.extract_strided_slice %1 {offsets = [0, 17], sizes = [4, 256], strides = [1, 1]} : vector<4x290xf32> to vector<4x256xf32>
    %42 = vector.extract_strided_slice %1 {offsets = [0, 18], sizes = [4, 256], strides = [1, 1]} : vector<4x290xf32> to vector<4x256xf32>
    %c15_i32_9 = arith.constant 15 : i32
    %43 = vector.broadcast %c15_i32_9 : i32 to vector<1x256xi32>
    %44 = arith.cmpi eq, %18, %43 : vector<1x256xi32>
    %cst_10 = arith.constant 0.000000e+00 : f32
    %45 = vector.shape_cast %44 : vector<1x256xi1> to vector<1x256xi1>
    %46 = vector.broadcast %45 : vector<1x256xi1> to vector<4x256xi1>
    %47 = vector.broadcast %cst_10 : f32 to vector<4x256xf32>
    %48 = arith.select %46, %47, %42 : vector<4x256xi1>, vector<4x256xf32>
    %49 = vector.extract_strided_slice %1 {offsets = [0, 32], sizes = [4, 256], strides = [1, 1]} : vector<4x290xf32> to vector<4x256xf32>
    %c0_i32_11 = arith.constant 0 : i32
    %50 = vector.broadcast %c0_i32_11 : i32 to vector<1x256xi32>
    %51 = arith.cmpi eq, %18, %50 : vector<1x256xi32>
    %cst_12 = arith.constant 0.000000e+00 : f32
    %52 = vector.shape_cast %51 : vector<1x256xi1> to vector<1x256xi1>
    %53 = vector.broadcast %52 : vector<1x256xi1> to vector<4x256xi1>
    %54 = vector.broadcast %cst_12 : f32 to vector<4x256xf32>
    %55 = arith.select %53, %54, %49 : vector<4x256xi1>, vector<4x256xf32>
    %56 = vector.extract_strided_slice %1 {offsets = [0, 33], sizes = [4, 256], strides = [1, 1]} : vector<4x290xf32> to vector<4x256xf32>
    %57 = vector.extract_strided_slice %1 {offsets = [0, 34], sizes = [4, 256], strides = [1, 1]} : vector<4x290xf32> to vector<4x256xf32>
    %c15_i32_13 = arith.constant 15 : i32
    %58 = vector.broadcast %c15_i32_13 : i32 to vector<1x256xi32>
    %59 = arith.cmpi eq, %18, %58 : vector<1x256xi32>
    %cst_14 = arith.constant 0.000000e+00 : f32
    %60 = vector.shape_cast %59 : vector<1x256xi1> to vector<1x256xi1>
    %61 = vector.broadcast %60 : vector<1x256xi1> to vector<4x256xi1>
    %62 = vector.broadcast %cst_14 : f32 to vector<4x256xf32>
    %63 = arith.select %61, %62, %57 : vector<4x256xi1>, vector<4x256xf32>
    %64 = tpu.concatenate %25, %26, %33, %40, %41, %48, %55, %56, %63 in 0 : vector<4x256xf32>, vector<4x256xf32>, vector<4x256xf32>, vector<4x256xf32>, vector<4x256xf32>, vector<4x256xf32>, vector<4x256xf32>, vector<4x256xf32>, vector<4x256xf32> -> vector<36x256xf32>
    %c0_15 = arith.constant 0 : index
    %c0_16 = arith.constant 0 : index
    %65 = vector.load %arg2[%c0_15, %c0_16] : memref<8x36xf32, #tpu.memory_space<vmem>>, vector<8x36xf32>
    %cst_17 = arith.constant dense<0.000000e+00> : vector<8x256xf32>
    %66 = tpu.matmul %65, %64, %cst_17 {dimension_numbers = #tpu.dot_dimension_numbers<[1], [0], [0], [1], [0, 0, 1, 1], [], []>} : vector<8x36xf32>, vector<36x256xf32>, vector<8x256xf32> -> vector<8x256xf32>
    %cst_18 = arith.constant dense<0.000000e+00> : vector<256xf32>
    %67 = vector.multi_reduction <add>, %66, %cst_18 [0] : vector<8x256xf32> to vector<256xf32>
    %68 = vector.shape_cast %67 : vector<256xf32> to vector<1x256xf32>
    %cst_19 = arith.constant 8.000000e+00 : f32
    %69 = vector.broadcast %cst_19 : f32 to vector<1x256xf32>
    %70 = arith.divf %68, %69 : vector<1x256xf32>
    %71 = vector.broadcast %70 : vector<1x256xf32> to vector<8x256xf32>
    %72 = arith.subf %66, %71 : vector<8x256xf32>
    %73 = arith.mulf %72, %72 : vector<8x256xf32>
    %cst_20 = arith.constant dense<0.000000e+00> : vector<256xf32>
    %74 = vector.multi_reduction <add>, %73, %cst_20 [0] : vector<8x256xf32> to vector<256xf32>
    %75 = vector.shape_cast %74 : vector<256xf32> to vector<1x256xf32>
    %cst_21 = arith.constant 8.000000e+00 : f32
    %76 = vector.broadcast %cst_21 : f32 to vector<1x256xf32>
    %77 = arith.divf %75, %76 : vector<1x256xf32>
    %78 = vector.broadcast %70 : vector<1x256xf32> to vector<8x256xf32>
    %79 = arith.subf %66, %78 : vector<8x256xf32>
    %cst_22 = arith.constant 9.99999974E-6 : f32
    %80 = vector.broadcast %cst_22 : f32 to vector<1x256xf32>
    %81 = arith.addf %77, %80 : vector<1x256xf32>
    %82 = math.rsqrt %81 : vector<1x256xf32>
    %83 = vector.broadcast %82 : vector<1x256xf32> to vector<8x256xf32>
    %84 = arith.mulf %79, %83 : vector<8x256xf32>
    %c0_23 = arith.constant 0 : index
    %c0_24 = arith.constant 0 : index
    %85 = vector.load %arg3[%c0_23, %c0_24] : memref<8x1xf32, #tpu.memory_space<vmem>>, vector<8x1xf32>
    %86 = vector.broadcast %85 : vector<8x1xf32> to vector<8x256xf32>
    %87 = arith.mulf %84, %86 : vector<8x256xf32>
    %c0_25 = arith.constant 0 : index
    %c0_26 = arith.constant 0 : index
    %88 = vector.load %arg4[%c0_25, %c0_26] : memref<8x1xf32, #tpu.memory_space<vmem>>, vector<8x1xf32>
    %89 = vector.broadcast %88 : vector<8x1xf32> to vector<8x256xf32>
    %90 = arith.addf %87, %89 : vector<8x256xf32>
    %cst_27 = arith.constant 5.000000e-01 : f32
    %91 = vector.broadcast %cst_27 : f32 to vector<8x256xf32>
    %92 = arith.mulf %91, %90 : vector<8x256xf32>
    %cst_28 = arith.constant 0.707106769 : f32
    %93 = vector.broadcast %cst_28 : f32 to vector<8x256xf32>
    %94 = arith.mulf %90, %93 : vector<8x256xf32>
    %cst_29 = arith.constant 0.000000e+00 : f32
    %95 = vector.broadcast %cst_29 : f32 to vector<8x256xf32>
    %96 = arith.cmpf olt, %94, %95 : vector<8x256xf32>
    %cst_30 = arith.constant -1.000000e+00 : f32
    %cst_31 = arith.constant 1.000000e+00 : f32
    %97 = vector.broadcast %cst_30 : f32 to vector<8x256xf32>
    %98 = vector.broadcast %cst_31 : f32 to vector<8x256xf32>
    %99 = arith.select %96, %97, %98 : vector<8x256xi1>, vector<8x256xf32>
    %100 = math.absf %94 : vector<8x256xf32>
    %cst_32 = arith.constant 0.327591091 : f32
    %101 = vector.broadcast %cst_32 : f32 to vector<8x256xf32>
    %102 = arith.mulf %101, %100 : vector<8x256xf32>
    %cst_33 = arith.constant 1.000000e+00 : f32
    %103 = vector.broadcast %cst_33 : f32 to vector<8x256xf32>
    %104 = arith.addf %103, %102 : vector<8x256xf32>
    %105 = tpu.reciprocal %104 {approx = true} : vector<8x256xf32> -> vector<8x256xf32>
    %cst_34 = arith.constant 1.06140542 : f32
    %106 = vector.broadcast %cst_34 : f32 to vector<8x256xf32>
    %107 = arith.mulf %106, %105 : vector<8x256xf32>
    %cst_35 = arith.constant -1.45315206 : f32
    %108 = vector.broadcast %cst_35 : f32 to vector<8x256xf32>
    %109 = arith.addf %107, %108 : vector<8x256xf32>
    %110 = arith.mulf %109, %105 : vector<8x256xf32>
    %cst_36 = arith.constant 1.42141378 : f32
    %111 = vector.broadcast %cst_36 : f32 to vector<8x256xf32>
    %112 = arith.addf %110, %111 : vector<8x256xf32>
    %113 = arith.mulf %112, %105 : vector<8x256xf32>
    %cst_37 = arith.constant -0.284496725 : f32
    %114 = vector.broadcast %cst_37 : f32 to vector<8x256xf32>
    %115 = arith.addf %113, %114 : vector<8x256xf32>
    %116 = arith.mulf %115, %105 : vector<8x256xf32>
    %cst_38 = arith.constant 0.254829586 : f32
    %117 = vector.broadcast %cst_38 : f32 to vector<8x256xf32>
    %118 = arith.addf %116, %117 : vector<8x256xf32>
    %119 = arith.mulf %118, %105 : vector<8x256xf32>
    %cst_39 = arith.constant 0.000000e+00 : f32
    %120 = vector.broadcast %cst_39 : f32 to vector<8x256xf32>
    %121 = arith.subf %120, %100 : vector<8x256xf32>
    %122 = arith.mulf %121, %100 : vector<8x256xf32>
    %123 = math.exp %122 : vector<8x256xf32>
    %124 = arith.mulf %119, %123 : vector<8x256xf32>
    %cst_40 = arith.constant 1.000000e+00 : f32
    %125 = vector.broadcast %cst_40 : f32 to vector<8x256xf32>
    %126 = arith.subf %125, %124 : vector<8x256xf32>
    %127 = arith.mulf %99, %126 : vector<8x256xf32>
    %cst_41 = arith.constant 1.000000e+00 : f32
    %128 = vector.broadcast %cst_41 : f32 to vector<8x256xf32>
    %129 = arith.addf %128, %127 : vector<8x256xf32>
    %130 = arith.mulf %92, %129 : vector<8x256xf32>
    %c0_42 = arith.constant 0 : index
    %c0_43 = arith.constant 0 : index
    %c0_44 = arith.constant 0 : index
    %131 = vector.load %arg5[%c0_42, %c0_43, %c0_44] : memref<1x8x256xf32, #tpu.memory_space<vmem>>, vector<1x8x256xf32>
    %132 = vector.shape_cast %131 : vector<1x8x256xf32> to vector<8x256xf32>
    %133 = vector.shape_cast %130 : vector<8x256xf32> to vector<1x8x256xf32>
    tpu.vector_store %arg5[%c0_42, %c0_43, %c0_44], %133 {strides = array<i32>} : memref<1x8x256xf32, #tpu.memory_space<vmem>>, vector<1x8x256xf32>,
    return
  }
  func.func @transform_0(%arg0: i32) -> (i32, i32, i32) {
    %c0_i32 = arith.constant 0 : i32
    %c0_i32_0 = arith.constant 0 : i32
    %c0_i32_1 = arith.constant 0 : i32
    return %arg0, %c0_i32, %c0_i32_0 : i32, i32, i32
  }
  func.func @transform_1(%arg0: i32) -> (i32, i32) {
    %c0_i32 = arith.constant 0 : i32
    %c0_i32_0 = arith.constant 0 : i32
    %c0_i32_1 = arith.constant 0 : i32
    return %c0_i32, %c0_i32_0 : i32, i32
  }
  func.func @transform_2(%arg0: i32) -> (i32, i32) {
    %c0_i32 = arith.constant 0 : i32
    %c0_i32_0 = arith.constant 0 : i32
    %c0_i32_1 = arith.constant 0 : i32
    return %c0_i32, %c0_i32_0 : i32, i32
  }
  func.func @transform_3(%arg0: i32) -> (i32, i32) {
    %c0_i32 = arith.constant 0 : i32
    %c0_i32_0 = arith.constant 0 : i32
    %c0_i32_1 = arith.constant 0 : i32
    return %c0_i32, %c0_i32_0 : i32, i32
  }
  func.func @transform_4(%arg0: i32) -> (i32, i32, i32) {
    %c0_i32 = arith.constant 0 : i32
    %c0_i32_0 = arith.constant 0 : i32
    %c0_i32_1 = arith.constant 0 : i32
    return %arg0, %c0_i32, %c0_i32_0 : i32, i32, i32
  }
}

module attributes {stable_mosaic.version = 11 : i64} {
  func.func @kernel(%arg0: i32, %arg1: memref<1x4x290xf32, #tpu.memory_space<vmem>>, %arg2: memref<4x36xf32, #tpu.memory_space<vmem>>, %arg3: memref<4x1xf32, #tpu.memory_space<vmem>>, %arg4: memref<4x1xf32, #tpu.memory_space<vmem>>, %arg5: memref<1x4x256xf32, #tpu.memory_space<vmem>>) attributes {dimension_semantics = [#tpu.dimension_semantics<parallel>], iteration_bounds = array<i64: 2>, scalar_prefetch = 0 : i64, scratch_operands = 0 : i64, tpu.core_type = #tpu.core_type<tc>, window_params = [{transform_indices = @transform_0, window_bounds = array<i64: 1, 4, 290>}, {pipeline_mode = #tpu.pipeline_mode<synchronous>, transform_indices = @transform_1, window_bounds = array<i64: 4, 36>}, {pipeline_mode = #tpu.pipeline_mode<synchronous>, transform_indices = @transform_2, window_bounds = array<i64: 4, 1>}, {pipeline_mode = #tpu.pipeline_mode<synchronous>, transform_indices = @transform_3, window_bounds = array<i64: 4, 1>}, {transform_indices = @transform_4, window_bounds = array<i64: 1, 4, 256>}]} {
    %c0 = arith.constant 0 : index
    %c0_0 = arith.constant 0 : index
    %c0_1 = arith.constant 0 : index
    %0 = vector.load %arg1[%c0, %c0_0, %c0_1] : memref<1x4x290xf32, #tpu.memory_space<vmem>>, vector<1x4x290xf32>
    %1 = vector.shape_cast %0 : vector<1x4x290xf32> to vector<4x290xf32>
    %2 = tpu.iota {dimensions = array<i32: 1>} : vector<1x256xi32>
    %c16_i32 = arith.constant 16 : i32
    %c0_i32 = arith.constant 0 : i32
    %3 = arith.cmpi eq, %c16_i32, %c0_i32 : i32
    %c1_i32 = arith.constant 1 : i32
    %4 = arith.select %3, %c1_i32, %c16_i32 : i32
    %5 = vector.broadcast %4 : i32 to vector<1x256xi32>
    %6 = arith.remsi %2, %5 : vector<1x256xi32>
    %c0_i32_2 = arith.constant 0 : i32
    %7 = vector.broadcast %c0_i32_2 : i32 to vector<1x256xi32>
    %8 = arith.cmpi ne, %6, %7 : vector<1x256xi32>
    %c0_i32_3 = arith.constant 0 : i32
    %9 = vector.broadcast %c0_i32_3 : i32 to vector<1x256xi32>
    %10 = arith.cmpi slt, %6, %9 : vector<1x256xi32>
    %c0_i32_4 = arith.constant 0 : i32
    %11 = arith.cmpi slt, %4, %c0_i32_4 : i32
    %12 = vector.broadcast %11 : i1 to vector<1x256xi1>
    %13 = vector.broadcast %12 : vector<1x256xi1> to vector<1x256xi1>
    %14 = arith.xori %10, %13 : vector<1x256xi1>
    %15 = arith.andi %14, %8 : vector<1x256xi1>
    %16 = vector.broadcast %4 : i32 to vector<1x256xi32>
    %17 = arith.addi %6, %16 : vector<1x256xi32>
    %18 = arith.select %15, %17, %6 : vector<1x256xi1>, vector<1x256xi32>
    %19 = vector.extract_strided_slice %1 {offsets = [0, 0], sizes = [4, 256], strides = [1, 1]} : vector<4x290xf32> to vector<4x256xf32>
    %c0_i32_5 = arith.constant 0 : i32
    %20 = vector.broadcast %c0_i32_5 : i32 to vector<1x256xi32>
    %21 = arith.cmpi eq, %18, %20 : vector<1x256xi32>
    %cst = arith.constant 0.000000e+00 : f32
    %22 = vector.shape_cast %21 : vector<1x256xi1> to vector<1x256xi1>
    %23 = vector.broadcast %22 : vector<1x256xi1> to vector<4x256xi1>
    %24 = vector.broadcast %cst : f32 to vector<4x256xf32>
    %25 = arith.select %23, %24, %19 : vector<4x256xi1>, vector<4x256xf32>
    %26 = vector.extract_strided_slice %1 {offsets = [0, 1], sizes = [4, 256], strides = [1, 1]} : vector<4x290xf32> to vector<4x256xf32>
    %27 = vector.extract_strided_slice %1 {offsets = [0, 2], sizes = [4, 256], strides = [1, 1]} : vector<4x290xf32> to vector<4x256xf32>
    %c15_i32 = arith.constant 15 : i32
    %28 = vector.broadcast %c15_i32 : i32 to vector<1x256xi32>
    %29 = arith.cmpi eq, %18, %28 : vector<1x256xi32>
    %cst_6 = arith.constant 0.000000e+00 : f32
    %30 = vector.shape_cast %29 : vector<1x256xi1> to vector<1x256xi1>
    %31 = vector.broadcast %30 : vector<1x256xi1> to vector<4x256xi1>
    %32 = vector.broadcast %cst_6 : f32 to vector<4x256xf32>
    %33 = arith.select %31, %32, %27 : vector<4x256xi1>, vector<4x256xf32>
    %34 = vector.extract_strided_slice %1 {offsets = [0, 16], sizes = [4, 256], strides = [1, 1]} : vector<4x290xf32> to vector<4x256xf32>
    %c0_i32_7 = arith.constant 0 : i32
    %35 = vector.broadcast %c0_i32_7 : i32 to vector<1x256xi32>
    %36 = arith.cmpi eq, %18, %35 : vector<1x256xi32>
    %cst_8 = arith.constant 0.000000e+00 : f32
    %37 = vector.shape_cast %36 : vector<1x256xi1> to vector<1x256xi1>
    %38 = vector.broadcast %37 : vector<1x256xi1> to vector<4x256xi1>
    %39 = vector.broadcast %cst_8 : f32 to vector<4x256xf32>
    %40 = arith.select %38, %39, %34 : vector<4x256xi1>, vector<4x256xf32>
    %41 = vector.extract_strided_slice %1 {offsets = [0, 17], sizes = [4, 256], strides = [1, 1]} : vector<4x290xf32> to vector<4x256xf32>
    %42 = vector.extract_strided_slice %1 {offsets = [0, 18], sizes = [4, 256], strides = [1, 1]} : vector<4x290xf32> to vector<4x256xf32>
    %c15_i32_9 = arith.constant 15 : i32
    %43 = vector.broadcast %c15_i32_9 : i32 to vector<1x256xi32>
    %44 = arith.cmpi eq, %18, %43 : vector<1x256xi32>
    %cst_10 = arith.constant 0.000000e+00 : f32
    %45 = vector.shape_cast %44 : vector<1x256xi1> to vector<1x256xi1>
    %46 = vector.broadcast %45 : vector<1x256xi1> to vector<4x256xi1>
    %47 = vector.broadcast %cst_10 : f32 to vector<4x256xf32>
    %48 = arith.select %46, %47, %42 : vector<4x256xi1>, vector<4x256xf32>
    %49 = vector.extract_strided_slice %1 {offsets = [0, 32], sizes = [4, 256], strides = [1, 1]} : vector<4x290xf32> to vector<4x256xf32>
    %c0_i32_11 = arith.constant 0 : i32
    %50 = vector.broadcast %c0_i32_11 : i32 to vector<1x256xi32>
    %51 = arith.cmpi eq, %18, %50 : vector<1x256xi32>
    %cst_12 = arith.constant 0.000000e+00 : f32
    %52 = vector.shape_cast %51 : vector<1x256xi1> to vector<1x256xi1>
    %53 = vector.broadcast %52 : vector<1x256xi1> to vector<4x256xi1>
    %54 = vector.broadcast %cst_12 : f32 to vector<4x256xf32>
    %55 = arith.select %53, %54, %49 : vector<4x256xi1>, vector<4x256xf32>
    %56 = vector.extract_strided_slice %1 {offsets = [0, 33], sizes = [4, 256], strides = [1, 1]} : vector<4x290xf32> to vector<4x256xf32>
    %57 = vector.extract_strided_slice %1 {offsets = [0, 34], sizes = [4, 256], strides = [1, 1]} : vector<4x290xf32> to vector<4x256xf32>
    %c15_i32_13 = arith.constant 15 : i32
    %58 = vector.broadcast %c15_i32_13 : i32 to vector<1x256xi32>
    %59 = arith.cmpi eq, %18, %58 : vector<1x256xi32>
    %cst_14 = arith.constant 0.000000e+00 : f32
    %60 = vector.shape_cast %59 : vector<1x256xi1> to vector<1x256xi1>
    %61 = vector.broadcast %60 : vector<1x256xi1> to vector<4x256xi1>
    %62 = vector.broadcast %cst_14 : f32 to vector<4x256xf32>
    %63 = arith.select %61, %62, %57 : vector<4x256xi1>, vector<4x256xf32>
    %64 = tpu.concatenate %25, %26, %33, %40, %41, %48, %55, %56, %63 in 0 : vector<4x256xf32>, vector<4x256xf32>, vector<4x256xf32>, vector<4x256xf32>, vector<4x256xf32>, vector<4x256xf32>, vector<4x256xf32>, vector<4x256xf32>, vector<4x256xf32> -> vector<36x256xf32>
    %c0_15 = arith.constant 0 : index
    %c0_16 = arith.constant 0 : index
    %65 = vector.load %arg2[%c0_15, %c0_16] : memref<4x36xf32, #tpu.memory_space<vmem>>, vector<4x36xf32>
    %cst_17 = arith.constant dense<0.000000e+00> : vector<4x256xf32>
    %66 = tpu.matmul %65, %64, %cst_17 {dimension_numbers = #tpu.dot_dimension_numbers<[1], [0], [0], [1], [0, 0, 1, 1], [], []>} : vector<4x36xf32>, vector<36x256xf32>, vector<4x256xf32> -> vector<4x256xf32>
    %cst_18 = arith.constant dense<0.000000e+00> : vector<256xf32>
    %67 = vector.multi_reduction <add>, %66, %cst_18 [0] : vector<4x256xf32> to vector<256xf32>
    %68 = vector.shape_cast %67 : vector<256xf32> to vector<1x256xf32>
    %cst_19 = arith.constant 4.000000e+00 : f32
    %69 = vector.broadcast %cst_19 : f32 to vector<1x256xf32>
    %70 = arith.divf %68, %69 : vector<1x256xf32>
    %71 = vector.broadcast %70 : vector<1x256xf32> to vector<4x256xf32>
    %72 = arith.subf %66, %71 : vector<4x256xf32>
    %73 = arith.mulf %72, %72 : vector<4x256xf32>
    %cst_20 = arith.constant dense<0.000000e+00> : vector<256xf32>
    %74 = vector.multi_reduction <add>, %73, %cst_20 [0] : vector<4x256xf32> to vector<256xf32>
    %75 = vector.shape_cast %74 : vector<256xf32> to vector<1x256xf32>
    %cst_21 = arith.constant 4.000000e+00 : f32
    %76 = vector.broadcast %cst_21 : f32 to vector<1x256xf32>
    %77 = arith.divf %75, %76 : vector<1x256xf32>
    %78 = vector.broadcast %70 : vector<1x256xf32> to vector<4x256xf32>
    %79 = arith.subf %66, %78 : vector<4x256xf32>
    %cst_22 = arith.constant 9.99999974E-6 : f32
    %80 = vector.broadcast %cst_22 : f32 to vector<1x256xf32>
    %81 = arith.addf %77, %80 : vector<1x256xf32>
    %82 = math.rsqrt %81 : vector<1x256xf32>
    %83 = vector.broadcast %82 : vector<1x256xf32> to vector<4x256xf32>
    %84 = arith.mulf %79, %83 : vector<4x256xf32>
    %c0_23 = arith.constant 0 : index
    %c0_24 = arith.constant 0 : index
    %85 = vector.load %arg3[%c0_23, %c0_24] : memref<4x1xf32, #tpu.memory_space<vmem>>, vector<4x1xf32>
    %86 = vector.broadcast %85 : vector<4x1xf32> to vector<4x256xf32>
    %87 = arith.mulf %84, %86 : vector<4x256xf32>
    %c0_25 = arith.constant 0 : index
    %c0_26 = arith.constant 0 : index
    %88 = vector.load %arg4[%c0_25, %c0_26] : memref<4x1xf32, #tpu.memory_space<vmem>>, vector<4x1xf32>
    %89 = vector.broadcast %88 : vector<4x1xf32> to vector<4x256xf32>
    %90 = arith.addf %87, %89 : vector<4x256xf32>
    %cst_27 = arith.constant 5.000000e-01 : f32
    %91 = vector.broadcast %cst_27 : f32 to vector<4x256xf32>
    %92 = arith.mulf %91, %90 : vector<4x256xf32>
    %cst_28 = arith.constant 0.707106769 : f32
    %93 = vector.broadcast %cst_28 : f32 to vector<4x256xf32>
    %94 = arith.mulf %90, %93 : vector<4x256xf32>
    %cst_29 = arith.constant 0.000000e+00 : f32
    %95 = vector.broadcast %cst_29 : f32 to vector<4x256xf32>
    %96 = arith.cmpf olt, %94, %95 : vector<4x256xf32>
    %cst_30 = arith.constant -1.000000e+00 : f32
    %cst_31 = arith.constant 1.000000e+00 : f32
    %97 = vector.broadcast %cst_30 : f32 to vector<4x256xf32>
    %98 = vector.broadcast %cst_31 : f32 to vector<4x256xf32>
    %99 = arith.select %96, %97, %98 : vector<4x256xi1>, vector<4x256xf32>
    %100 = math.absf %94 : vector<4x256xf32>
    %cst_32 = arith.constant 0.327591091 : f32
    %101 = vector.broadcast %cst_32 : f32 to vector<4x256xf32>
    %102 = arith.mulf %101, %100 : vector<4x256xf32>
    %cst_33 = arith.constant 1.000000e+00 : f32
    %103 = vector.broadcast %cst_33 : f32 to vector<4x256xf32>
    %104 = arith.addf %103, %102 : vector<4x256xf32>
    %105 = tpu.reciprocal %104 {approx = true} : vector<4x256xf32> -> vector<4x256xf32>
    %cst_34 = arith.constant 1.06140542 : f32
    %106 = vector.broadcast %cst_34 : f32 to vector<4x256xf32>
    %107 = arith.mulf %106, %105 : vector<4x256xf32>
    %cst_35 = arith.constant -1.45315206 : f32
    %108 = vector.broadcast %cst_35 : f32 to vector<4x256xf32>
    %109 = arith.addf %107, %108 : vector<4x256xf32>
    %110 = arith.mulf %109, %105 : vector<4x256xf32>
    %cst_36 = arith.constant 1.42141378 : f32
    %111 = vector.broadcast %cst_36 : f32 to vector<4x256xf32>
    %112 = arith.addf %110, %111 : vector<4x256xf32>
    %113 = arith.mulf %112, %105 : vector<4x256xf32>
    %cst_37 = arith.constant -0.284496725 : f32
    %114 = vector.broadcast %cst_37 : f32 to vector<4x256xf32>
    %115 = arith.addf %113, %114 : vector<4x256xf32>
    %116 = arith.mulf %115, %105 : vector<4x256xf32>
    %cst_38 = arith.constant 0.254829586 : f32
    %117 = vector.broadcast %cst_38 : f32 to vector<4x256xf32>
    %118 = arith.addf %116, %117 : vector<4x256xf32>
    %119 = arith.mulf %118, %105 : vector<4x256xf32>
    %cst_39 = arith.constant 0.000000e+00 : f32
    %120 = vector.broadcast %cst_39 : f32 to vector<4x256xf32>
    %121 = arith.subf %120, %100 : vector<4x256xf32>
    %122 = arith.mulf %121, %100 : vector<4x256xf32>
    %123 = math.exp %122 : vector<4x256xf32>
    %124 = arith.mulf %119, %123 : vector<4x256xf32>
    %cst_40 = arith.constant 1.000000e+00 : f32
    %125 = vector.broadcast %cst_40 : f32 to vector<4x256xf32>
    %126 = arith.subf %125, %124 : vector<4x256xf32>
    %127 = arith.mulf %99, %126 : vector<4x256xf32>
    %cst_41 = arith.constant 1.000000e+00 : f32
    %128 = vector.broadcast %cst_41 : f32 to vector<4x256xf32>
    %129 = arith.addf %128, %127 : vector<4x256xf32>
    %130 = arith.mulf %92, %129 : vector<4x256xf32>
    %c0_42 = arith.constant 0 : index
    %c0_43 = arith.constant 0 : index
    %c0_44 = arith.constant 0 : index
    %131 = vector.load %arg5[%c0_42, %c0_43, %c0_44] : memref<1x4x256xf32, #tpu.memory_space<vmem>>, vector<1x4x256xf32>
    %132 = vector.shape_cast %131 : vector<1x4x256xf32> to vector<4x256xf32>
    %133 = vector.shape_cast %130 : vector<4x256xf32> to vector<1x4x256xf32>
    tpu.vector_store %arg5[%c0_42, %c0_43, %c0_44], %133 {strides = array<i32>} : memref<1x4x256xf32, #tpu.memory_space<vmem>>, vector<1x4x256xf32>,
    return
  }
  func.func @transform_0(%arg0: i32) -> (i32, i32, i32) {
    %c0_i32 = arith.constant 0 : i32
    %c0_i32_0 = arith.constant 0 : i32
    %c0_i32_1 = arith.constant 0 : i32
    return %arg0, %c0_i32, %c0_i32_0 : i32, i32, i32
  }
  func.func @transform_1(%arg0: i32) -> (i32, i32) {
    %c0_i32 = arith.constant 0 : i32
    %c0_i32_0 = arith.constant 0 : i32
    %c0_i32_1 = arith.constant 0 : i32
    return %c0_i32, %c0_i32_0 : i32, i32
  }
  func.func @transform_2(%arg0: i32) -> (i32, i32) {
    %c0_i32 = arith.constant 0 : i32
    %c0_i32_0 = arith.constant 0 : i32
    %c0_i32_1 = arith.constant 0 : i32
    return %c0_i32, %c0_i32_0 : i32, i32
  }
  func.func @transform_3(%arg0: i32) -> (i32, i32) {
    %c0_i32 = arith.constant 0 : i32
    %c0_i32_0 = arith.constant 0 : i32
    %c0_i32_1 = arith.constant 0 : i32
    return %c0_i32, %c0_i32_0 : i32, i32
  }
  func.func @transform_4(%arg0: i32) -> (i32, i32, i32) {
    %c0_i32 = arith.constant 0 : i32
    %c0_i32_0 = arith.constant 0 : i32
    %c0_i32_1 = arith.constant 0 : i32
    return %arg0, %c0_i32, %c0_i32_0 : i32, i32, i32
  }
}

module attributes {stable_mosaic.version = 11 : i64} {
  func.func @kernel(%arg0: i32, %arg1: memref<1x8x290xf32, #tpu.memory_space<vmem>>, %arg2: memref<8x72xf32, #tpu.memory_space<vmem>>, %arg3: memref<8x1xf32, #tpu.memory_space<vmem>>, %arg4: memref<8x1xf32, #tpu.memory_space<vmem>>, %arg5: memref<1x8x256xf32, #tpu.memory_space<vmem>>, %arg6: memref<1x8x256xf32, #tpu.memory_space<vmem>>) attributes {dimension_semantics = [#tpu.dimension_semantics<parallel>], iteration_bounds = array<i64: 2>, scalar_prefetch = 0 : i64, scratch_operands = 0 : i64, tpu.core_type = #tpu.core_type<tc>, window_params = [{transform_indices = @transform_0, window_bounds = array<i64: 1, 8, 290>}, {pipeline_mode = #tpu.pipeline_mode<synchronous>, transform_indices = @transform_1, window_bounds = array<i64: 8, 72>}, {pipeline_mode = #tpu.pipeline_mode<synchronous>, transform_indices = @transform_2, window_bounds = array<i64: 8, 1>}, {pipeline_mode = #tpu.pipeline_mode<synchronous>, transform_indices = @transform_3, window_bounds = array<i64: 8, 1>}, {transform_indices = @transform_4, window_bounds = array<i64: 1, 8, 256>}, {transform_indices = @transform_5, window_bounds = array<i64: 1, 8, 256>}]} {
    %c0 = arith.constant 0 : index
    %c0_0 = arith.constant 0 : index
    %c0_1 = arith.constant 0 : index
    %0 = vector.load %arg1[%c0, %c0_0, %c0_1] : memref<1x8x290xf32, #tpu.memory_space<vmem>>, vector<1x8x290xf32>
    %1 = vector.shape_cast %0 : vector<1x8x290xf32> to vector<8x290xf32>
    %2 = tpu.iota {dimensions = array<i32: 1>} : vector<1x256xi32>
    %c16_i32 = arith.constant 16 : i32
    %c0_i32 = arith.constant 0 : i32
    %3 = arith.cmpi eq, %c16_i32, %c0_i32 : i32
    %c1_i32 = arith.constant 1 : i32
    %4 = arith.select %3, %c1_i32, %c16_i32 : i32
    %5 = vector.broadcast %4 : i32 to vector<1x256xi32>
    %6 = arith.remsi %2, %5 : vector<1x256xi32>
    %c0_i32_2 = arith.constant 0 : i32
    %7 = vector.broadcast %c0_i32_2 : i32 to vector<1x256xi32>
    %8 = arith.cmpi ne, %6, %7 : vector<1x256xi32>
    %c0_i32_3 = arith.constant 0 : i32
    %9 = vector.broadcast %c0_i32_3 : i32 to vector<1x256xi32>
    %10 = arith.cmpi slt, %6, %9 : vector<1x256xi32>
    %c0_i32_4 = arith.constant 0 : i32
    %11 = arith.cmpi slt, %4, %c0_i32_4 : i32
    %12 = vector.broadcast %11 : i1 to vector<1x256xi1>
    %13 = vector.broadcast %12 : vector<1x256xi1> to vector<1x256xi1>
    %14 = arith.xori %10, %13 : vector<1x256xi1>
    %15 = arith.andi %14, %8 : vector<1x256xi1>
    %16 = vector.broadcast %4 : i32 to vector<1x256xi32>
    %17 = arith.addi %6, %16 : vector<1x256xi32>
    %18 = arith.select %15, %17, %6 : vector<1x256xi1>, vector<1x256xi32>
    %19 = vector.extract_strided_slice %1 {offsets = [0, 0], sizes = [8, 256], strides = [1, 1]} : vector<8x290xf32> to vector<8x256xf32>
    %c0_i32_5 = arith.constant 0 : i32
    %20 = vector.broadcast %c0_i32_5 : i32 to vector<1x256xi32>
    %21 = arith.cmpi eq, %18, %20 : vector<1x256xi32>
    %cst = arith.constant 0.000000e+00 : f32
    %22 = vector.shape_cast %21 : vector<1x256xi1> to vector<1x256xi1>
    %23 = vector.broadcast %22 : vector<1x256xi1> to vector<8x256xi1>
    %24 = vector.broadcast %cst : f32 to vector<8x256xf32>
    %25 = arith.select %23, %24, %19 : vector<8x256xi1>, vector<8x256xf32>
    %26 = vector.extract_strided_slice %1 {offsets = [0, 1], sizes = [8, 256], strides = [1, 1]} : vector<8x290xf32> to vector<8x256xf32>
    %27 = vector.extract_strided_slice %1 {offsets = [0, 2], sizes = [8, 256], strides = [1, 1]} : vector<8x290xf32> to vector<8x256xf32>
    %c15_i32 = arith.constant 15 : i32
    %28 = vector.broadcast %c15_i32 : i32 to vector<1x256xi32>
    %29 = arith.cmpi eq, %18, %28 : vector<1x256xi32>
    %cst_6 = arith.constant 0.000000e+00 : f32
    %30 = vector.shape_cast %29 : vector<1x256xi1> to vector<1x256xi1>
    %31 = vector.broadcast %30 : vector<1x256xi1> to vector<8x256xi1>
    %32 = vector.broadcast %cst_6 : f32 to vector<8x256xf32>
    %33 = arith.select %31, %32, %27 : vector<8x256xi1>, vector<8x256xf32>
    %34 = vector.extract_strided_slice %1 {offsets = [0, 16], sizes = [8, 256], strides = [1, 1]} : vector<8x290xf32> to vector<8x256xf32>
    %c0_i32_7 = arith.constant 0 : i32
    %35 = vector.broadcast %c0_i32_7 : i32 to vector<1x256xi32>
    %36 = arith.cmpi eq, %18, %35 : vector<1x256xi32>
    %cst_8 = arith.constant 0.000000e+00 : f32
    %37 = vector.shape_cast %36 : vector<1x256xi1> to vector<1x256xi1>
    %38 = vector.broadcast %37 : vector<1x256xi1> to vector<8x256xi1>
    %39 = vector.broadcast %cst_8 : f32 to vector<8x256xf32>
    %40 = arith.select %38, %39, %34 : vector<8x256xi1>, vector<8x256xf32>
    %41 = vector.extract_strided_slice %1 {offsets = [0, 17], sizes = [8, 256], strides = [1, 1]} : vector<8x290xf32> to vector<8x256xf32>
    %42 = vector.extract_strided_slice %1 {offsets = [0, 18], sizes = [8, 256], strides = [1, 1]} : vector<8x290xf32> to vector<8x256xf32>
    %c15_i32_9 = arith.constant 15 : i32
    %43 = vector.broadcast %c15_i32_9 : i32 to vector<1x256xi32>
    %44 = arith.cmpi eq, %18, %43 : vector<1x256xi32>
    %cst_10 = arith.constant 0.000000e+00 : f32
    %45 = vector.shape_cast %44 : vector<1x256xi1> to vector<1x256xi1>
    %46 = vector.broadcast %45 : vector<1x256xi1> to vector<8x256xi1>
    %47 = vector.broadcast %cst_10 : f32 to vector<8x256xf32>
    %48 = arith.select %46, %47, %42 : vector<8x256xi1>, vector<8x256xf32>
    %49 = vector.extract_strided_slice %1 {offsets = [0, 32], sizes = [8, 256], strides = [1, 1]} : vector<8x290xf32> to vector<8x256xf32>
    %c0_i32_11 = arith.constant 0 : i32
    %50 = vector.broadcast %c0_i32_11 : i32 to vector<1x256xi32>
    %51 = arith.cmpi eq, %18, %50 : vector<1x256xi32>
    %cst_12 = arith.constant 0.000000e+00 : f32
    %52 = vector.shape_cast %51 : vector<1x256xi1> to vector<1x256xi1>
    %53 = vector.broadcast %52 : vector<1x256xi1> to vector<8x256xi1>
    %54 = vector.broadcast %cst_12 : f32 to vector<8x256xf32>
    %55 = arith.select %53, %54, %49 : vector<8x256xi1>, vector<8x256xf32>
    %56 = vector.extract_strided_slice %1 {offsets = [0, 33], sizes = [8, 256], strides = [1, 1]} : vector<8x290xf32> to vector<8x256xf32>
    %57 = vector.extract_strided_slice %1 {offsets = [0, 34], sizes = [8, 256], strides = [1, 1]} : vector<8x290xf32> to vector<8x256xf32>
    %c15_i32_13 = arith.constant 15 : i32
    %58 = vector.broadcast %c15_i32_13 : i32 to vector<1x256xi32>
    %59 = arith.cmpi eq, %18, %58 : vector<1x256xi32>
    %cst_14 = arith.constant 0.000000e+00 : f32
    %60 = vector.shape_cast %59 : vector<1x256xi1> to vector<1x256xi1>
    %61 = vector.broadcast %60 : vector<1x256xi1> to vector<8x256xi1>
    %62 = vector.broadcast %cst_14 : f32 to vector<8x256xf32>
    %63 = arith.select %61, %62, %57 : vector<8x256xi1>, vector<8x256xf32>
    %64 = tpu.concatenate %25, %26, %33, %40, %41, %48, %55, %56, %63 in 0 : vector<8x256xf32>, vector<8x256xf32>, vector<8x256xf32>, vector<8x256xf32>, vector<8x256xf32>, vector<8x256xf32>, vector<8x256xf32>, vector<8x256xf32>, vector<8x256xf32> -> vector<72x256xf32>
    %c0_15 = arith.constant 0 : index
    %c0_16 = arith.constant 0 : index
    %65 = vector.load %arg2[%c0_15, %c0_16] : memref<8x72xf32, #tpu.memory_space<vmem>>, vector<8x72xf32>
    %cst_17 = arith.constant dense<0.000000e+00> : vector<8x256xf32>
    %66 = tpu.matmul %65, %64, %cst_17 {dimension_numbers = #tpu.dot_dimension_numbers<[1], [0], [0], [1], [0, 0, 1, 1], [], []>} : vector<8x72xf32>, vector<72x256xf32>, vector<8x256xf32> -> vector<8x256xf32>
    %cst_18 = arith.constant dense<0.000000e+00> : vector<256xf32>
    %67 = vector.multi_reduction <add>, %66, %cst_18 [0] : vector<8x256xf32> to vector<256xf32>
    %68 = vector.shape_cast %67 : vector<256xf32> to vector<1x256xf32>
    %cst_19 = arith.constant 8.000000e+00 : f32
    %69 = vector.broadcast %cst_19 : f32 to vector<1x256xf32>
    %70 = arith.divf %68, %69 : vector<1x256xf32>
    %71 = vector.broadcast %70 : vector<1x256xf32> to vector<8x256xf32>
    %72 = arith.subf %66, %71 : vector<8x256xf32>
    %73 = arith.mulf %72, %72 : vector<8x256xf32>
    %cst_20 = arith.constant dense<0.000000e+00> : vector<256xf32>
    %74 = vector.multi_reduction <add>, %73, %cst_20 [0] : vector<8x256xf32> to vector<256xf32>
    %75 = vector.shape_cast %74 : vector<256xf32> to vector<1x256xf32>
    %cst_21 = arith.constant 8.000000e+00 : f32
    %76 = vector.broadcast %cst_21 : f32 to vector<1x256xf32>
    %77 = arith.divf %75, %76 : vector<1x256xf32>
    %78 = vector.broadcast %70 : vector<1x256xf32> to vector<8x256xf32>
    %79 = arith.subf %66, %78 : vector<8x256xf32>
    %cst_22 = arith.constant 9.99999974E-6 : f32
    %80 = vector.broadcast %cst_22 : f32 to vector<1x256xf32>
    %81 = arith.addf %77, %80 : vector<1x256xf32>
    %82 = math.rsqrt %81 : vector<1x256xf32>
    %83 = vector.broadcast %82 : vector<1x256xf32> to vector<8x256xf32>
    %84 = arith.mulf %79, %83 : vector<8x256xf32>
    %c0_23 = arith.constant 0 : index
    %c0_24 = arith.constant 0 : index
    %85 = vector.load %arg3[%c0_23, %c0_24] : memref<8x1xf32, #tpu.memory_space<vmem>>, vector<8x1xf32>
    %86 = vector.broadcast %85 : vector<8x1xf32> to vector<8x256xf32>
    %87 = arith.mulf %84, %86 : vector<8x256xf32>
    %c0_25 = arith.constant 0 : index
    %c0_26 = arith.constant 0 : index
    %88 = vector.load %arg4[%c0_25, %c0_26] : memref<8x1xf32, #tpu.memory_space<vmem>>, vector<8x1xf32>
    %89 = vector.broadcast %88 : vector<8x1xf32> to vector<8x256xf32>
    %90 = arith.addf %87, %89 : vector<8x256xf32>
    %c0_27 = arith.constant 0 : index
    %c0_28 = arith.constant 0 : index
    %c0_29 = arith.constant 0 : index
    %91 = vector.load %arg5[%c0_27, %c0_28, %c0_29] : memref<1x8x256xf32, #tpu.memory_space<vmem>>, vector<1x8x256xf32>
    %92 = vector.shape_cast %91 : vector<1x8x256xf32> to vector<8x256xf32>
    %93 = arith.addf %90, %92 : vector<8x256xf32>
    %c0_30 = arith.constant 0 : index
    %c0_31 = arith.constant 0 : index
    %c0_32 = arith.constant 0 : index
    %94 = vector.load %arg6[%c0_30, %c0_31, %c0_32] : memref<1x8x256xf32, #tpu.memory_space<vmem>>, vector<1x8x256xf32>
    %95 = vector.shape_cast %94 : vector<1x8x256xf32> to vector<8x256xf32>
    %96 = vector.shape_cast %93 : vector<8x256xf32> to vector<1x8x256xf32>
    tpu.vector_store %arg6[%c0_30, %c0_31, %c0_32], %96 {strides = array<i32>} : memref<1x8x256xf32, #tpu.memory_space<vmem>>, vector<1x8x256xf32>,
    return
  }
  func.func @transform_0(%arg0: i32) -> (i32, i32, i32) {
    %c0_i32 = arith.constant 0 : i32
    %c0_i32_0 = arith.constant 0 : i32
    %c0_i32_1 = arith.constant 0 : i32
    return %arg0, %c0_i32, %c0_i32_0 : i32, i32, i32
  }
  func.func @transform_1(%arg0: i32) -> (i32, i32) {
    %c0_i32 = arith.constant 0 : i32
    %c0_i32_0 = arith.constant 0 : i32
    %c0_i32_1 = arith.constant 0 : i32
    return %c0_i32, %c0_i32_0 : i32, i32
  }
  func.func @transform_2(%arg0: i32) -> (i32, i32) {
    %c0_i32 = arith.constant 0 : i32
    %c0_i32_0 = arith.constant 0 : i32
    %c0_i32_1 = arith.constant 0 : i32
    return %c0_i32, %c0_i32_0 : i32, i32
  }
  func.func @transform_3(%arg0: i32) -> (i32, i32) {
    %c0_i32 = arith.constant 0 : i32
    %c0_i32_0 = arith.constant 0 : i32
    %c0_i32_1 = arith.constant 0 : i32
    return %c0_i32, %c0_i32_0 : i32, i32
  }
  func.func @transform_4(%arg0: i32) -> (i32, i32, i32) {
    %c0_i32 = arith.constant 0 : i32
    %c0_i32_0 = arith.constant 0 : i32
    %c0_i32_1 = arith.constant 0 : i32
    return %arg0, %c0_i32, %c0_i32_0 : i32, i32, i32
  }
  func.func @transform_5(%arg0: i32) -> (i32, i32, i32) {
    %c0_i32 = arith.constant 0 : i32
    %c0_i32_0 = arith.constant 0 : i32
    %c0_i32_1 = arith.constant 0 : i32
    return %arg0, %c0_i32, %c0_i32_0 : i32, i32, i32
  }
}

module attributes {stable_mosaic.version = 11 : i64} {
  func.func @kernel(%arg0: i32, %arg1: memref<1x8x290xf32, #tpu.memory_space<vmem>>, %arg2: memref<8x72xf32, #tpu.memory_space<vmem>>, %arg3: memref<8x1xf32, #tpu.memory_space<vmem>>, %arg4: memref<8x1xf32, #tpu.memory_space<vmem>>, %arg5: memref<1x8x256xf32, #tpu.memory_space<vmem>>) attributes {dimension_semantics = [#tpu.dimension_semantics<parallel>], iteration_bounds = array<i64: 2>, scalar_prefetch = 0 : i64, scratch_operands = 0 : i64, tpu.core_type = #tpu.core_type<tc>, window_params = [{transform_indices = @transform_0, window_bounds = array<i64: 1, 8, 290>}, {pipeline_mode = #tpu.pipeline_mode<synchronous>, transform_indices = @transform_1, window_bounds = array<i64: 8, 72>}, {pipeline_mode = #tpu.pipeline_mode<synchronous>, transform_indices = @transform_2, window_bounds = array<i64: 8, 1>}, {pipeline_mode = #tpu.pipeline_mode<synchronous>, transform_indices = @transform_3, window_bounds = array<i64: 8, 1>}, {transform_indices = @transform_4, window_bounds = array<i64: 1, 8, 256>}]} {
    %c0 = arith.constant 0 : index
    %c0_0 = arith.constant 0 : index
    %c0_1 = arith.constant 0 : index
    %0 = vector.load %arg1[%c0, %c0_0, %c0_1] : memref<1x8x290xf32, #tpu.memory_space<vmem>>, vector<1x8x290xf32>
    %1 = vector.shape_cast %0 : vector<1x8x290xf32> to vector<8x290xf32>
    %2 = tpu.iota {dimensions = array<i32: 1>} : vector<1x256xi32>
    %c16_i32 = arith.constant 16 : i32
    %c0_i32 = arith.constant 0 : i32
    %3 = arith.cmpi eq, %c16_i32, %c0_i32 : i32
    %c1_i32 = arith.constant 1 : i32
    %4 = arith.select %3, %c1_i32, %c16_i32 : i32
    %5 = vector.broadcast %4 : i32 to vector<1x256xi32>
    %6 = arith.remsi %2, %5 : vector<1x256xi32>
    %c0_i32_2 = arith.constant 0 : i32
    %7 = vector.broadcast %c0_i32_2 : i32 to vector<1x256xi32>
    %8 = arith.cmpi ne, %6, %7 : vector<1x256xi32>
    %c0_i32_3 = arith.constant 0 : i32
    %9 = vector.broadcast %c0_i32_3 : i32 to vector<1x256xi32>
    %10 = arith.cmpi slt, %6, %9 : vector<1x256xi32>
    %c0_i32_4 = arith.constant 0 : i32
    %11 = arith.cmpi slt, %4, %c0_i32_4 : i32
    %12 = vector.broadcast %11 : i1 to vector<1x256xi1>
    %13 = vector.broadcast %12 : vector<1x256xi1> to vector<1x256xi1>
    %14 = arith.xori %10, %13 : vector<1x256xi1>
    %15 = arith.andi %14, %8 : vector<1x256xi1>
    %16 = vector.broadcast %4 : i32 to vector<1x256xi32>
    %17 = arith.addi %6, %16 : vector<1x256xi32>
    %18 = arith.select %15, %17, %6 : vector<1x256xi1>, vector<1x256xi32>
    %19 = vector.extract_strided_slice %1 {offsets = [0, 0], sizes = [8, 256], strides = [1, 1]} : vector<8x290xf32> to vector<8x256xf32>
    %c0_i32_5 = arith.constant 0 : i32
    %20 = vector.broadcast %c0_i32_5 : i32 to vector<1x256xi32>
    %21 = arith.cmpi eq, %18, %20 : vector<1x256xi32>
    %cst = arith.constant 0.000000e+00 : f32
    %22 = vector.shape_cast %21 : vector<1x256xi1> to vector<1x256xi1>
    %23 = vector.broadcast %22 : vector<1x256xi1> to vector<8x256xi1>
    %24 = vector.broadcast %cst : f32 to vector<8x256xf32>
    %25 = arith.select %23, %24, %19 : vector<8x256xi1>, vector<8x256xf32>
    %26 = vector.extract_strided_slice %1 {offsets = [0, 1], sizes = [8, 256], strides = [1, 1]} : vector<8x290xf32> to vector<8x256xf32>
    %27 = vector.extract_strided_slice %1 {offsets = [0, 2], sizes = [8, 256], strides = [1, 1]} : vector<8x290xf32> to vector<8x256xf32>
    %c15_i32 = arith.constant 15 : i32
    %28 = vector.broadcast %c15_i32 : i32 to vector<1x256xi32>
    %29 = arith.cmpi eq, %18, %28 : vector<1x256xi32>
    %cst_6 = arith.constant 0.000000e+00 : f32
    %30 = vector.shape_cast %29 : vector<1x256xi1> to vector<1x256xi1>
    %31 = vector.broadcast %30 : vector<1x256xi1> to vector<8x256xi1>
    %32 = vector.broadcast %cst_6 : f32 to vector<8x256xf32>
    %33 = arith.select %31, %32, %27 : vector<8x256xi1>, vector<8x256xf32>
    %34 = vector.extract_strided_slice %1 {offsets = [0, 16], sizes = [8, 256], strides = [1, 1]} : vector<8x290xf32> to vector<8x256xf32>
    %c0_i32_7 = arith.constant 0 : i32
    %35 = vector.broadcast %c0_i32_7 : i32 to vector<1x256xi32>
    %36 = arith.cmpi eq, %18, %35 : vector<1x256xi32>
    %cst_8 = arith.constant 0.000000e+00 : f32
    %37 = vector.shape_cast %36 : vector<1x256xi1> to vector<1x256xi1>
    %38 = vector.broadcast %37 : vector<1x256xi1> to vector<8x256xi1>
    %39 = vector.broadcast %cst_8 : f32 to vector<8x256xf32>
    %40 = arith.select %38, %39, %34 : vector<8x256xi1>, vector<8x256xf32>
    %41 = vector.extract_strided_slice %1 {offsets = [0, 17], sizes = [8, 256], strides = [1, 1]} : vector<8x290xf32> to vector<8x256xf32>
    %42 = vector.extract_strided_slice %1 {offsets = [0, 18], sizes = [8, 256], strides = [1, 1]} : vector<8x290xf32> to vector<8x256xf32>
    %c15_i32_9 = arith.constant 15 : i32
    %43 = vector.broadcast %c15_i32_9 : i32 to vector<1x256xi32>
    %44 = arith.cmpi eq, %18, %43 : vector<1x256xi32>
    %cst_10 = arith.constant 0.000000e+00 : f32
    %45 = vector.shape_cast %44 : vector<1x256xi1> to vector<1x256xi1>
    %46 = vector.broadcast %45 : vector<1x256xi1> to vector<8x256xi1>
    %47 = vector.broadcast %cst_10 : f32 to vector<8x256xf32>
    %48 = arith.select %46, %47, %42 : vector<8x256xi1>, vector<8x256xf32>
    %49 = vector.extract_strided_slice %1 {offsets = [0, 32], sizes = [8, 256], strides = [1, 1]} : vector<8x290xf32> to vector<8x256xf32>
    %c0_i32_11 = arith.constant 0 : i32
    %50 = vector.broadcast %c0_i32_11 : i32 to vector<1x256xi32>
    %51 = arith.cmpi eq, %18, %50 : vector<1x256xi32>
    %cst_12 = arith.constant 0.000000e+00 : f32
    %52 = vector.shape_cast %51 : vector<1x256xi1> to vector<1x256xi1>
    %53 = vector.broadcast %52 : vector<1x256xi1> to vector<8x256xi1>
    %54 = vector.broadcast %cst_12 : f32 to vector<8x256xf32>
    %55 = arith.select %53, %54, %49 : vector<8x256xi1>, vector<8x256xf32>
    %56 = vector.extract_strided_slice %1 {offsets = [0, 33], sizes = [8, 256], strides = [1, 1]} : vector<8x290xf32> to vector<8x256xf32>
    %57 = vector.extract_strided_slice %1 {offsets = [0, 34], sizes = [8, 256], strides = [1, 1]} : vector<8x290xf32> to vector<8x256xf32>
    %c15_i32_13 = arith.constant 15 : i32
    %58 = vector.broadcast %c15_i32_13 : i32 to vector<1x256xi32>
    %59 = arith.cmpi eq, %18, %58 : vector<1x256xi32>
    %cst_14 = arith.constant 0.000000e+00 : f32
    %60 = vector.shape_cast %59 : vector<1x256xi1> to vector<1x256xi1>
    %61 = vector.broadcast %60 : vector<1x256xi1> to vector<8x256xi1>
    %62 = vector.broadcast %cst_14 : f32 to vector<8x256xf32>
    %63 = arith.select %61, %62, %57 : vector<8x256xi1>, vector<8x256xf32>
    %64 = tpu.concatenate %25, %26, %33, %40, %41, %48, %55, %56, %63 in 0 : vector<8x256xf32>, vector<8x256xf32>, vector<8x256xf32>, vector<8x256xf32>, vector<8x256xf32>, vector<8x256xf32>, vector<8x256xf32>, vector<8x256xf32>, vector<8x256xf32> -> vector<72x256xf32>
    %c0_15 = arith.constant 0 : index
    %c0_16 = arith.constant 0 : index
    %65 = vector.load %arg2[%c0_15, %c0_16] : memref<8x72xf32, #tpu.memory_space<vmem>>, vector<8x72xf32>
    %cst_17 = arith.constant dense<0.000000e+00> : vector<8x256xf32>
    %66 = tpu.matmul %65, %64, %cst_17 {dimension_numbers = #tpu.dot_dimension_numbers<[1], [0], [0], [1], [0, 0, 1, 1], [], []>} : vector<8x72xf32>, vector<72x256xf32>, vector<8x256xf32> -> vector<8x256xf32>
    %cst_18 = arith.constant dense<0.000000e+00> : vector<256xf32>
    %67 = vector.multi_reduction <add>, %66, %cst_18 [0] : vector<8x256xf32> to vector<256xf32>
    %68 = vector.shape_cast %67 : vector<256xf32> to vector<1x256xf32>
    %cst_19 = arith.constant 8.000000e+00 : f32
    %69 = vector.broadcast %cst_19 : f32 to vector<1x256xf32>
    %70 = arith.divf %68, %69 : vector<1x256xf32>
    %71 = vector.broadcast %70 : vector<1x256xf32> to vector<8x256xf32>
    %72 = arith.subf %66, %71 : vector<8x256xf32>
    %73 = arith.mulf %72, %72 : vector<8x256xf32>
    %cst_20 = arith.constant dense<0.000000e+00> : vector<256xf32>
    %74 = vector.multi_reduction <add>, %73, %cst_20 [0] : vector<8x256xf32> to vector<256xf32>
    %75 = vector.shape_cast %74 : vector<256xf32> to vector<1x256xf32>
    %cst_21 = arith.constant 8.000000e+00 : f32
    %76 = vector.broadcast %cst_21 : f32 to vector<1x256xf32>
    %77 = arith.divf %75, %76 : vector<1x256xf32>
    %78 = vector.broadcast %70 : vector<1x256xf32> to vector<8x256xf32>
    %79 = arith.subf %66, %78 : vector<8x256xf32>
    %cst_22 = arith.constant 9.99999974E-6 : f32
    %80 = vector.broadcast %cst_22 : f32 to vector<1x256xf32>
    %81 = arith.addf %77, %80 : vector<1x256xf32>
    %82 = math.rsqrt %81 : vector<1x256xf32>
    %83 = vector.broadcast %82 : vector<1x256xf32> to vector<8x256xf32>
    %84 = arith.mulf %79, %83 : vector<8x256xf32>
    %c0_23 = arith.constant 0 : index
    %c0_24 = arith.constant 0 : index
    %85 = vector.load %arg3[%c0_23, %c0_24] : memref<8x1xf32, #tpu.memory_space<vmem>>, vector<8x1xf32>
    %86 = vector.broadcast %85 : vector<8x1xf32> to vector<8x256xf32>
    %87 = arith.mulf %84, %86 : vector<8x256xf32>
    %c0_25 = arith.constant 0 : index
    %c0_26 = arith.constant 0 : index
    %88 = vector.load %arg4[%c0_25, %c0_26] : memref<8x1xf32, #tpu.memory_space<vmem>>, vector<8x1xf32>
    %89 = vector.broadcast %88 : vector<8x1xf32> to vector<8x256xf32>
    %90 = arith.addf %87, %89 : vector<8x256xf32>
    %cst_27 = arith.constant 5.000000e-01 : f32
    %91 = vector.broadcast %cst_27 : f32 to vector<8x256xf32>
    %92 = arith.mulf %91, %90 : vector<8x256xf32>
    %cst_28 = arith.constant 0.707106769 : f32
    %93 = vector.broadcast %cst_28 : f32 to vector<8x256xf32>
    %94 = arith.mulf %90, %93 : vector<8x256xf32>
    %cst_29 = arith.constant 0.000000e+00 : f32
    %95 = vector.broadcast %cst_29 : f32 to vector<8x256xf32>
    %96 = arith.cmpf olt, %94, %95 : vector<8x256xf32>
    %cst_30 = arith.constant -1.000000e+00 : f32
    %cst_31 = arith.constant 1.000000e+00 : f32
    %97 = vector.broadcast %cst_30 : f32 to vector<8x256xf32>
    %98 = vector.broadcast %cst_31 : f32 to vector<8x256xf32>
    %99 = arith.select %96, %97, %98 : vector<8x256xi1>, vector<8x256xf32>
    %100 = math.absf %94 : vector<8x256xf32>
    %cst_32 = arith.constant 0.327591091 : f32
    %101 = vector.broadcast %cst_32 : f32 to vector<8x256xf32>
    %102 = arith.mulf %101, %100 : vector<8x256xf32>
    %cst_33 = arith.constant 1.000000e+00 : f32
    %103 = vector.broadcast %cst_33 : f32 to vector<8x256xf32>
    %104 = arith.addf %103, %102 : vector<8x256xf32>
    %105 = tpu.reciprocal %104 {approx = true} : vector<8x256xf32> -> vector<8x256xf32>
    %cst_34 = arith.constant 1.06140542 : f32
    %106 = vector.broadcast %cst_34 : f32 to vector<8x256xf32>
    %107 = arith.mulf %106, %105 : vector<8x256xf32>
    %cst_35 = arith.constant -1.45315206 : f32
    %108 = vector.broadcast %cst_35 : f32 to vector<8x256xf32>
    %109 = arith.addf %107, %108 : vector<8x256xf32>
    %110 = arith.mulf %109, %105 : vector<8x256xf32>
    %cst_36 = arith.constant 1.42141378 : f32
    %111 = vector.broadcast %cst_36 : f32 to vector<8x256xf32>
    %112 = arith.addf %110, %111 : vector<8x256xf32>
    %113 = arith.mulf %112, %105 : vector<8x256xf32>
    %cst_37 = arith.constant -0.284496725 : f32
    %114 = vector.broadcast %cst_37 : f32 to vector<8x256xf32>
    %115 = arith.addf %113, %114 : vector<8x256xf32>
    %116 = arith.mulf %115, %105 : vector<8x256xf32>
    %cst_38 = arith.constant 0.254829586 : f32
    %117 = vector.broadcast %cst_38 : f32 to vector<8x256xf32>
    %118 = arith.addf %116, %117 : vector<8x256xf32>
    %119 = arith.mulf %118, %105 : vector<8x256xf32>
    %cst_39 = arith.constant 0.000000e+00 : f32
    %120 = vector.broadcast %cst_39 : f32 to vector<8x256xf32>
    %121 = arith.subf %120, %100 : vector<8x256xf32>
    %122 = arith.mulf %121, %100 : vector<8x256xf32>
    %123 = math.exp %122 : vector<8x256xf32>
    %124 = arith.mulf %119, %123 : vector<8x256xf32>
    %cst_40 = arith.constant 1.000000e+00 : f32
    %125 = vector.broadcast %cst_40 : f32 to vector<8x256xf32>
    %126 = arith.subf %125, %124 : vector<8x256xf32>
    %127 = arith.mulf %99, %126 : vector<8x256xf32>
    %cst_41 = arith.constant 1.000000e+00 : f32
    %128 = vector.broadcast %cst_41 : f32 to vector<8x256xf32>
    %129 = arith.addf %128, %127 : vector<8x256xf32>
    %130 = arith.mulf %92, %129 : vector<8x256xf32>
    %c0_42 = arith.constant 0 : index
    %c0_43 = arith.constant 0 : index
    %c0_44 = arith.constant 0 : index
    %131 = vector.load %arg5[%c0_42, %c0_43, %c0_44] : memref<1x8x256xf32, #tpu.memory_space<vmem>>, vector<1x8x256xf32>
    %132 = vector.shape_cast %131 : vector<1x8x256xf32> to vector<8x256xf32>
    %133 = vector.shape_cast %130 : vector<8x256xf32> to vector<1x8x256xf32>
    tpu.vector_store %arg5[%c0_42, %c0_43, %c0_44], %133 {strides = array<i32>} : memref<1x8x256xf32, #tpu.memory_space<vmem>>, vector<1x8x256xf32>,
    return
  }
  func.func @transform_0(%arg0: i32) -> (i32, i32, i32) {
    %c0_i32 = arith.constant 0 : i32
    %c0_i32_0 = arith.constant 0 : i32
    %c0_i32_1 = arith.constant 0 : i32
    return %arg0, %c0_i32, %c0_i32_0 : i32, i32, i32
  }
  func.func @transform_1(%arg0: i32) -> (i32, i32) {
    %c0_i32 = arith.constant 0 : i32
    %c0_i32_0 = arith.constant 0 : i32
    %c0_i32_1 = arith.constant 0 : i32
    return %c0_i32, %c0_i32_0 : i32, i32
  }
  func.func @transform_2(%arg0: i32) -> (i32, i32) {
    %c0_i32 = arith.constant 0 : i32
    %c0_i32_0 = arith.constant 0 : i32
    %c0_i32_1 = arith.constant 0 : i32
    return %c0_i32, %c0_i32_0 : i32, i32
  }
  func.func @transform_3(%arg0: i32) -> (i32, i32) {
    %c0_i32 = arith.constant 0 : i32
    %c0_i32_0 = arith.constant 0 : i32
    %c0_i32_1 = arith.constant 0 : i32
    return %c0_i32, %c0_i32_0 : i32, i32
  }
  func.func @transform_4(%arg0: i32) -> (i32, i32, i32) {
    %c0_i32 = arith.constant 0 : i32
    %c0_i32_0 = arith.constant 0 : i32
    %c0_i32_1 = arith.constant 0 : i32
    return %arg0, %c0_i32, %c0_i32_0 : i32, i32, i32
  }
}

module attributes {stable_mosaic.version = 11 : i64} {
  func.func @kernel(%arg0: i32, %arg1: memref<1x8x82xf32, #tpu.memory_space<vmem>>, %arg2: memref<8x72xf32, #tpu.memory_space<vmem>>, %arg3: memref<8x1xf32, #tpu.memory_space<vmem>>, %arg4: memref<8x1xf32, #tpu.memory_space<vmem>>, %arg5: memref<1x8x64xf32, #tpu.memory_space<vmem>>) attributes {dimension_semantics = [#tpu.dimension_semantics<parallel>], iteration_bounds = array<i64: 2>, scalar_prefetch = 0 : i64, scratch_operands = 0 : i64, tpu.core_type = #tpu.core_type<tc>, window_params = [{transform_indices = @transform_0, window_bounds = array<i64: 1, 8, 82>}, {pipeline_mode = #tpu.pipeline_mode<synchronous>, transform_indices = @transform_1, window_bounds = array<i64: 8, 72>}, {pipeline_mode = #tpu.pipeline_mode<synchronous>, transform_indices = @transform_2, window_bounds = array<i64: 8, 1>}, {pipeline_mode = #tpu.pipeline_mode<synchronous>, transform_indices = @transform_3, window_bounds = array<i64: 8, 1>}, {transform_indices = @transform_4, window_bounds = array<i64: 1, 8, 64>}]} {
    %c0 = arith.constant 0 : index
    %c0_0 = arith.constant 0 : index
    %c0_1 = arith.constant 0 : index
    %0 = vector.load %arg1[%c0, %c0_0, %c0_1] : memref<1x8x82xf32, #tpu.memory_space<vmem>>, vector<1x8x82xf32>
    %1 = vector.shape_cast %0 : vector<1x8x82xf32> to vector<8x82xf32>
    %2 = tpu.iota {dimensions = array<i32: 1>} : vector<1x64xi32>
    %c8_i32 = arith.constant 8 : i32
    %c0_i32 = arith.constant 0 : i32
    %3 = arith.cmpi eq, %c8_i32, %c0_i32 : i32
    %c1_i32 = arith.constant 1 : i32
    %4 = arith.select %3, %c1_i32, %c8_i32 : i32
    %5 = vector.broadcast %4 : i32 to vector<1x64xi32>
    %6 = arith.remsi %2, %5 : vector<1x64xi32>
    %c0_i32_2 = arith.constant 0 : i32
    %7 = vector.broadcast %c0_i32_2 : i32 to vector<1x64xi32>
    %8 = arith.cmpi ne, %6, %7 : vector<1x64xi32>
    %c0_i32_3 = arith.constant 0 : i32
    %9 = vector.broadcast %c0_i32_3 : i32 to vector<1x64xi32>
    %10 = arith.cmpi slt, %6, %9 : vector<1x64xi32>
    %c0_i32_4 = arith.constant 0 : i32
    %11 = arith.cmpi slt, %4, %c0_i32_4 : i32
    %12 = vector.broadcast %11 : i1 to vector<1x64xi1>
    %13 = vector.broadcast %12 : vector<1x64xi1> to vector<1x64xi1>
    %14 = arith.xori %10, %13 : vector<1x64xi1>
    %15 = arith.andi %14, %8 : vector<1x64xi1>
    %16 = vector.broadcast %4 : i32 to vector<1x64xi32>
    %17 = arith.addi %6, %16 : vector<1x64xi32>
    %18 = arith.select %15, %17, %6 : vector<1x64xi1>, vector<1x64xi32>
    %19 = vector.extract_strided_slice %1 {offsets = [0, 0], sizes = [8, 64], strides = [1, 1]} : vector<8x82xf32> to vector<8x64xf32>
    %c0_i32_5 = arith.constant 0 : i32
    %20 = vector.broadcast %c0_i32_5 : i32 to vector<1x64xi32>
    %21 = arith.cmpi eq, %18, %20 : vector<1x64xi32>
    %cst = arith.constant 0.000000e+00 : f32
    %22 = vector.shape_cast %21 : vector<1x64xi1> to vector<1x64xi1>
    %23 = vector.broadcast %22 : vector<1x64xi1> to vector<8x64xi1>
    %24 = vector.broadcast %cst : f32 to vector<8x64xf32>
    %25 = arith.select %23, %24, %19 : vector<8x64xi1>, vector<8x64xf32>
    %26 = vector.extract_strided_slice %1 {offsets = [0, 1], sizes = [8, 64], strides = [1, 1]} : vector<8x82xf32> to vector<8x64xf32>
    %27 = vector.extract_strided_slice %1 {offsets = [0, 2], sizes = [8, 64], strides = [1, 1]} : vector<8x82xf32> to vector<8x64xf32>
    %c7_i32 = arith.constant 7 : i32
    %28 = vector.broadcast %c7_i32 : i32 to vector<1x64xi32>
    %29 = arith.cmpi eq, %18, %28 : vector<1x64xi32>
    %cst_6 = arith.constant 0.000000e+00 : f32
    %30 = vector.shape_cast %29 : vector<1x64xi1> to vector<1x64xi1>
    %31 = vector.broadcast %30 : vector<1x64xi1> to vector<8x64xi1>
    %32 = vector.broadcast %cst_6 : f32 to vector<8x64xf32>
    %33 = arith.select %31, %32, %27 : vector<8x64xi1>, vector<8x64xf32>
    %34 = vector.extract_strided_slice %1 {offsets = [0, 8], sizes = [8, 64], strides = [1, 1]} : vector<8x82xf32> to vector<8x64xf32>
    %c0_i32_7 = arith.constant 0 : i32
    %35 = vector.broadcast %c0_i32_7 : i32 to vector<1x64xi32>
    %36 = arith.cmpi eq, %18, %35 : vector<1x64xi32>
    %cst_8 = arith.constant 0.000000e+00 : f32
    %37 = vector.shape_cast %36 : vector<1x64xi1> to vector<1x64xi1>
    %38 = vector.broadcast %37 : vector<1x64xi1> to vector<8x64xi1>
    %39 = vector.broadcast %cst_8 : f32 to vector<8x64xf32>
    %40 = arith.select %38, %39, %34 : vector<8x64xi1>, vector<8x64xf32>
    %41 = vector.extract_strided_slice %1 {offsets = [0, 9], sizes = [8, 64], strides = [1, 1]} : vector<8x82xf32> to vector<8x64xf32>
    %42 = vector.extract_strided_slice %1 {offsets = [0, 10], sizes = [8, 64], strides = [1, 1]} : vector<8x82xf32> to vector<8x64xf32>
    %c7_i32_9 = arith.constant 7 : i32
    %43 = vector.broadcast %c7_i32_9 : i32 to vector<1x64xi32>
    %44 = arith.cmpi eq, %18, %43 : vector<1x64xi32>
    %cst_10 = arith.constant 0.000000e+00 : f32
    %45 = vector.shape_cast %44 : vector<1x64xi1> to vector<1x64xi1>
    %46 = vector.broadcast %45 : vector<1x64xi1> to vector<8x64xi1>
    %47 = vector.broadcast %cst_10 : f32 to vector<8x64xf32>
    %48 = arith.select %46, %47, %42 : vector<8x64xi1>, vector<8x64xf32>
    %49 = vector.extract_strided_slice %1 {offsets = [0, 16], sizes = [8, 64], strides = [1, 1]} : vector<8x82xf32> to vector<8x64xf32>
    %c0_i32_11 = arith.constant 0 : i32
    %50 = vector.broadcast %c0_i32_11 : i32 to vector<1x64xi32>
    %51 = arith.cmpi eq, %18, %50 : vector<1x64xi32>
    %cst_12 = arith.constant 0.000000e+00 : f32
    %52 = vector.shape_cast %51 : vector<1x64xi1> to vector<1x64xi1>
    %53 = vector.broadcast %52 : vector<1x64xi1> to vector<8x64xi1>
    %54 = vector.broadcast %cst_12 : f32 to vector<8x64xf32>
    %55 = arith.select %53, %54, %49 : vector<8x64xi1>, vector<8x64xf32>
    %56 = vector.extract_strided_slice %1 {offsets = [0, 17], sizes = [8, 64], strides = [1, 1]} : vector<8x82xf32> to vector<8x64xf32>
    %57 = vector.extract_strided_slice %1 {offsets = [0, 18], sizes = [8, 64], strides = [1, 1]} : vector<8x82xf32> to vector<8x64xf32>
    %c7_i32_13 = arith.constant 7 : i32
    %58 = vector.broadcast %c7_i32_13 : i32 to vector<1x64xi32>
    %59 = arith.cmpi eq, %18, %58 : vector<1x64xi32>
    %cst_14 = arith.constant 0.000000e+00 : f32
    %60 = vector.shape_cast %59 : vector<1x64xi1> to vector<1x64xi1>
    %61 = vector.broadcast %60 : vector<1x64xi1> to vector<8x64xi1>
    %62 = vector.broadcast %cst_14 : f32 to vector<8x64xf32>
    %63 = arith.select %61, %62, %57 : vector<8x64xi1>, vector<8x64xf32>
    %64 = tpu.concatenate %25, %26, %33, %40, %41, %48, %55, %56, %63 in 0 : vector<8x64xf32>, vector<8x64xf32>, vector<8x64xf32>, vector<8x64xf32>, vector<8x64xf32>, vector<8x64xf32>, vector<8x64xf32>, vector<8x64xf32>, vector<8x64xf32> -> vector<72x64xf32>
    %c0_15 = arith.constant 0 : index
    %c0_16 = arith.constant 0 : index
    %65 = vector.load %arg2[%c0_15, %c0_16] : memref<8x72xf32, #tpu.memory_space<vmem>>, vector<8x72xf32>
    %cst_17 = arith.constant dense<0.000000e+00> : vector<8x64xf32>
    %66 = tpu.matmul %65, %64, %cst_17 {dimension_numbers = #tpu.dot_dimension_numbers<[1], [0], [0], [1], [0, 0, 1, 1], [], []>} : vector<8x72xf32>, vector<72x64xf32>, vector<8x64xf32> -> vector<8x64xf32>
    %cst_18 = arith.constant dense<0.000000e+00> : vector<64xf32>
    %67 = vector.multi_reduction <add>, %66, %cst_18 [0] : vector<8x64xf32> to vector<64xf32>
    %68 = vector.shape_cast %67 : vector<64xf32> to vector<1x64xf32>
    %cst_19 = arith.constant 8.000000e+00 : f32
    %69 = vector.broadcast %cst_19 : f32 to vector<1x64xf32>
    %70 = arith.divf %68, %69 : vector<1x64xf32>
    %71 = vector.broadcast %70 : vector<1x64xf32> to vector<8x64xf32>
    %72 = arith.subf %66, %71 : vector<8x64xf32>
    %73 = arith.mulf %72, %72 : vector<8x64xf32>
    %cst_20 = arith.constant dense<0.000000e+00> : vector<64xf32>
    %74 = vector.multi_reduction <add>, %73, %cst_20 [0] : vector<8x64xf32> to vector<64xf32>
    %75 = vector.shape_cast %74 : vector<64xf32> to vector<1x64xf32>
    %cst_21 = arith.constant 8.000000e+00 : f32
    %76 = vector.broadcast %cst_21 : f32 to vector<1x64xf32>
    %77 = arith.divf %75, %76 : vector<1x64xf32>
    %78 = vector.broadcast %70 : vector<1x64xf32> to vector<8x64xf32>
    %79 = arith.subf %66, %78 : vector<8x64xf32>
    %cst_22 = arith.constant 9.99999974E-6 : f32
    %80 = vector.broadcast %cst_22 : f32 to vector<1x64xf32>
    %81 = arith.addf %77, %80 : vector<1x64xf32>
    %82 = math.rsqrt %81 : vector<1x64xf32>
    %83 = vector.broadcast %82 : vector<1x64xf32> to vector<8x64xf32>
    %84 = arith.mulf %79, %83 : vector<8x64xf32>
    %c0_23 = arith.constant 0 : index
    %c0_24 = arith.constant 0 : index
    %85 = vector.load %arg3[%c0_23, %c0_24] : memref<8x1xf32, #tpu.memory_space<vmem>>, vector<8x1xf32>
    %86 = vector.broadcast %85 : vector<8x1xf32> to vector<8x64xf32>
    %87 = arith.mulf %84, %86 : vector<8x64xf32>
    %c0_25 = arith.constant 0 : index
    %c0_26 = arith.constant 0 : index
    %88 = vector.load %arg4[%c0_25, %c0_26] : memref<8x1xf32, #tpu.memory_space<vmem>>, vector<8x1xf32>
    %89 = vector.broadcast %88 : vector<8x1xf32> to vector<8x64xf32>
    %90 = arith.addf %87, %89 : vector<8x64xf32>
    %cst_27 = arith.constant 5.000000e-01 : f32
    %91 = vector.broadcast %cst_27 : f32 to vector<8x64xf32>
    %92 = arith.mulf %91, %90 : vector<8x64xf32>
    %cst_28 = arith.constant 0.707106769 : f32
    %93 = vector.broadcast %cst_28 : f32 to vector<8x64xf32>
    %94 = arith.mulf %90, %93 : vector<8x64xf32>
    %cst_29 = arith.constant 0.000000e+00 : f32
    %95 = vector.broadcast %cst_29 : f32 to vector<8x64xf32>
    %96 = arith.cmpf olt, %94, %95 : vector<8x64xf32>
    %cst_30 = arith.constant -1.000000e+00 : f32
    %cst_31 = arith.constant 1.000000e+00 : f32
    %97 = vector.broadcast %cst_30 : f32 to vector<8x64xf32>
    %98 = vector.broadcast %cst_31 : f32 to vector<8x64xf32>
    %99 = arith.select %96, %97, %98 : vector<8x64xi1>, vector<8x64xf32>
    %100 = math.absf %94 : vector<8x64xf32>
    %cst_32 = arith.constant 0.327591091 : f32
    %101 = vector.broadcast %cst_32 : f32 to vector<8x64xf32>
    %102 = arith.mulf %101, %100 : vector<8x64xf32>
    %cst_33 = arith.constant 1.000000e+00 : f32
    %103 = vector.broadcast %cst_33 : f32 to vector<8x64xf32>
    %104 = arith.addf %103, %102 : vector<8x64xf32>
    %105 = tpu.reciprocal %104 {approx = true} : vector<8x64xf32> -> vector<8x64xf32>
    %cst_34 = arith.constant 1.06140542 : f32
    %106 = vector.broadcast %cst_34 : f32 to vector<8x64xf32>
    %107 = arith.mulf %106, %105 : vector<8x64xf32>
    %cst_35 = arith.constant -1.45315206 : f32
    %108 = vector.broadcast %cst_35 : f32 to vector<8x64xf32>
    %109 = arith.addf %107, %108 : vector<8x64xf32>
    %110 = arith.mulf %109, %105 : vector<8x64xf32>
    %cst_36 = arith.constant 1.42141378 : f32
    %111 = vector.broadcast %cst_36 : f32 to vector<8x64xf32>
    %112 = arith.addf %110, %111 : vector<8x64xf32>
    %113 = arith.mulf %112, %105 : vector<8x64xf32>
    %cst_37 = arith.constant -0.284496725 : f32
    %114 = vector.broadcast %cst_37 : f32 to vector<8x64xf32>
    %115 = arith.addf %113, %114 : vector<8x64xf32>
    %116 = arith.mulf %115, %105 : vector<8x64xf32>
    %cst_38 = arith.constant 0.254829586 : f32
    %117 = vector.broadcast %cst_38 : f32 to vector<8x64xf32>
    %118 = arith.addf %116, %117 : vector<8x64xf32>
    %119 = arith.mulf %118, %105 : vector<8x64xf32>
    %cst_39 = arith.constant 0.000000e+00 : f32
    %120 = vector.broadcast %cst_39 : f32 to vector<8x64xf32>
    %121 = arith.subf %120, %100 : vector<8x64xf32>
    %122 = arith.mulf %121, %100 : vector<8x64xf32>
    %123 = math.exp %122 : vector<8x64xf32>
    %124 = arith.mulf %119, %123 : vector<8x64xf32>
    %cst_40 = arith.constant 1.000000e+00 : f32
    %125 = vector.broadcast %cst_40 : f32 to vector<8x64xf32>
    %126 = arith.subf %125, %124 : vector<8x64xf32>
    %127 = arith.mulf %99, %126 : vector<8x64xf32>
    %cst_41 = arith.constant 1.000000e+00 : f32
    %128 = vector.broadcast %cst_41 : f32 to vector<8x64xf32>
    %129 = arith.addf %128, %127 : vector<8x64xf32>
    %130 = arith.mulf %92, %129 : vector<8x64xf32>
    %c0_42 = arith.constant 0 : index
    %c0_43 = arith.constant 0 : index
    %c0_44 = arith.constant 0 : index
    %131 = vector.load %arg5[%c0_42, %c0_43, %c0_44] : memref<1x8x64xf32, #tpu.memory_space<vmem>>, vector<1x8x64xf32>
    %132 = vector.shape_cast %131 : vector<1x8x64xf32> to vector<8x64xf32>
    %133 = vector.shape_cast %130 : vector<8x64xf32> to vector<1x8x64xf32>
    tpu.vector_store %arg5[%c0_42, %c0_43, %c0_44], %133 {strides = array<i32>} : memref<1x8x64xf32, #tpu.memory_space<vmem>>, vector<1x8x64xf32>,
    return
  }
  func.func @transform_0(%arg0: i32) -> (i32, i32, i32) {
    %c0_i32 = arith.constant 0 : i32
    %c0_i32_0 = arith.constant 0 : i32
    %c0_i32_1 = arith.constant 0 : i32
    return %arg0, %c0_i32, %c0_i32_0 : i32, i32, i32
  }
  func.func @transform_1(%arg0: i32) -> (i32, i32) {
    %c0_i32 = arith.constant 0 : i32
    %c0_i32_0 = arith.constant 0 : i32
    %c0_i32_1 = arith.constant 0 : i32
    return %c0_i32, %c0_i32_0 : i32, i32
  }
  func.func @transform_2(%arg0: i32) -> (i32, i32) {
    %c0_i32 = arith.constant 0 : i32
    %c0_i32_0 = arith.constant 0 : i32
    %c0_i32_1 = arith.constant 0 : i32
    return %c0_i32, %c0_i32_0 : i32, i32
  }
  func.func @transform_3(%arg0: i32) -> (i32, i32) {
    %c0_i32 = arith.constant 0 : i32
    %c0_i32_0 = arith.constant 0 : i32
    %c0_i32_1 = arith.constant 0 : i32
    return %c0_i32, %c0_i32_0 : i32, i32
  }
  func.func @transform_4(%arg0: i32) -> (i32, i32, i32) {
    %c0_i32 = arith.constant 0 : i32
    %c0_i32_0 = arith.constant 0 : i32
    %c0_i32_1 = arith.constant 0 : i32
    return %arg0, %c0_i32, %c0_i32_0 : i32, i32, i32
  }
}

module attributes {stable_mosaic.version = 11 : i64} {
  func.func @kernel(%arg0: i32, %arg1: memref<1x8x26xf32, #tpu.memory_space<vmem>>, %arg2: memref<8x72xf32, #tpu.memory_space<vmem>>, %arg3: memref<8x1xf32, #tpu.memory_space<vmem>>, %arg4: memref<8x1xf32, #tpu.memory_space<vmem>>, %arg5: memref<1x8x16xf32, #tpu.memory_space<vmem>>) attributes {dimension_semantics = [#tpu.dimension_semantics<parallel>], iteration_bounds = array<i64: 2>, scalar_prefetch = 0 : i64, scratch_operands = 0 : i64, tpu.core_type = #tpu.core_type<tc>, window_params = [{transform_indices = @transform_0, window_bounds = array<i64: 1, 8, 26>}, {pipeline_mode = #tpu.pipeline_mode<synchronous>, transform_indices = @transform_1, window_bounds = array<i64: 8, 72>}, {pipeline_mode = #tpu.pipeline_mode<synchronous>, transform_indices = @transform_2, window_bounds = array<i64: 8, 1>}, {pipeline_mode = #tpu.pipeline_mode<synchronous>, transform_indices = @transform_3, window_bounds = array<i64: 8, 1>}, {transform_indices = @transform_4, window_bounds = array<i64: 1, 8, 16>}]} {
    %c0 = arith.constant 0 : index
    %c0_0 = arith.constant 0 : index
    %c0_1 = arith.constant 0 : index
    %0 = vector.load %arg1[%c0, %c0_0, %c0_1] : memref<1x8x26xf32, #tpu.memory_space<vmem>>, vector<1x8x26xf32>
    %1 = vector.shape_cast %0 : vector<1x8x26xf32> to vector<8x26xf32>
    %2 = tpu.iota {dimensions = array<i32: 1>} : vector<1x16xi32>
    %c4_i32 = arith.constant 4 : i32
    %c0_i32 = arith.constant 0 : i32
    %3 = arith.cmpi eq, %c4_i32, %c0_i32 : i32
    %c1_i32 = arith.constant 1 : i32
    %4 = arith.select %3, %c1_i32, %c4_i32 : i32
    %5 = vector.broadcast %4 : i32 to vector<1x16xi32>
    %6 = arith.remsi %2, %5 : vector<1x16xi32>
    %c0_i32_2 = arith.constant 0 : i32
    %7 = vector.broadcast %c0_i32_2 : i32 to vector<1x16xi32>
    %8 = arith.cmpi ne, %6, %7 : vector<1x16xi32>
    %c0_i32_3 = arith.constant 0 : i32
    %9 = vector.broadcast %c0_i32_3 : i32 to vector<1x16xi32>
    %10 = arith.cmpi slt, %6, %9 : vector<1x16xi32>
    %c0_i32_4 = arith.constant 0 : i32
    %11 = arith.cmpi slt, %4, %c0_i32_4 : i32
    %12 = vector.broadcast %11 : i1 to vector<1x16xi1>
    %13 = vector.broadcast %12 : vector<1x16xi1> to vector<1x16xi1>
    %14 = arith.xori %10, %13 : vector<1x16xi1>
    %15 = arith.andi %14, %8 : vector<1x16xi1>
    %16 = vector.broadcast %4 : i32 to vector<1x16xi32>
    %17 = arith.addi %6, %16 : vector<1x16xi32>
    %18 = arith.select %15, %17, %6 : vector<1x16xi1>, vector<1x16xi32>
    %19 = vector.extract_strided_slice %1 {offsets = [0, 0], sizes = [8, 16], strides = [1, 1]} : vector<8x26xf32> to vector<8x16xf32>
    %c0_i32_5 = arith.constant 0 : i32
    %20 = vector.broadcast %c0_i32_5 : i32 to vector<1x16xi32>
    %21 = arith.cmpi eq, %18, %20 : vector<1x16xi32>
    %cst = arith.constant 0.000000e+00 : f32
    %22 = vector.shape_cast %21 : vector<1x16xi1> to vector<1x16xi1>
    %23 = vector.broadcast %22 : vector<1x16xi1> to vector<8x16xi1>
    %24 = vector.broadcast %cst : f32 to vector<8x16xf32>
    %25 = arith.select %23, %24, %19 : vector<8x16xi1>, vector<8x16xf32>
    %26 = vector.extract_strided_slice %1 {offsets = [0, 1], sizes = [8, 16], strides = [1, 1]} : vector<8x26xf32> to vector<8x16xf32>
    %27 = vector.extract_strided_slice %1 {offsets = [0, 2], sizes = [8, 16], strides = [1, 1]} : vector<8x26xf32> to vector<8x16xf32>
    %c3_i32 = arith.constant 3 : i32
    %28 = vector.broadcast %c3_i32 : i32 to vector<1x16xi32>
    %29 = arith.cmpi eq, %18, %28 : vector<1x16xi32>
    %cst_6 = arith.constant 0.000000e+00 : f32
    %30 = vector.shape_cast %29 : vector<1x16xi1> to vector<1x16xi1>
    %31 = vector.broadcast %30 : vector<1x16xi1> to vector<8x16xi1>
    %32 = vector.broadcast %cst_6 : f32 to vector<8x16xf32>
    %33 = arith.select %31, %32, %27 : vector<8x16xi1>, vector<8x16xf32>
    %34 = vector.extract_strided_slice %1 {offsets = [0, 4], sizes = [8, 16], strides = [1, 1]} : vector<8x26xf32> to vector<8x16xf32>
    %c0_i32_7 = arith.constant 0 : i32
    %35 = vector.broadcast %c0_i32_7 : i32 to vector<1x16xi32>
    %36 = arith.cmpi eq, %18, %35 : vector<1x16xi32>
    %cst_8 = arith.constant 0.000000e+00 : f32
    %37 = vector.shape_cast %36 : vector<1x16xi1> to vector<1x16xi1>
    %38 = vector.broadcast %37 : vector<1x16xi1> to vector<8x16xi1>
    %39 = vector.broadcast %cst_8 : f32 to vector<8x16xf32>
    %40 = arith.select %38, %39, %34 : vector<8x16xi1>, vector<8x16xf32>
    %41 = vector.extract_strided_slice %1 {offsets = [0, 5], sizes = [8, 16], strides = [1, 1]} : vector<8x26xf32> to vector<8x16xf32>
    %42 = vector.extract_strided_slice %1 {offsets = [0, 6], sizes = [8, 16], strides = [1, 1]} : vector<8x26xf32> to vector<8x16xf32>
    %c3_i32_9 = arith.constant 3 : i32
    %43 = vector.broadcast %c3_i32_9 : i32 to vector<1x16xi32>
    %44 = arith.cmpi eq, %18, %43 : vector<1x16xi32>
    %cst_10 = arith.constant 0.000000e+00 : f32
    %45 = vector.shape_cast %44 : vector<1x16xi1> to vector<1x16xi1>
    %46 = vector.broadcast %45 : vector<1x16xi1> to vector<8x16xi1>
    %47 = vector.broadcast %cst_10 : f32 to vector<8x16xf32>
    %48 = arith.select %46, %47, %42 : vector<8x16xi1>, vector<8x16xf32>
    %49 = vector.extract_strided_slice %1 {offsets = [0, 8], sizes = [8, 16], strides = [1, 1]} : vector<8x26xf32> to vector<8x16xf32>
    %c0_i32_11 = arith.constant 0 : i32
    %50 = vector.broadcast %c0_i32_11 : i32 to vector<1x16xi32>
    %51 = arith.cmpi eq, %18, %50 : vector<1x16xi32>
    %cst_12 = arith.constant 0.000000e+00 : f32
    %52 = vector.shape_cast %51 : vector<1x16xi1> to vector<1x16xi1>
    %53 = vector.broadcast %52 : vector<1x16xi1> to vector<8x16xi1>
    %54 = vector.broadcast %cst_12 : f32 to vector<8x16xf32>
    %55 = arith.select %53, %54, %49 : vector<8x16xi1>, vector<8x16xf32>
    %56 = vector.extract_strided_slice %1 {offsets = [0, 9], sizes = [8, 16], strides = [1, 1]} : vector<8x26xf32> to vector<8x16xf32>
    %57 = vector.extract_strided_slice %1 {offsets = [0, 10], sizes = [8, 16], strides = [1, 1]} : vector<8x26xf32> to vector<8x16xf32>
    %c3_i32_13 = arith.constant 3 : i32
    %58 = vector.broadcast %c3_i32_13 : i32 to vector<1x16xi32>
    %59 = arith.cmpi eq, %18, %58 : vector<1x16xi32>
    %cst_14 = arith.constant 0.000000e+00 : f32
    %60 = vector.shape_cast %59 : vector<1x16xi1> to vector<1x16xi1>
    %61 = vector.broadcast %60 : vector<1x16xi1> to vector<8x16xi1>
    %62 = vector.broadcast %cst_14 : f32 to vector<8x16xf32>
    %63 = arith.select %61, %62, %57 : vector<8x16xi1>, vector<8x16xf32>
    %64 = tpu.concatenate %25, %26, %33, %40, %41, %48, %55, %56, %63 in 0 : vector<8x16xf32>, vector<8x16xf32>, vector<8x16xf32>, vector<8x16xf32>, vector<8x16xf32>, vector<8x16xf32>, vector<8x16xf32>, vector<8x16xf32>, vector<8x16xf32> -> vector<72x16xf32>
    %c0_15 = arith.constant 0 : index
    %c0_16 = arith.constant 0 : index
    %65 = vector.load %arg2[%c0_15, %c0_16] : memref<8x72xf32, #tpu.memory_space<vmem>>, vector<8x72xf32>
    %cst_17 = arith.constant dense<0.000000e+00> : vector<8x16xf32>
    %66 = tpu.matmul %65, %64, %cst_17 {dimension_numbers = #tpu.dot_dimension_numbers<[1], [0], [0], [1], [0, 0, 1, 1], [], []>} : vector<8x72xf32>, vector<72x16xf32>, vector<8x16xf32> -> vector<8x16xf32>
    %cst_18 = arith.constant dense<0.000000e+00> : vector<16xf32>
    %67 = vector.multi_reduction <add>, %66, %cst_18 [0] : vector<8x16xf32> to vector<16xf32>
    %68 = vector.shape_cast %67 : vector<16xf32> to vector<1x16xf32>
    %cst_19 = arith.constant 8.000000e+00 : f32
    %69 = vector.broadcast %cst_19 : f32 to vector<1x16xf32>
    %70 = arith.divf %68, %69 : vector<1x16xf32>
    %71 = vector.broadcast %70 : vector<1x16xf32> to vector<8x16xf32>
    %72 = arith.subf %66, %71 : vector<8x16xf32>
    %73 = arith.mulf %72, %72 : vector<8x16xf32>
    %cst_20 = arith.constant dense<0.000000e+00> : vector<16xf32>
    %74 = vector.multi_reduction <add>, %73, %cst_20 [0] : vector<8x16xf32> to vector<16xf32>
    %75 = vector.shape_cast %74 : vector<16xf32> to vector<1x16xf32>
    %cst_21 = arith.constant 8.000000e+00 : f32
    %76 = vector.broadcast %cst_21 : f32 to vector<1x16xf32>
    %77 = arith.divf %75, %76 : vector<1x16xf32>
    %78 = vector.broadcast %70 : vector<1x16xf32> to vector<8x16xf32>
    %79 = arith.subf %66, %78 : vector<8x16xf32>
    %cst_22 = arith.constant 9.99999974E-6 : f32
    %80 = vector.broadcast %cst_22 : f32 to vector<1x16xf32>
    %81 = arith.addf %77, %80 : vector<1x16xf32>
    %82 = math.rsqrt %81 : vector<1x16xf32>
    %83 = vector.broadcast %82 : vector<1x16xf32> to vector<8x16xf32>
    %84 = arith.mulf %79, %83 : vector<8x16xf32>
    %c0_23 = arith.constant 0 : index
    %c0_24 = arith.constant 0 : index
    %85 = vector.load %arg3[%c0_23, %c0_24] : memref<8x1xf32, #tpu.memory_space<vmem>>, vector<8x1xf32>
    %86 = vector.broadcast %85 : vector<8x1xf32> to vector<8x16xf32>
    %87 = arith.mulf %84, %86 : vector<8x16xf32>
    %c0_25 = arith.constant 0 : index
    %c0_26 = arith.constant 0 : index
    %88 = vector.load %arg4[%c0_25, %c0_26] : memref<8x1xf32, #tpu.memory_space<vmem>>, vector<8x1xf32>
    %89 = vector.broadcast %88 : vector<8x1xf32> to vector<8x16xf32>
    %90 = arith.addf %87, %89 : vector<8x16xf32>
    %cst_27 = arith.constant 5.000000e-01 : f32
    %91 = vector.broadcast %cst_27 : f32 to vector<8x16xf32>
    %92 = arith.mulf %91, %90 : vector<8x16xf32>
    %cst_28 = arith.constant 0.707106769 : f32
    %93 = vector.broadcast %cst_28 : f32 to vector<8x16xf32>
    %94 = arith.mulf %90, %93 : vector<8x16xf32>
    %cst_29 = arith.constant 0.000000e+00 : f32
    %95 = vector.broadcast %cst_29 : f32 to vector<8x16xf32>
    %96 = arith.cmpf olt, %94, %95 : vector<8x16xf32>
    %cst_30 = arith.constant -1.000000e+00 : f32
    %cst_31 = arith.constant 1.000000e+00 : f32
    %97 = vector.broadcast %cst_30 : f32 to vector<8x16xf32>
    %98 = vector.broadcast %cst_31 : f32 to vector<8x16xf32>
    %99 = arith.select %96, %97, %98 : vector<8x16xi1>, vector<8x16xf32>
    %100 = math.absf %94 : vector<8x16xf32>
    %cst_32 = arith.constant 0.327591091 : f32
    %101 = vector.broadcast %cst_32 : f32 to vector<8x16xf32>
    %102 = arith.mulf %101, %100 : vector<8x16xf32>
    %cst_33 = arith.constant 1.000000e+00 : f32
    %103 = vector.broadcast %cst_33 : f32 to vector<8x16xf32>
    %104 = arith.addf %103, %102 : vector<8x16xf32>
    %105 = tpu.reciprocal %104 {approx = true} : vector<8x16xf32> -> vector<8x16xf32>
    %cst_34 = arith.constant 1.06140542 : f32
    %106 = vector.broadcast %cst_34 : f32 to vector<8x16xf32>
    %107 = arith.mulf %106, %105 : vector<8x16xf32>
    %cst_35 = arith.constant -1.45315206 : f32
    %108 = vector.broadcast %cst_35 : f32 to vector<8x16xf32>
    %109 = arith.addf %107, %108 : vector<8x16xf32>
    %110 = arith.mulf %109, %105 : vector<8x16xf32>
    %cst_36 = arith.constant 1.42141378 : f32
    %111 = vector.broadcast %cst_36 : f32 to vector<8x16xf32>
    %112 = arith.addf %110, %111 : vector<8x16xf32>
    %113 = arith.mulf %112, %105 : vector<8x16xf32>
    %cst_37 = arith.constant -0.284496725 : f32
    %114 = vector.broadcast %cst_37 : f32 to vector<8x16xf32>
    %115 = arith.addf %113, %114 : vector<8x16xf32>
    %116 = arith.mulf %115, %105 : vector<8x16xf32>
    %cst_38 = arith.constant 0.254829586 : f32
    %117 = vector.broadcast %cst_38 : f32 to vector<8x16xf32>
    %118 = arith.addf %116, %117 : vector<8x16xf32>
    %119 = arith.mulf %118, %105 : vector<8x16xf32>
    %cst_39 = arith.constant 0.000000e+00 : f32
    %120 = vector.broadcast %cst_39 : f32 to vector<8x16xf32>
    %121 = arith.subf %120, %100 : vector<8x16xf32>
    %122 = arith.mulf %121, %100 : vector<8x16xf32>
    %123 = math.exp %122 : vector<8x16xf32>
    %124 = arith.mulf %119, %123 : vector<8x16xf32>
    %cst_40 = arith.constant 1.000000e+00 : f32
    %125 = vector.broadcast %cst_40 : f32 to vector<8x16xf32>
    %126 = arith.subf %125, %124 : vector<8x16xf32>
    %127 = arith.mulf %99, %126 : vector<8x16xf32>
    %cst_41 = arith.constant 1.000000e+00 : f32
    %128 = vector.broadcast %cst_41 : f32 to vector<8x16xf32>
    %129 = arith.addf %128, %127 : vector<8x16xf32>
    %130 = arith.mulf %92, %129 : vector<8x16xf32>
    %c0_42 = arith.constant 0 : index
    %c0_43 = arith.constant 0 : index
    %c0_44 = arith.constant 0 : index
    %131 = vector.load %arg5[%c0_42, %c0_43, %c0_44] : memref<1x8x16xf32, #tpu.memory_space<vmem>>, vector<1x8x16xf32>
    %132 = vector.shape_cast %131 : vector<1x8x16xf32> to vector<8x16xf32>
    %133 = vector.shape_cast %130 : vector<8x16xf32> to vector<1x8x16xf32>
    tpu.vector_store %arg5[%c0_42, %c0_43, %c0_44], %133 {strides = array<i32>} : memref<1x8x16xf32, #tpu.memory_space<vmem>>, vector<1x8x16xf32>,
    return
  }
  func.func @transform_0(%arg0: i32) -> (i32, i32, i32) {
    %c0_i32 = arith.constant 0 : i32
    %c0_i32_0 = arith.constant 0 : i32
    %c0_i32_1 = arith.constant 0 : i32
    return %arg0, %c0_i32, %c0_i32_0 : i32, i32, i32
  }
  func.func @transform_1(%arg0: i32) -> (i32, i32) {
    %c0_i32 = arith.constant 0 : i32
    %c0_i32_0 = arith.constant 0 : i32
    %c0_i32_1 = arith.constant 0 : i32
    return %c0_i32, %c0_i32_0 : i32, i32
  }
  func.func @transform_2(%arg0: i32) -> (i32, i32) {
    %c0_i32 = arith.constant 0 : i32
    %c0_i32_0 = arith.constant 0 : i32
    %c0_i32_1 = arith.constant 0 : i32
    return %c0_i32, %c0_i32_0 : i32, i32
  }
  func.func @transform_3(%arg0: i32) -> (i32, i32) {
    %c0_i32 = arith.constant 0 : i32
    %c0_i32_0 = arith.constant 0 : i32
    %c0_i32_1 = arith.constant 0 : i32
    return %c0_i32, %c0_i32_0 : i32, i32
  }
  func.func @transform_4(%arg0: i32) -> (i32, i32, i32) {
    %c0_i32 = arith.constant 0 : i32
    %c0_i32_0 = arith.constant 0 : i32
    %c0_i32_1 = arith.constant 0 : i32
    return %arg0, %c0_i32, %c0_i32_0 : i32, i32, i32
  }
}

module attributes {stable_mosaic.version = 11 : i64} {
  func.func @kernel(%arg0: i32, %arg1: memref<1x8x10xf32, #tpu.memory_space<vmem>>, %arg2: memref<8x72xf32, #tpu.memory_space<vmem>>, %arg3: memref<8x1xf32, #tpu.memory_space<vmem>>, %arg4: memref<8x1xf32, #tpu.memory_space<vmem>>, %arg5: memref<1x8x4xf32, #tpu.memory_space<vmem>>) attributes {dimension_semantics = [#tpu.dimension_semantics<parallel>], iteration_bounds = array<i64: 2>, scalar_prefetch = 0 : i64, scratch_operands = 0 : i64, tpu.core_type = #tpu.core_type<tc>, window_params = [{transform_indices = @transform_0, window_bounds = array<i64: 1, 8, 10>}, {pipeline_mode = #tpu.pipeline_mode<synchronous>, transform_indices = @transform_1, window_bounds = array<i64: 8, 72>}, {pipeline_mode = #tpu.pipeline_mode<synchronous>, transform_indices = @transform_2, window_bounds = array<i64: 8, 1>}, {pipeline_mode = #tpu.pipeline_mode<synchronous>, transform_indices = @transform_3, window_bounds = array<i64: 8, 1>}, {transform_indices = @transform_4, window_bounds = array<i64: 1, 8, 4>}]} {
    %c0 = arith.constant 0 : index
    %c0_0 = arith.constant 0 : index
    %c0_1 = arith.constant 0 : index
    %0 = vector.load %arg1[%c0, %c0_0, %c0_1] : memref<1x8x10xf32, #tpu.memory_space<vmem>>, vector<1x8x10xf32>
    %1 = vector.shape_cast %0 : vector<1x8x10xf32> to vector<8x10xf32>
    %2 = tpu.iota {dimensions = array<i32: 1>} : vector<1x4xi32>
    %c2_i32 = arith.constant 2 : i32
    %c0_i32 = arith.constant 0 : i32
    %3 = arith.cmpi eq, %c2_i32, %c0_i32 : i32
    %c1_i32 = arith.constant 1 : i32
    %4 = arith.select %3, %c1_i32, %c2_i32 : i32
    %5 = vector.broadcast %4 : i32 to vector<1x4xi32>
    %6 = arith.remsi %2, %5 : vector<1x4xi32>
    %c0_i32_2 = arith.constant 0 : i32
    %7 = vector.broadcast %c0_i32_2 : i32 to vector<1x4xi32>
    %8 = arith.cmpi ne, %6, %7 : vector<1x4xi32>
    %c0_i32_3 = arith.constant 0 : i32
    %9 = vector.broadcast %c0_i32_3 : i32 to vector<1x4xi32>
    %10 = arith.cmpi slt, %6, %9 : vector<1x4xi32>
    %c0_i32_4 = arith.constant 0 : i32
    %11 = arith.cmpi slt, %4, %c0_i32_4 : i32
    %12 = vector.broadcast %11 : i1 to vector<1x4xi1>
    %13 = vector.broadcast %12 : vector<1x4xi1> to vector<1x4xi1>
    %14 = arith.xori %10, %13 : vector<1x4xi1>
    %15 = arith.andi %14, %8 : vector<1x4xi1>
    %16 = vector.broadcast %4 : i32 to vector<1x4xi32>
    %17 = arith.addi %6, %16 : vector<1x4xi32>
    %18 = arith.select %15, %17, %6 : vector<1x4xi1>, vector<1x4xi32>
    %19 = vector.extract_strided_slice %1 {offsets = [0, 0], sizes = [8, 4], strides = [1, 1]} : vector<8x10xf32> to vector<8x4xf32>
    %c0_i32_5 = arith.constant 0 : i32
    %20 = vector.broadcast %c0_i32_5 : i32 to vector<1x4xi32>
    %21 = arith.cmpi eq, %18, %20 : vector<1x4xi32>
    %cst = arith.constant 0.000000e+00 : f32
    %22 = vector.shape_cast %21 : vector<1x4xi1> to vector<1x4xi1>
    %23 = vector.broadcast %22 : vector<1x4xi1> to vector<8x4xi1>
    %24 = vector.broadcast %cst : f32 to vector<8x4xf32>
    %25 = arith.select %23, %24, %19 : vector<8x4xi1>, vector<8x4xf32>
    %26 = vector.extract_strided_slice %1 {offsets = [0, 1], sizes = [8, 4], strides = [1, 1]} : vector<8x10xf32> to vector<8x4xf32>
    %27 = vector.extract_strided_slice %1 {offsets = [0, 2], sizes = [8, 4], strides = [1, 1]} : vector<8x10xf32> to vector<8x4xf32>
    %c1_i32_6 = arith.constant 1 : i32
    %28 = vector.broadcast %c1_i32_6 : i32 to vector<1x4xi32>
    %29 = arith.cmpi eq, %18, %28 : vector<1x4xi32>
    %cst_7 = arith.constant 0.000000e+00 : f32
    %30 = vector.shape_cast %29 : vector<1x4xi1> to vector<1x4xi1>
    %31 = vector.broadcast %30 : vector<1x4xi1> to vector<8x4xi1>
    %32 = vector.broadcast %cst_7 : f32 to vector<8x4xf32>
    %33 = arith.select %31, %32, %27 : vector<8x4xi1>, vector<8x4xf32>
    %34 = vector.extract_strided_slice %1 {offsets = [0, 2], sizes = [8, 4], strides = [1, 1]} : vector<8x10xf32> to vector<8x4xf32>
    %c0_i32_8 = arith.constant 0 : i32
    %35 = vector.broadcast %c0_i32_8 : i32 to vector<1x4xi32>
    %36 = arith.cmpi eq, %18, %35 : vector<1x4xi32>
    %cst_9 = arith.constant 0.000000e+00 : f32
    %37 = vector.shape_cast %36 : vector<1x4xi1> to vector<1x4xi1>
    %38 = vector.broadcast %37 : vector<1x4xi1> to vector<8x4xi1>
    %39 = vector.broadcast %cst_9 : f32 to vector<8x4xf32>
    %40 = arith.select %38, %39, %34 : vector<8x4xi1>, vector<8x4xf32>
    %41 = vector.extract_strided_slice %1 {offsets = [0, 3], sizes = [8, 4], strides = [1, 1]} : vector<8x10xf32> to vector<8x4xf32>
    %42 = vector.extract_strided_slice %1 {offsets = [0, 4], sizes = [8, 4], strides = [1, 1]} : vector<8x10xf32> to vector<8x4xf32>
    %c1_i32_10 = arith.constant 1 : i32
    %43 = vector.broadcast %c1_i32_10 : i32 to vector<1x4xi32>
    %44 = arith.cmpi eq, %18, %43 : vector<1x4xi32>
    %cst_11 = arith.constant 0.000000e+00 : f32
    %45 = vector.shape_cast %44 : vector<1x4xi1> to vector<1x4xi1>
    %46 = vector.broadcast %45 : vector<1x4xi1> to vector<8x4xi1>
    %47 = vector.broadcast %cst_11 : f32 to vector<8x4xf32>
    %48 = arith.select %46, %47, %42 : vector<8x4xi1>, vector<8x4xf32>
    %49 = vector.extract_strided_slice %1 {offsets = [0, 4], sizes = [8, 4], strides = [1, 1]} : vector<8x10xf32> to vector<8x4xf32>
    %c0_i32_12 = arith.constant 0 : i32
    %50 = vector.broadcast %c0_i32_12 : i32 to vector<1x4xi32>
    %51 = arith.cmpi eq, %18, %50 : vector<1x4xi32>
    %cst_13 = arith.constant 0.000000e+00 : f32
    %52 = vector.shape_cast %51 : vector<1x4xi1> to vector<1x4xi1>
    %53 = vector.broadcast %52 : vector<1x4xi1> to vector<8x4xi1>
    %54 = vector.broadcast %cst_13 : f32 to vector<8x4xf32>
    %55 = arith.select %53, %54, %49 : vector<8x4xi1>, vector<8x4xf32>
    %56 = vector.extract_strided_slice %1 {offsets = [0, 5], sizes = [8, 4], strides = [1, 1]} : vector<8x10xf32> to vector<8x4xf32>
    %57 = vector.extract_strided_slice %1 {offsets = [0, 6], sizes = [8, 4], strides = [1, 1]} : vector<8x10xf32> to vector<8x4xf32>
    %c1_i32_14 = arith.constant 1 : i32
    %58 = vector.broadcast %c1_i32_14 : i32 to vector<1x4xi32>
    %59 = arith.cmpi eq, %18, %58 : vector<1x4xi32>
    %cst_15 = arith.constant 0.000000e+00 : f32
    %60 = vector.shape_cast %59 : vector<1x4xi1> to vector<1x4xi1>
    %61 = vector.broadcast %60 : vector<1x4xi1> to vector<8x4xi1>
    %62 = vector.broadcast %cst_15 : f32 to vector<8x4xf32>
    %63 = arith.select %61, %62, %57 : vector<8x4xi1>, vector<8x4xf32>
    %64 = tpu.concatenate %25, %26, %33, %40, %41, %48, %55, %56, %63 in 0 : vector<8x4xf32>, vector<8x4xf32>, vector<8x4xf32>, vector<8x4xf32>, vector<8x4xf32>, vector<8x4xf32>, vector<8x4xf32>, vector<8x4xf32>, vector<8x4xf32> -> vector<72x4xf32>
    %c0_16 = arith.constant 0 : index
    %c0_17 = arith.constant 0 : index
    %65 = vector.load %arg2[%c0_16, %c0_17] : memref<8x72xf32, #tpu.memory_space<vmem>>, vector<8x72xf32>
    %cst_18 = arith.constant dense<0.000000e+00> : vector<8x4xf32>
    %66 = tpu.matmul %65, %64, %cst_18 {dimension_numbers = #tpu.dot_dimension_numbers<[1], [0], [0], [1], [0, 0, 1, 1], [], []>} : vector<8x72xf32>, vector<72x4xf32>, vector<8x4xf32> -> vector<8x4xf32>
    %cst_19 = arith.constant dense<0.000000e+00> : vector<4xf32>
    %67 = vector.multi_reduction <add>, %66, %cst_19 [0] : vector<8x4xf32> to vector<4xf32>
    %68 = vector.shape_cast %67 : vector<4xf32> to vector<1x4xf32>
    %cst_20 = arith.constant 8.000000e+00 : f32
    %69 = vector.broadcast %cst_20 : f32 to vector<1x4xf32>
    %70 = arith.divf %68, %69 : vector<1x4xf32>
    %71 = vector.broadcast %70 : vector<1x4xf32> to vector<8x4xf32>
    %72 = arith.subf %66, %71 : vector<8x4xf32>
    %73 = arith.mulf %72, %72 : vector<8x4xf32>
    %cst_21 = arith.constant dense<0.000000e+00> : vector<4xf32>
    %74 = vector.multi_reduction <add>, %73, %cst_21 [0] : vector<8x4xf32> to vector<4xf32>
    %75 = vector.shape_cast %74 : vector<4xf32> to vector<1x4xf32>
    %cst_22 = arith.constant 8.000000e+00 : f32
    %76 = vector.broadcast %cst_22 : f32 to vector<1x4xf32>
    %77 = arith.divf %75, %76 : vector<1x4xf32>
    %78 = vector.broadcast %70 : vector<1x4xf32> to vector<8x4xf32>
    %79 = arith.subf %66, %78 : vector<8x4xf32>
    %cst_23 = arith.constant 9.99999974E-6 : f32
    %80 = vector.broadcast %cst_23 : f32 to vector<1x4xf32>
    %81 = arith.addf %77, %80 : vector<1x4xf32>
    %82 = math.rsqrt %81 : vector<1x4xf32>
    %83 = vector.broadcast %82 : vector<1x4xf32> to vector<8x4xf32>
    %84 = arith.mulf %79, %83 : vector<8x4xf32>
    %c0_24 = arith.constant 0 : index
    %c0_25 = arith.constant 0 : index
    %85 = vector.load %arg3[%c0_24, %c0_25] : memref<8x1xf32, #tpu.memory_space<vmem>>, vector<8x1xf32>
    %86 = vector.broadcast %85 : vector<8x1xf32> to vector<8x4xf32>
    %87 = arith.mulf %84, %86 : vector<8x4xf32>
    %c0_26 = arith.constant 0 : index
    %c0_27 = arith.constant 0 : index
    %88 = vector.load %arg4[%c0_26, %c0_27] : memref<8x1xf32, #tpu.memory_space<vmem>>, vector<8x1xf32>
    %89 = vector.broadcast %88 : vector<8x1xf32> to vector<8x4xf32>
    %90 = arith.addf %87, %89 : vector<8x4xf32>
    %cst_28 = arith.constant 5.000000e-01 : f32
    %91 = vector.broadcast %cst_28 : f32 to vector<8x4xf32>
    %92 = arith.mulf %91, %90 : vector<8x4xf32>
    %cst_29 = arith.constant 0.707106769 : f32
    %93 = vector.broadcast %cst_29 : f32 to vector<8x4xf32>
    %94 = arith.mulf %90, %93 : vector<8x4xf32>
    %cst_30 = arith.constant 0.000000e+00 : f32
    %95 = vector.broadcast %cst_30 : f32 to vector<8x4xf32>
    %96 = arith.cmpf olt, %94, %95 : vector<8x4xf32>
    %cst_31 = arith.constant -1.000000e+00 : f32
    %cst_32 = arith.constant 1.000000e+00 : f32
    %97 = vector.broadcast %cst_31 : f32 to vector<8x4xf32>
    %98 = vector.broadcast %cst_32 : f32 to vector<8x4xf32>
    %99 = arith.select %96, %97, %98 : vector<8x4xi1>, vector<8x4xf32>
    %100 = math.absf %94 : vector<8x4xf32>
    %cst_33 = arith.constant 0.327591091 : f32
    %101 = vector.broadcast %cst_33 : f32 to vector<8x4xf32>
    %102 = arith.mulf %101, %100 : vector<8x4xf32>
    %cst_34 = arith.constant 1.000000e+00 : f32
    %103 = vector.broadcast %cst_34 : f32 to vector<8x4xf32>
    %104 = arith.addf %103, %102 : vector<8x4xf32>
    %105 = tpu.reciprocal %104 {approx = true} : vector<8x4xf32> -> vector<8x4xf32>
    %cst_35 = arith.constant 1.06140542 : f32
    %106 = vector.broadcast %cst_35 : f32 to vector<8x4xf32>
    %107 = arith.mulf %106, %105 : vector<8x4xf32>
    %cst_36 = arith.constant -1.45315206 : f32
    %108 = vector.broadcast %cst_36 : f32 to vector<8x4xf32>
    %109 = arith.addf %107, %108 : vector<8x4xf32>
    %110 = arith.mulf %109, %105 : vector<8x4xf32>
    %cst_37 = arith.constant 1.42141378 : f32
    %111 = vector.broadcast %cst_37 : f32 to vector<8x4xf32>
    %112 = arith.addf %110, %111 : vector<8x4xf32>
    %113 = arith.mulf %112, %105 : vector<8x4xf32>
    %cst_38 = arith.constant -0.284496725 : f32
    %114 = vector.broadcast %cst_38 : f32 to vector<8x4xf32>
    %115 = arith.addf %113, %114 : vector<8x4xf32>
    %116 = arith.mulf %115, %105 : vector<8x4xf32>
    %cst_39 = arith.constant 0.254829586 : f32
    %117 = vector.broadcast %cst_39 : f32 to vector<8x4xf32>
    %118 = arith.addf %116, %117 : vector<8x4xf32>
    %119 = arith.mulf %118, %105 : vector<8x4xf32>
    %cst_40 = arith.constant 0.000000e+00 : f32
    %120 = vector.broadcast %cst_40 : f32 to vector<8x4xf32>
    %121 = arith.subf %120, %100 : vector<8x4xf32>
    %122 = arith.mulf %121, %100 : vector<8x4xf32>
    %123 = math.exp %122 : vector<8x4xf32>
    %124 = arith.mulf %119, %123 : vector<8x4xf32>
    %cst_41 = arith.constant 1.000000e+00 : f32
    %125 = vector.broadcast %cst_41 : f32 to vector<8x4xf32>
    %126 = arith.subf %125, %124 : vector<8x4xf32>
    %127 = arith.mulf %99, %126 : vector<8x4xf32>
    %cst_42 = arith.constant 1.000000e+00 : f32
    %128 = vector.broadcast %cst_42 : f32 to vector<8x4xf32>
    %129 = arith.addf %128, %127 : vector<8x4xf32>
    %130 = arith.mulf %92, %129 : vector<8x4xf32>
    %c0_43 = arith.constant 0 : index
    %c0_44 = arith.constant 0 : index
    %c0_45 = arith.constant 0 : index
    %131 = vector.load %arg5[%c0_43, %c0_44, %c0_45] : memref<1x8x4xf32, #tpu.memory_space<vmem>>, vector<1x8x4xf32>
    %132 = vector.shape_cast %131 : vector<1x8x4xf32> to vector<8x4xf32>
    %133 = vector.shape_cast %130 : vector<8x4xf32> to vector<1x8x4xf32>
    tpu.vector_store %arg5[%c0_43, %c0_44, %c0_45], %133 {strides = array<i32>} : memref<1x8x4xf32, #tpu.memory_space<vmem>>, vector<1x8x4xf32>,
    return
  }
  func.func @transform_0(%arg0: i32) -> (i32, i32, i32) {
    %c0_i32 = arith.constant 0 : i32
    %c0_i32_0 = arith.constant 0 : i32
    %c0_i32_1 = arith.constant 0 : i32
    return %arg0, %c0_i32, %c0_i32_0 : i32, i32, i32
  }
  func.func @transform_1(%arg0: i32) -> (i32, i32) {
    %c0_i32 = arith.constant 0 : i32
    %c0_i32_0 = arith.constant 0 : i32
    %c0_i32_1 = arith.constant 0 : i32
    return %c0_i32, %c0_i32_0 : i32, i32
  }
  func.func @transform_2(%arg0: i32) -> (i32, i32) {
    %c0_i32 = arith.constant 0 : i32
    %c0_i32_0 = arith.constant 0 : i32
    %c0_i32_1 = arith.constant 0 : i32
    return %c0_i32, %c0_i32_0 : i32, i32
  }
  func.func @transform_3(%arg0: i32) -> (i32, i32) {
    %c0_i32 = arith.constant 0 : i32
    %c0_i32_0 = arith.constant 0 : i32
    %c0_i32_1 = arith.constant 0 : i32
    return %c0_i32, %c0_i32_0 : i32, i32
  }
  func.func @transform_4(%arg0: i32) -> (i32, i32, i32) {
    %c0_i32 = arith.constant 0 : i32
    %c0_i32_0 = arith.constant 0 : i32
    %c0_i32_1 = arith.constant 0 : i32
    return %arg0, %c0_i32, %c0_i32_0 : i32, i32, i32
  }
}

module attributes {stable_mosaic.version = 11 : i64} {
  func.func @kernel(%arg0: i32, %arg1: memref<1x8x5xf32, #tpu.memory_space<vmem>>, %arg2: memref<8x72xf32, #tpu.memory_space<vmem>>, %arg3: memref<8x1xf32, #tpu.memory_space<vmem>>, %arg4: memref<8x1xf32, #tpu.memory_space<vmem>>, %arg5: memref<1x8x1xf32, #tpu.memory_space<vmem>>) attributes {dimension_semantics = [#tpu.dimension_semantics<parallel>], iteration_bounds = array<i64: 2>, scalar_prefetch = 0 : i64, scratch_operands = 0 : i64, tpu.core_type = #tpu.core_type<tc>, window_params = [{transform_indices = @transform_0, window_bounds = array<i64: 1, 8, 5>}, {pipeline_mode = #tpu.pipeline_mode<synchronous>, transform_indices = @transform_1, window_bounds = array<i64: 8, 72>}, {pipeline_mode = #tpu.pipeline_mode<synchronous>, transform_indices = @transform_2, window_bounds = array<i64: 8, 1>}, {pipeline_mode = #tpu.pipeline_mode<synchronous>, transform_indices = @transform_3, window_bounds = array<i64: 8, 1>}, {transform_indices = @transform_4, window_bounds = array<i64: 1, 8, 1>}]} {
    %c0 = arith.constant 0 : index
    %c0_0 = arith.constant 0 : index
    %c0_1 = arith.constant 0 : index
    %0 = vector.load %arg1[%c0, %c0_0, %c0_1] : memref<1x8x5xf32, #tpu.memory_space<vmem>>, vector<1x8x5xf32>
    %1 = vector.shape_cast %0 : vector<1x8x5xf32> to vector<8x5xf32>
    %2 = tpu.iota {dimensions = array<i32: 1>} : vector<1x1xi32>
    %c1_i32 = arith.constant 1 : i32
    %c0_i32 = arith.constant 0 : i32
    %3 = arith.cmpi eq, %c1_i32, %c0_i32 : i32
    %c1_i32_2 = arith.constant 1 : i32
    %4 = arith.select %3, %c1_i32_2, %c1_i32 : i32
    %5 = vector.broadcast %4 : i32 to vector<1x1xi32>
    %6 = arith.remsi %2, %5 : vector<1x1xi32>
    %c0_i32_3 = arith.constant 0 : i32
    %7 = vector.broadcast %c0_i32_3 : i32 to vector<1x1xi32>
    %8 = arith.cmpi ne, %6, %7 : vector<1x1xi32>
    %c0_i32_4 = arith.constant 0 : i32
    %9 = vector.broadcast %c0_i32_4 : i32 to vector<1x1xi32>
    %10 = arith.cmpi slt, %6, %9 : vector<1x1xi32>
    %c0_i32_5 = arith.constant 0 : i32
    %11 = arith.cmpi slt, %4, %c0_i32_5 : i32
    %12 = vector.broadcast %11 : i1 to vector<1x1xi1>
    %13 = vector.broadcast %12 : vector<1x1xi1> to vector<1x1xi1>
    %14 = arith.xori %10, %13 : vector<1x1xi1>
    %15 = arith.andi %14, %8 : vector<1x1xi1>
    %16 = vector.broadcast %4 : i32 to vector<1x1xi32>
    %17 = arith.addi %6, %16 : vector<1x1xi32>
    %18 = arith.select %15, %17, %6 : vector<1x1xi1>, vector<1x1xi32>
    %19 = vector.extract_strided_slice %1 {offsets = [0, 0], sizes = [8, 1], strides = [1, 1]} : vector<8x5xf32> to vector<8x1xf32>
    %c0_i32_6 = arith.constant 0 : i32
    %20 = vector.broadcast %c0_i32_6 : i32 to vector<1x1xi32>
    %21 = arith.cmpi eq, %18, %20 : vector<1x1xi32>
    %cst = arith.constant 0.000000e+00 : f32
    %22 = vector.shape_cast %21 : vector<1x1xi1> to vector<1x1xi1>
    %23 = vector.broadcast %22 : vector<1x1xi1> to vector<8x1xi1>
    %24 = vector.broadcast %cst : f32 to vector<8x1xf32>
    %25 = arith.select %23, %24, %19 : vector<8x1xi1>, vector<8x1xf32>
    %26 = vector.extract_strided_slice %1 {offsets = [0, 1], sizes = [8, 1], strides = [1, 1]} : vector<8x5xf32> to vector<8x1xf32>
    %27 = vector.extract_strided_slice %1 {offsets = [0, 2], sizes = [8, 1], strides = [1, 1]} : vector<8x5xf32> to vector<8x1xf32>
    %c0_i32_7 = arith.constant 0 : i32
    %28 = vector.broadcast %c0_i32_7 : i32 to vector<1x1xi32>
    %29 = arith.cmpi eq, %18, %28 : vector<1x1xi32>
    %cst_8 = arith.constant 0.000000e+00 : f32
    %30 = vector.shape_cast %29 : vector<1x1xi1> to vector<1x1xi1>
    %31 = vector.broadcast %30 : vector<1x1xi1> to vector<8x1xi1>
    %32 = vector.broadcast %cst_8 : f32 to vector<8x1xf32>
    %33 = arith.select %31, %32, %27 : vector<8x1xi1>, vector<8x1xf32>
    %34 = vector.extract_strided_slice %1 {offsets = [0, 1], sizes = [8, 1], strides = [1, 1]} : vector<8x5xf32> to vector<8x1xf32>
    %c0_i32_9 = arith.constant 0 : i32
    %35 = vector.broadcast %c0_i32_9 : i32 to vector<1x1xi32>
    %36 = arith.cmpi eq, %18, %35 : vector<1x1xi32>
    %cst_10 = arith.constant 0.000000e+00 : f32
    %37 = vector.shape_cast %36 : vector<1x1xi1> to vector<1x1xi1>
    %38 = vector.broadcast %37 : vector<1x1xi1> to vector<8x1xi1>
    %39 = vector.broadcast %cst_10 : f32 to vector<8x1xf32>
    %40 = arith.select %38, %39, %34 : vector<8x1xi1>, vector<8x1xf32>
    %41 = vector.extract_strided_slice %1 {offsets = [0, 2], sizes = [8, 1], strides = [1, 1]} : vector<8x5xf32> to vector<8x1xf32>
    %42 = vector.extract_strided_slice %1 {offsets = [0, 3], sizes = [8, 1], strides = [1, 1]} : vector<8x5xf32> to vector<8x1xf32>
    %c0_i32_11 = arith.constant 0 : i32
    %43 = vector.broadcast %c0_i32_11 : i32 to vector<1x1xi32>
    %44 = arith.cmpi eq, %18, %43 : vector<1x1xi32>
    %cst_12 = arith.constant 0.000000e+00 : f32
    %45 = vector.shape_cast %44 : vector<1x1xi1> to vector<1x1xi1>
    %46 = vector.broadcast %45 : vector<1x1xi1> to vector<8x1xi1>
    %47 = vector.broadcast %cst_12 : f32 to vector<8x1xf32>
    %48 = arith.select %46, %47, %42 : vector<8x1xi1>, vector<8x1xf32>
    %49 = vector.extract_strided_slice %1 {offsets = [0, 2], sizes = [8, 1], strides = [1, 1]} : vector<8x5xf32> to vector<8x1xf32>
    %c0_i32_13 = arith.constant 0 : i32
    %50 = vector.broadcast %c0_i32_13 : i32 to vector<1x1xi32>
    %51 = arith.cmpi eq, %18, %50 : vector<1x1xi32>
    %cst_14 = arith.constant 0.000000e+00 : f32
    %52 = vector.shape_cast %51 : vector<1x1xi1> to vector<1x1xi1>
    %53 = vector.broadcast %52 : vector<1x1xi1> to vector<8x1xi1>
    %54 = vector.broadcast %cst_14 : f32 to vector<8x1xf32>
    %55 = arith.select %53, %54, %49 : vector<8x1xi1>, vector<8x1xf32>
    %56 = vector.extract_strided_slice %1 {offsets = [0, 3], sizes = [8, 1], strides = [1, 1]} : vector<8x5xf32> to vector<8x1xf32>
    %57 = vector.extract_strided_slice %1 {offsets = [0, 4], sizes = [8, 1], strides = [1, 1]} : vector<8x5xf32> to vector<8x1xf32>
    %c0_i32_15 = arith.constant 0 : i32
    %58 = vector.broadcast %c0_i32_15 : i32 to vector<1x1xi32>
    %59 = arith.cmpi eq, %18, %58 : vector<1x1xi32>
    %cst_16 = arith.constant 0.000000e+00 : f32
    %60 = vector.shape_cast %59 : vector<1x1xi1> to vector<1x1xi1>
    %61 = vector.broadcast %60 : vector<1x1xi1> to vector<8x1xi1>
    %62 = vector.broadcast %cst_16 : f32 to vector<8x1xf32>
    %63 = arith.select %61, %62, %57 : vector<8x1xi1>, vector<8x1xf32>
    %64 = tpu.concatenate %25, %26, %33, %40, %41, %48, %55, %56, %63 in 0 : vector<8x1xf32>, vector<8x1xf32>, vector<8x1xf32>, vector<8x1xf32>, vector<8x1xf32>, vector<8x1xf32>, vector<8x1xf32>, vector<8x1xf32>, vector<8x1xf32> -> vector<72x1xf32>
    %c0_17 = arith.constant 0 : index
    %c0_18 = arith.constant 0 : index
    %65 = vector.load %arg2[%c0_17, %c0_18] : memref<8x72xf32, #tpu.memory_space<vmem>>, vector<8x72xf32>
    %cst_19 = arith.constant dense<0.000000e+00> : vector<8x1xf32>
    %66 = tpu.matmul %65, %64, %cst_19 {dimension_numbers = #tpu.dot_dimension_numbers<[1], [0], [0], [1], [0, 0, 1, 1], [], []>} : vector<8x72xf32>, vector<72x1xf32>, vector<8x1xf32> -> vector<8x1xf32>
    %cst_20 = arith.constant dense<0.000000e+00> : vector<1xf32>
    %67 = vector.multi_reduction <add>, %66, %cst_20 [0] : vector<8x1xf32> to vector<1xf32>
    %68 = vector.shape_cast %67 : vector<1xf32> to vector<1x1xf32>
    %cst_21 = arith.constant 8.000000e+00 : f32
    %69 = vector.broadcast %cst_21 : f32 to vector<1x1xf32>
    %70 = arith.divf %68, %69 : vector<1x1xf32>
    %71 = vector.broadcast %70 : vector<1x1xf32> to vector<8x1xf32>
    %72 = arith.subf %66, %71 : vector<8x1xf32>
    %73 = arith.mulf %72, %72 : vector<8x1xf32>
    %cst_22 = arith.constant dense<0.000000e+00> : vector<1xf32>
    %74 = vector.multi_reduction <add>, %73, %cst_22 [0] : vector<8x1xf32> to vector<1xf32>
    %75 = vector.shape_cast %74 : vector<1xf32> to vector<1x1xf32>
    %cst_23 = arith.constant 8.000000e+00 : f32
    %76 = vector.broadcast %cst_23 : f32 to vector<1x1xf32>
    %77 = arith.divf %75, %76 : vector<1x1xf32>
    %78 = vector.broadcast %70 : vector<1x1xf32> to vector<8x1xf32>
    %79 = arith.subf %66, %78 : vector<8x1xf32>
    %cst_24 = arith.constant 9.99999974E-6 : f32
    %80 = vector.broadcast %cst_24 : f32 to vector<1x1xf32>
    %81 = arith.addf %77, %80 : vector<1x1xf32>
    %82 = math.rsqrt %81 : vector<1x1xf32>
    %83 = vector.broadcast %82 : vector<1x1xf32> to vector<8x1xf32>
    %84 = arith.mulf %79, %83 : vector<8x1xf32>
    %c0_25 = arith.constant 0 : index
    %c0_26 = arith.constant 0 : index
    %85 = vector.load %arg3[%c0_25, %c0_26] : memref<8x1xf32, #tpu.memory_space<vmem>>, vector<8x1xf32>
    %86 = arith.mulf %84, %85 : vector<8x1xf32>
    %c0_27 = arith.constant 0 : index
    %c0_28 = arith.constant 0 : index
    %87 = vector.load %arg4[%c0_27, %c0_28] : memref<8x1xf32, #tpu.memory_space<vmem>>, vector<8x1xf32>
    %88 = arith.addf %86, %87 : vector<8x1xf32>
    %cst_29 = arith.constant 5.000000e-01 : f32
    %89 = vector.broadcast %cst_29 : f32 to vector<8x1xf32>
    %90 = arith.mulf %89, %88 : vector<8x1xf32>
    %cst_30 = arith.constant 0.707106769 : f32
    %91 = vector.broadcast %cst_30 : f32 to vector<8x1xf32>
    %92 = arith.mulf %88, %91 : vector<8x1xf32>
    %cst_31 = arith.constant 0.000000e+00 : f32
    %93 = vector.broadcast %cst_31 : f32 to vector<8x1xf32>
    %94 = arith.cmpf olt, %92, %93 : vector<8x1xf32>
    %cst_32 = arith.constant -1.000000e+00 : f32
    %cst_33 = arith.constant 1.000000e+00 : f32
    %95 = vector.broadcast %cst_32 : f32 to vector<8x1xf32>
    %96 = vector.broadcast %cst_33 : f32 to vector<8x1xf32>
    %97 = arith.select %94, %95, %96 : vector<8x1xi1>, vector<8x1xf32>
    %98 = math.absf %92 : vector<8x1xf32>
    %cst_34 = arith.constant 0.327591091 : f32
    %99 = vector.broadcast %cst_34 : f32 to vector<8x1xf32>
    %100 = arith.mulf %99, %98 : vector<8x1xf32>
    %cst_35 = arith.constant 1.000000e+00 : f32
    %101 = vector.broadcast %cst_35 : f32 to vector<8x1xf32>
    %102 = arith.addf %101, %100 : vector<8x1xf32>
    %103 = tpu.reciprocal %102 {approx = true} : vector<8x1xf32> -> vector<8x1xf32>
    %cst_36 = arith.constant 1.06140542 : f32
    %104 = vector.broadcast %cst_36 : f32 to vector<8x1xf32>
    %105 = arith.mulf %104, %103 : vector<8x1xf32>
    %cst_37 = arith.constant -1.45315206 : f32
    %106 = vector.broadcast %cst_37 : f32 to vector<8x1xf32>
    %107 = arith.addf %105, %106 : vector<8x1xf32>
    %108 = arith.mulf %107, %103 : vector<8x1xf32>
    %cst_38 = arith.constant 1.42141378 : f32
    %109 = vector.broadcast %cst_38 : f32 to vector<8x1xf32>
    %110 = arith.addf %108, %109 : vector<8x1xf32>
    %111 = arith.mulf %110, %103 : vector<8x1xf32>
    %cst_39 = arith.constant -0.284496725 : f32
    %112 = vector.broadcast %cst_39 : f32 to vector<8x1xf32>
    %113 = arith.addf %111, %112 : vector<8x1xf32>
    %114 = arith.mulf %113, %103 : vector<8x1xf32>
    %cst_40 = arith.constant 0.254829586 : f32
    %115 = vector.broadcast %cst_40 : f32 to vector<8x1xf32>
    %116 = arith.addf %114, %115 : vector<8x1xf32>
    %117 = arith.mulf %116, %103 : vector<8x1xf32>
    %cst_41 = arith.constant 0.000000e+00 : f32
    %118 = vector.broadcast %cst_41 : f32 to vector<8x1xf32>
    %119 = arith.subf %118, %98 : vector<8x1xf32>
    %120 = arith.mulf %119, %98 : vector<8x1xf32>
    %121 = math.exp %120 : vector<8x1xf32>
    %122 = arith.mulf %117, %121 : vector<8x1xf32>
    %cst_42 = arith.constant 1.000000e+00 : f32
    %123 = vector.broadcast %cst_42 : f32 to vector<8x1xf32>
    %124 = arith.subf %123, %122 : vector<8x1xf32>
    %125 = arith.mulf %97, %124 : vector<8x1xf32>
    %cst_43 = arith.constant 1.000000e+00 : f32
    %126 = vector.broadcast %cst_43 : f32 to vector<8x1xf32>
    %127 = arith.addf %126, %125 : vector<8x1xf32>
    %128 = arith.mulf %90, %127 : vector<8x1xf32>
    %c0_44 = arith.constant 0 : index
    %c0_45 = arith.constant 0 : index
    %c0_46 = arith.constant 0 : index
    %129 = vector.load %arg5[%c0_44, %c0_45, %c0_46] : memref<1x8x1xf32, #tpu.memory_space<vmem>>, vector<1x8x1xf32>
    %130 = vector.shape_cast %129 : vector<1x8x1xf32> to vector<8x1xf32>
    %131 = vector.shape_cast %128 : vector<8x1xf32> to vector<1x8x1xf32>
    tpu.vector_store %arg5[%c0_44, %c0_45, %c0_46], %131 {strides = array<i32>} : memref<1x8x1xf32, #tpu.memory_space<vmem>>, vector<1x8x1xf32>,
    return
  }
  func.func @transform_0(%arg0: i32) -> (i32, i32, i32) {
    %c0_i32 = arith.constant 0 : i32
    %c0_i32_0 = arith.constant 0 : i32
    %c0_i32_1 = arith.constant 0 : i32
    return %arg0, %c0_i32, %c0_i32_0 : i32, i32, i32
  }
  func.func @transform_1(%arg0: i32) -> (i32, i32) {
    %c0_i32 = arith.constant 0 : i32
    %c0_i32_0 = arith.constant 0 : i32
    %c0_i32_1 = arith.constant 0 : i32
    return %c0_i32, %c0_i32_0 : i32, i32
  }
  func.func @transform_2(%arg0: i32) -> (i32, i32) {
    %c0_i32 = arith.constant 0 : i32
    %c0_i32_0 = arith.constant 0 : i32
    %c0_i32_1 = arith.constant 0 : i32
    return %c0_i32, %c0_i32_0 : i32, i32
  }
  func.func @transform_3(%arg0: i32) -> (i32, i32) {
    %c0_i32 = arith.constant 0 : i32
    %c0_i32_0 = arith.constant 0 : i32
    %c0_i32_1 = arith.constant 0 : i32
    return %c0_i32, %c0_i32_0 : i32, i32
  }
  func.func @transform_4(%arg0: i32) -> (i32, i32, i32) {
    %c0_i32 = arith.constant 0 : i32
    %c0_i32_0 = arith.constant 0 : i32
    %c0_i32_1 = arith.constant 0 : i32
    return %arg0, %c0_i32, %c0_i32_0 : i32, i32, i32
  }
}

module attributes {stable_mosaic.version = 11 : i64} {
  func.func @kernel(%arg0: i32, %arg1: memref<1x40x290xf32, #tpu.memory_space<vmem>>, %arg2: memref<16x360xf32, #tpu.memory_space<vmem>>, %arg3: memref<16x1xf32, #tpu.memory_space<vmem>>, %arg4: memref<16x1xf32, #tpu.memory_space<vmem>>, %arg5: memref<4x16xf32, #tpu.memory_space<vmem>>, %arg6: memref<1x4x256xf32, #tpu.memory_space<vmem>>) attributes {dimension_semantics = [#tpu.dimension_semantics<parallel>], iteration_bounds = array<i64: 2>, scalar_prefetch = 0 : i64, scratch_operands = 0 : i64, tpu.core_type = #tpu.core_type<tc>, window_params = [{transform_indices = @transform_0, window_bounds = array<i64: 1, 40, 290>}, {pipeline_mode = #tpu.pipeline_mode<synchronous>, transform_indices = @transform_1, window_bounds = array<i64: 16, 360>}, {pipeline_mode = #tpu.pipeline_mode<synchronous>, transform_indices = @transform_2, window_bounds = array<i64: 16, 1>}, {pipeline_mode = #tpu.pipeline_mode<synchronous>, transform_indices = @transform_3, window_bounds = array<i64: 16, 1>}, {pipeline_mode = #tpu.pipeline_mode<synchronous>, transform_indices = @transform_4, window_bounds = array<i64: 4, 16>}, {transform_indices = @transform_5, window_bounds = array<i64: 1, 4, 256>}]} {
    %c0 = arith.constant 0 : index
    %c0_0 = arith.constant 0 : index
    %c0_1 = arith.constant 0 : index
    %0 = vector.load %arg1[%c0, %c0_0, %c0_1] : memref<1x40x290xf32, #tpu.memory_space<vmem>>, vector<1x40x290xf32>
    %1 = vector.shape_cast %0 : vector<1x40x290xf32> to vector<40x290xf32>
    %2 = tpu.iota {dimensions = array<i32: 1>} : vector<1x256xi32>
    %c16_i32 = arith.constant 16 : i32
    %c0_i32 = arith.constant 0 : i32
    %3 = arith.cmpi eq, %c16_i32, %c0_i32 : i32
    %c1_i32 = arith.constant 1 : i32
    %4 = arith.select %3, %c1_i32, %c16_i32 : i32
    %5 = vector.broadcast %4 : i32 to vector<1x256xi32>
    %6 = arith.remsi %2, %5 : vector<1x256xi32>
    %c0_i32_2 = arith.constant 0 : i32
    %7 = vector.broadcast %c0_i32_2 : i32 to vector<1x256xi32>
    %8 = arith.cmpi ne, %6, %7 : vector<1x256xi32>
    %c0_i32_3 = arith.constant 0 : i32
    %9 = vector.broadcast %c0_i32_3 : i32 to vector<1x256xi32>
    %10 = arith.cmpi slt, %6, %9 : vector<1x256xi32>
    %c0_i32_4 = arith.constant 0 : i32
    %11 = arith.cmpi slt, %4, %c0_i32_4 : i32
    %12 = vector.broadcast %11 : i1 to vector<1x256xi1>
    %13 = vector.broadcast %12 : vector<1x256xi1> to vector<1x256xi1>
    %14 = arith.xori %10, %13 : vector<1x256xi1>
    %15 = arith.andi %14, %8 : vector<1x256xi1>
    %16 = vector.broadcast %4 : i32 to vector<1x256xi32>
    %17 = arith.addi %6, %16 : vector<1x256xi32>
    %18 = arith.select %15, %17, %6 : vector<1x256xi1>, vector<1x256xi32>
    %19 = vector.extract_strided_slice %1 {offsets = [0, 0], sizes = [40, 256], strides = [1, 1]} : vector<40x290xf32> to vector<40x256xf32>
    %c0_i32_5 = arith.constant 0 : i32
    %20 = vector.broadcast %c0_i32_5 : i32 to vector<1x256xi32>
    %21 = arith.cmpi eq, %18, %20 : vector<1x256xi32>
    %cst = arith.constant 0.000000e+00 : f32
    %22 = vector.shape_cast %21 : vector<1x256xi1> to vector<1x256xi1>
    %23 = vector.broadcast %22 : vector<1x256xi1> to vector<40x256xi1>
    %24 = vector.broadcast %cst : f32 to vector<40x256xf32>
    %25 = arith.select %23, %24, %19 : vector<40x256xi1>, vector<40x256xf32>
    %26 = vector.extract_strided_slice %1 {offsets = [0, 1], sizes = [40, 256], strides = [1, 1]} : vector<40x290xf32> to vector<40x256xf32>
    %27 = vector.extract_strided_slice %1 {offsets = [0, 2], sizes = [40, 256], strides = [1, 1]} : vector<40x290xf32> to vector<40x256xf32>
    %c15_i32 = arith.constant 15 : i32
    %28 = vector.broadcast %c15_i32 : i32 to vector<1x256xi32>
    %29 = arith.cmpi eq, %18, %28 : vector<1x256xi32>
    %cst_6 = arith.constant 0.000000e+00 : f32
    %30 = vector.shape_cast %29 : vector<1x256xi1> to vector<1x256xi1>
    %31 = vector.broadcast %30 : vector<1x256xi1> to vector<40x256xi1>
    %32 = vector.broadcast %cst_6 : f32 to vector<40x256xf32>
    %33 = arith.select %31, %32, %27 : vector<40x256xi1>, vector<40x256xf32>
    %34 = vector.extract_strided_slice %1 {offsets = [0, 16], sizes = [40, 256], strides = [1, 1]} : vector<40x290xf32> to vector<40x256xf32>
    %c0_i32_7 = arith.constant 0 : i32
    %35 = vector.broadcast %c0_i32_7 : i32 to vector<1x256xi32>
    %36 = arith.cmpi eq, %18, %35 : vector<1x256xi32>
    %cst_8 = arith.constant 0.000000e+00 : f32
    %37 = vector.shape_cast %36 : vector<1x256xi1> to vector<1x256xi1>
    %38 = vector.broadcast %37 : vector<1x256xi1> to vector<40x256xi1>
    %39 = vector.broadcast %cst_8 : f32 to vector<40x256xf32>
    %40 = arith.select %38, %39, %34 : vector<40x256xi1>, vector<40x256xf32>
    %41 = vector.extract_strided_slice %1 {offsets = [0, 17], sizes = [40, 256], strides = [1, 1]} : vector<40x290xf32> to vector<40x256xf32>
    %42 = vector.extract_strided_slice %1 {offsets = [0, 18], sizes = [40, 256], strides = [1, 1]} : vector<40x290xf32> to vector<40x256xf32>
    %c15_i32_9 = arith.constant 15 : i32
    %43 = vector.broadcast %c15_i32_9 : i32 to vector<1x256xi32>
    %44 = arith.cmpi eq, %18, %43 : vector<1x256xi32>
    %cst_10 = arith.constant 0.000000e+00 : f32
    %45 = vector.shape_cast %44 : vector<1x256xi1> to vector<1x256xi1>
    %46 = vector.broadcast %45 : vector<1x256xi1> to vector<40x256xi1>
    %47 = vector.broadcast %cst_10 : f32 to vector<40x256xf32>
    %48 = arith.select %46, %47, %42 : vector<40x256xi1>, vector<40x256xf32>
    %49 = vector.extract_strided_slice %1 {offsets = [0, 32], sizes = [40, 256], strides = [1, 1]} : vector<40x290xf32> to vector<40x256xf32>
    %c0_i32_11 = arith.constant 0 : i32
    %50 = vector.broadcast %c0_i32_11 : i32 to vector<1x256xi32>
    %51 = arith.cmpi eq, %18, %50 : vector<1x256xi32>
    %cst_12 = arith.constant 0.000000e+00 : f32
    %52 = vector.shape_cast %51 : vector<1x256xi1> to vector<1x256xi1>
    %53 = vector.broadcast %52 : vector<1x256xi1> to vector<40x256xi1>
    %54 = vector.broadcast %cst_12 : f32 to vector<40x256xf32>
    %55 = arith.select %53, %54, %49 : vector<40x256xi1>, vector<40x256xf32>
    %56 = vector.extract_strided_slice %1 {offsets = [0, 33], sizes = [40, 256], strides = [1, 1]} : vector<40x290xf32> to vector<40x256xf32>
    %57 = vector.extract_strided_slice %1 {offsets = [0, 34], sizes = [40, 256], strides = [1, 1]} : vector<40x290xf32> to vector<40x256xf32>
    %c15_i32_13 = arith.constant 15 : i32
    %58 = vector.broadcast %c15_i32_13 : i32 to vector<1x256xi32>
    %59 = arith.cmpi eq, %18, %58 : vector<1x256xi32>
    %cst_14 = arith.constant 0.000000e+00 : f32
    %60 = vector.shape_cast %59 : vector<1x256xi1> to vector<1x256xi1>
    %61 = vector.broadcast %60 : vector<1x256xi1> to vector<40x256xi1>
    %62 = vector.broadcast %cst_14 : f32 to vector<40x256xf32>
    %63 = arith.select %61, %62, %57 : vector<40x256xi1>, vector<40x256xf32>
    %64 = tpu.concatenate %25, %26, %33, %40, %41, %48, %55, %56, %63 in 0 : vector<40x256xf32>, vector<40x256xf32>, vector<40x256xf32>, vector<40x256xf32>, vector<40x256xf32>, vector<40x256xf32>, vector<40x256xf32>, vector<40x256xf32>, vector<40x256xf32> -> vector<360x256xf32>
    %c0_15 = arith.constant 0 : index
    %c0_16 = arith.constant 0 : index
    %65 = vector.load %arg2[%c0_15, %c0_16] : memref<16x360xf32, #tpu.memory_space<vmem>>, vector<16x360xf32>
    %cst_17 = arith.constant dense<0.000000e+00> : vector<16x256xf32>
    %66 = tpu.matmul %65, %64, %cst_17 {dimension_numbers = #tpu.dot_dimension_numbers<[1], [0], [0], [1], [0, 0, 1, 1], [], []>} : vector<16x360xf32>, vector<360x256xf32>, vector<16x256xf32> -> vector<16x256xf32>
    %cst_18 = arith.constant dense<0.000000e+00> : vector<256xf32>
    %67 = vector.multi_reduction <add>, %66, %cst_18 [0] : vector<16x256xf32> to vector<256xf32>
    %68 = vector.shape_cast %67 : vector<256xf32> to vector<1x256xf32>
    %cst_19 = arith.constant 1.600000e+01 : f32
    %69 = vector.broadcast %cst_19 : f32 to vector<1x256xf32>
    %70 = arith.divf %68, %69 : vector<1x256xf32>
    %71 = vector.broadcast %70 : vector<1x256xf32> to vector<16x256xf32>
    %72 = arith.subf %66, %71 : vector<16x256xf32>
    %73 = arith.mulf %72, %72 : vector<16x256xf32>
    %cst_20 = arith.constant dense<0.000000e+00> : vector<256xf32>
    %74 = vector.multi_reduction <add>, %73, %cst_20 [0] : vector<16x256xf32> to vector<256xf32>
    %75 = vector.shape_cast %74 : vector<256xf32> to vector<1x256xf32>
    %cst_21 = arith.constant 1.600000e+01 : f32
    %76 = vector.broadcast %cst_21 : f32 to vector<1x256xf32>
    %77 = arith.divf %75, %76 : vector<1x256xf32>
    %78 = vector.broadcast %70 : vector<1x256xf32> to vector<16x256xf32>
    %79 = arith.subf %66, %78 : vector<16x256xf32>
    %cst_22 = arith.constant 9.99999974E-6 : f32
    %80 = vector.broadcast %cst_22 : f32 to vector<1x256xf32>
    %81 = arith.addf %77, %80 : vector<1x256xf32>
    %82 = math.rsqrt %81 : vector<1x256xf32>
    %83 = vector.broadcast %82 : vector<1x256xf32> to vector<16x256xf32>
    %84 = arith.mulf %79, %83 : vector<16x256xf32>
    %c0_23 = arith.constant 0 : index
    %c0_24 = arith.constant 0 : index
    %85 = vector.load %arg3[%c0_23, %c0_24] : memref<16x1xf32, #tpu.memory_space<vmem>>, vector<16x1xf32>
    %86 = vector.broadcast %85 : vector<16x1xf32> to vector<16x256xf32>
    %87 = arith.mulf %84, %86 : vector<16x256xf32>
    %c0_25 = arith.constant 0 : index
    %c0_26 = arith.constant 0 : index
    %88 = vector.load %arg4[%c0_25, %c0_26] : memref<16x1xf32, #tpu.memory_space<vmem>>, vector<16x1xf32>
    %89 = vector.broadcast %88 : vector<16x1xf32> to vector<16x256xf32>
    %90 = arith.addf %87, %89 : vector<16x256xf32>
    %cst_27 = arith.constant 5.000000e-01 : f32
    %91 = vector.broadcast %cst_27 : f32 to vector<16x256xf32>
    %92 = arith.mulf %91, %90 : vector<16x256xf32>
    %cst_28 = arith.constant 0.707106769 : f32
    %93 = vector.broadcast %cst_28 : f32 to vector<16x256xf32>
    %94 = arith.mulf %90, %93 : vector<16x256xf32>
    %cst_29 = arith.constant 0.000000e+00 : f32
    %95 = vector.broadcast %cst_29 : f32 to vector<16x256xf32>
    %96 = arith.cmpf olt, %94, %95 : vector<16x256xf32>
    %cst_30 = arith.constant -1.000000e+00 : f32
    %cst_31 = arith.constant 1.000000e+00 : f32
    %97 = vector.broadcast %cst_30 : f32 to vector<16x256xf32>
    %98 = vector.broadcast %cst_31 : f32 to vector<16x256xf32>
    %99 = arith.select %96, %97, %98 : vector<16x256xi1>, vector<16x256xf32>
    %100 = math.absf %94 : vector<16x256xf32>
    %cst_32 = arith.constant 0.327591091 : f32
    %101 = vector.broadcast %cst_32 : f32 to vector<16x256xf32>
    %102 = arith.mulf %101, %100 : vector<16x256xf32>
    %cst_33 = arith.constant 1.000000e+00 : f32
    %103 = vector.broadcast %cst_33 : f32 to vector<16x256xf32>
    %104 = arith.addf %103, %102 : vector<16x256xf32>
    %105 = tpu.reciprocal %104 {approx = true} : vector<16x256xf32> -> vector<16x256xf32>
    %cst_34 = arith.constant 1.06140542 : f32
    %106 = vector.broadcast %cst_34 : f32 to vector<16x256xf32>
    %107 = arith.mulf %106, %105 : vector<16x256xf32>
    %cst_35 = arith.constant -1.45315206 : f32
    %108 = vector.broadcast %cst_35 : f32 to vector<16x256xf32>
    %109 = arith.addf %107, %108 : vector<16x256xf32>
    %110 = arith.mulf %109, %105 : vector<16x256xf32>
    %cst_36 = arith.constant 1.42141378 : f32
    %111 = vector.broadcast %cst_36 : f32 to vector<16x256xf32>
    %112 = arith.addf %110, %111 : vector<16x256xf32>
    %113 = arith.mulf %112, %105 : vector<16x256xf32>
    %cst_37 = arith.constant -0.284496725 : f32
    %114 = vector.broadcast %cst_37 : f32 to vector<16x256xf32>
    %115 = arith.addf %113, %114 : vector<16x256xf32>
    %116 = arith.mulf %115, %105 : vector<16x256xf32>
    %cst_38 = arith.constant 0.254829586 : f32
    %117 = vector.broadcast %cst_38 : f32 to vector<16x256xf32>
    %118 = arith.addf %116, %117 : vector<16x256xf32>
    %119 = arith.mulf %118, %105 : vector<16x256xf32>
    %cst_39 = arith.constant 0.000000e+00 : f32
    %120 = vector.broadcast %cst_39 : f32 to vector<16x256xf32>
    %121 = arith.subf %120, %100 : vector<16x256xf32>
    %122 = arith.mulf %121, %100 : vector<16x256xf32>
    %123 = math.exp %122 : vector<16x256xf32>
    %124 = arith.mulf %119, %123 : vector<16x256xf32>
    %cst_40 = arith.constant 1.000000e+00 : f32
    %125 = vector.broadcast %cst_40 : f32 to vector<16x256xf32>
    %126 = arith.subf %125, %124 : vector<16x256xf32>
    %127 = arith.mulf %99, %126 : vector<16x256xf32>
    %cst_41 = arith.constant 1.000000e+00 : f32
    %128 = vector.broadcast %cst_41 : f32 to vector<16x256xf32>
    %129 = arith.addf %128, %127 : vector<16x256xf32>
    %130 = arith.mulf %92, %129 : vector<16x256xf32>
    %c0_42 = arith.constant 0 : index
    %c0_43 = arith.constant 0 : index
    %131 = vector.load %arg5[%c0_42, %c0_43] : memref<4x16xf32, #tpu.memory_space<vmem>>, vector<4x16xf32>
    %cst_44 = arith.constant dense<0.000000e+00> : vector<4x256xf32>
    %132 = tpu.matmul %131, %130, %cst_44 {dimension_numbers = #tpu.dot_dimension_numbers<[1], [0], [0], [1], [0, 0, 1, 1], [], []>} : vector<4x16xf32>, vector<16x256xf32>, vector<4x256xf32> -> vector<4x256xf32>
    %c0_45 = arith.constant 0 : index
    %c0_46 = arith.constant 0 : index
    %c0_47 = arith.constant 0 : index
    %133 = vector.load %arg6[%c0_45, %c0_46, %c0_47] : memref<1x4x256xf32, #tpu.memory_space<vmem>>, vector<1x4x256xf32>
    %134 = vector.shape_cast %133 : vector<1x4x256xf32> to vector<4x256xf32>
    %135 = vector.shape_cast %132 : vector<4x256xf32> to vector<1x4x256xf32>
    tpu.vector_store %arg6[%c0_45, %c0_46, %c0_47], %135 {strides = array<i32>} : memref<1x4x256xf32, #tpu.memory_space<vmem>>, vector<1x4x256xf32>,
    return
  }
  func.func @transform_0(%arg0: i32) -> (i32, i32, i32) {
    %c0_i32 = arith.constant 0 : i32
    %c0_i32_0 = arith.constant 0 : i32
    %c0_i32_1 = arith.constant 0 : i32
    return %arg0, %c0_i32, %c0_i32_0 : i32, i32, i32
  }
  func.func @transform_1(%arg0: i32) -> (i32, i32) {
    %c0_i32 = arith.constant 0 : i32
    %c0_i32_0 = arith.constant 0 : i32
    %c0_i32_1 = arith.constant 0 : i32
    return %c0_i32, %c0_i32_0 : i32, i32
  }
  func.func @transform_2(%arg0: i32) -> (i32, i32) {
    %c0_i32 = arith.constant 0 : i32
    %c0_i32_0 = arith.constant 0 : i32
    %c0_i32_1 = arith.constant 0 : i32
    return %c0_i32, %c0_i32_0 : i32, i32
  }
  func.func @transform_3(%arg0: i32) -> (i32, i32) {
    %c0_i32 = arith.constant 0 : i32
    %c0_i32_0 = arith.constant 0 : i32
    %c0_i32_1 = arith.constant 0 : i32
    return %c0_i32, %c0_i32_0 : i32, i32
  }
  func.func @transform_4(%arg0: i32) -> (i32, i32) {
    %c0_i32 = arith.constant 0 : i32
    %c0_i32_0 = arith.constant 0 : i32
    %c0_i32_1 = arith.constant 0 : i32
    return %c0_i32, %c0_i32_0 : i32, i32
  }
  func.func @transform_5(%arg0: i32) -> (i32, i32, i32) {
    %c0_i32 = arith.constant 0 : i32
    %c0_i32_0 = arith.constant 0 : i32
    %c0_i32_1 = arith.constant 0 : i32
    return %arg0, %c0_i32, %c0_i32_0 : i32, i32, i32
  }
}

</mosaic_0001>

<bundles_post_ra>
// kernel: _lambda_.17
= control target key start
LH: loop header
LB: loop body
LE: loop exit
PB: predicated region body
PF: predicated region fallthrough
CT: control target
= control target key end

     0   :  { %s794_s15 = smov 0   ;;  %s939_s0 = inlined_call_operand.vmem [shape: f32[2,4,290], index: 0, kind: input, shape index: {}]   ;;  %s940_s1 = inlined_call_operand.vmem [shape: f32[4,36], index: 1, kind: input, shape index: {}]   ;;  %s941_s2 = inlined_call_operand.vmem [shape: f32[4,1], index: 2, kind: input, shape index: {}]   ;;  %s942_s3 = inlined_call_operand.vmem [shape: f32[4,1], index: 3, kind: input, shape index: {}]   ;;  %s943_s4 = inlined_call_operand.vmem [shape: f32[2,4,256], index: 4, kind: output, shape index: {}]  }
   0x1 LB: > { %s664_s16 = sadd.s32 4294967295, %s756_s15   ;;  %p668_p0 = scmp.ge.s32.totalorder %s756_s15, 1  ;;  %s756_s15 = sphi %s794_s15, %s14_s15  }
   0x2   : > { %p162_p1 = scmp.lt.s32.totalorder %s756_s15, 3 }
   0x4   : > { %p163_p2 = pnand %p668_p0, %p162_p1 }
   0x5   : > { %p188_p3 = scmp.lt.s32.totalorder (!%p163_p2), %s664_s16, 1  ;;  %s758_s21 = smov (!%p163_p2), 126  }
   0x6   : > { %166 = sbr.rel (%p163_p2) target bundleno = 445 (0x1bd), region = 36  ;;  %s759_s22 = smov (!%p163_p2), 112  }
   0x7   : > { %s760_s23 = smov (!%p163_p2), 110   ;;  %s761_s24 = smov (!%p163_p2), 96  }
   0x8   : > { %s762_s25 = smov (!%p163_p2), 94   ;;  %s763_s26 = smov (!%p163_p2), 111  }
   0x9   : > { %s764_s27 = smov (!%p163_p2), 95   ;;  %s765_s28 = smov (!%p163_p2), 127  }
   0xb   : > { %s953_s16 = smov (!%p188_p3, %s664_s16), 1  ;;  %v200_v39 = vlaneseq  ;;  %vm336_vm1 = vcmask 769024   ;;  %vm408_vm3 = vcmask 1043456   ;;  %vm403_vm5 = vcmask 777216   ;;  %v543_v60 = vld [vmem:[%s942_s3] sm:$0xf] }
   0xc   : > { %s679_s17 = smul.u32 12, %s953_s16  ;;  %vm317_vm6 = vcmask 785408   ;;  %v535_v61 = vld [vmem:[%s941_s2] sm:$0xf]  ;;  %vm279_vm7 = vcmask 916480   ;;  %vm298_vm8 = vcmask 900096  }
   0xd   : > { %v838_v41 = vand.u32 127, %v200_v39  ;;  %vm260_vm9 = vcmask 1031168   ;;  %vm379_vm10 = vcmask 908288   ;;  %vm356_vm12 = vcmask 1039360   ;;  %v417_v51 = vld [vmem:[%s940_s1] sm:$0xf] }
   0xe   : > { %s192_s20 = scalar_lea.vmem %s939_s0, %s679_s17  ;;  %vm418_vm13 = vcmask 293888   ;;  %s678_s9 = sshll.u32 %s953_s16, 3 }
   0xf   : > { %v808_v0 = vld [vmem:[%s192_s20] sm:$0xff]  ;;  %v199_v1 = vld [vmem:[%s192_s20 + $0x8] sm:$0xf]  ;;  %v202_v45 = vadd.s32 128, %v838_v41  ;;  %v207_v47 = vand.u32 15, %v838_v41  ;;  %s197_s12 = scalar_lea.vmem %s943_s4, %s678_s9 }
  0x10   : > { %234 = vst [vmem:[#allocation1] ss:$2 sm:$0xff] %v808_v0 }
  0x11   : > { %250 = vst [vmem:[#allocation1 + $0x10] ss:$2 sm:$0xff] %v199_v1  ;;  %v214_v46 = vand.u32 15, %v202_v45  ;;  %vm842_vm0 = vcmp.eq.s32.totalorder %v207_v47, 15  ;;  %vm890_vm11 = vcmp.eq.s32.totalorder %v207_v47, 0 }
  0x13   : > { %vm848_vm2 = vcmp.eq.s32.totalorder %v214_v46, 15  ;;  %vm852_vm4 = vcmp.eq.s32.totalorder %v214_v46, 0 }
  0x17   : > { %v811_v2 = vld.sshfl [vmem:[#allocation1] sm:$0xff pattern:$0x75316420]  ;;  %v813_v3 = vld.sshfl [vmem:[#allocation1 + $0x8] sm:$0xff pattern:$0x75316420] }
  0x18   : > { %248 = vst [vmem:[#allocation1] ss:$2 sm:$0xff] %v808_v0  ;;  %v253_v4 = vld.sshfl [vmem:[#allocation1 + $0x10] sm:$0xff pattern:$0x75316420]  ;;  %v240_v46 = vsel %vm852_vm4, 0.0, %v813_v3 }
  0x19   : > { %269 = vst [vmem:[#allocation1 + $0x10] ss:$2 sm:$0xff] %v199_v1  ;;  %v239_v3 = vsel %vm890_vm11, 0.0, %v811_v2 }
  0x1f   : > { %v816_v5 = vld.sshfl [vmem:[#allocation1] sm:$0xff pattern:$0x75316420]  ;;  %v252_v6 = vld.sshfl [vmem:[#allocation1 + $0x8] sm:$0xff pattern:$0x75316420] }
  0x20   : > { %267 = vst [vmem:[#allocation1] ss:$2 sm:$0xff] %v808_v0  ;;  %v272_v7 = vld.sshfl [vmem:[#allocation1 + $0x10] sm:$0xff pattern:$0x75316420]  ;;  %v699_v8 = vpack.i.bf16 %v253_v4, %v252_v6  ;;  %v766_v4 = vmov 0  }
  0x21   : > { %288 = vst [vmem:[#allocation1 + $0x10] ss:$2 sm:$0xff] %v199_v1  ;;  %735 = vset.pattern.permute.xlu0 %v766_v4  ;;  %734 = vset.pattern.permute.xlu2 %v766_v4 }
  0x22   : > { %700 = vrot.lane.b32.xlu2 %v699_v8, %s758_s21 }
  0x27   : > { %v271_v9 = vld.sshfl [vmem:[#allocation1 + $0x8] sm:$0xff pattern:$0x75316420]  ;;  %v270_v10 = vld.sshfl [vmem:[#allocation1] sm:$0xff pattern:$0x75316420] }
  0x28   : > { %v704_v11 = vpack.i.bf16 %v272_v7, %v271_v9  ;;  %286 = vst [vmem:[#allocation1] ss:$2 sm:$0xff] %v808_v0  ;;  %v291_v12 = vld.sshfl [vmem:[#allocation1 + $0x10] sm:$0xff pattern:$0x75316420] }
  0x29   : > { %307 = vst [vmem:[#allocation1 + $0x10] ss:$2 sm:$0xff] %v199_v1 }
  0x2a   : > { %705 = vrot.lane.b32.xlu0 %v704_v11, %s759_s22 }
  0x2f   : > { %v290_v13 = vld.sshfl [vmem:[#allocation1 + $0x8] sm:$0xff pattern:$0x75316420]  ;;  %v289_v14 = vld.sshfl [vmem:[#allocation1] sm:$0xff pattern:$0x75316420] }
  0x30   : > { %v310_v15 = vld.sshfl [vmem:[#allocation1 + $0x10] sm:$0xff pattern:$0x75316420]  ;;  %v709_v16 = vpack.i.bf16 %v291_v12, %v290_v13  ;;  %305 = vst [vmem:[#allocation1] ss:$2 sm:$0xff] %v808_v0 }
  0x31   : > { %326 = vst [vmem:[#allocation1 + $0x10] ss:$2 sm:$0xff] %v199_v1 }
  0x32   : > { %710 = vrot.lane.b32.xlu1 %v709_v16, %s760_s23  ;;  %273 = vrot.lane.b32.xlu0 %v270_v10, %s759_s22 }
  0x37   : > { %v308_v17 = vld.sshfl [vmem:[#allocation1] sm:$0xff pattern:$0x75316420]  ;;  %v309_v18 = vld.sshfl [vmem:[#allocation1 + $0x8] sm:$0xff pattern:$0x75316420] }
  0x38   : > { %v329_v19 = vld.sshfl [vmem:[#allocation1 + $0x10] sm:$0xff pattern:$0x75316420]  ;;  %324 = vst [vmem:[#allocation1] ss:$2 sm:$0xff] %v808_v0  ;;  %311 = vrot.lane.b32.xlu2 %v308_v17, %s761_s24  ;;  %v714_v20 = vpack.i.bf16 %v310_v15, %v309_v18 }
  0x39   : > { %346 = vst [vmem:[#allocation1 + $0x11] ss:$2 sm:$0xff] %v199_v1 }
  0x3a   : > { %292 = vrot.lane.b32.xlu1 %v289_v14, %s760_s23  ;;  %334 = vrot.lane.b32.xlu0 %v329_v19, %s762_s25 }
  0x3f   : > { %v328_v21 = vld.sshfl [vmem:[#allocation1 + $0x8] sm:$0xff pattern:$0x75316420]  ;;  %v327_v22 = vld.sshfl [vmem:[#allocation1] sm:$0xff pattern:$0x75316420] }
  0x40   : > { %v349_v23 = vld.sshfl [vmem:[#allocation1 + $0x10] sm:$0xff pattern:$0x75316420]  ;;  %344 = vst [vmem:[#allocation1 + $0x1] ss:$2 sm:$0xff] %v808_v0  ;;  %330 = vrot.lane.b32.xlu2 %v327_v22, %s762_s25 }
  0x41   : > { %369 = vst [vmem:[#allocation1 + $0x10] ss:$2 sm:$0xff] %v199_v1 }
  0x42   : > { %715 = vrot.lane.b32.xlu1 %v714_v20, %s761_s24  ;;  %332 = vrot.lane.b32.xlu0 %v328_v21, %s762_s25 }
  0x47   : > { %v347_v24 = vld.sshfl [vmem:[#allocation1] sm:$0xff pattern:$0x75316420]  ;;  %v348_v25 = vld.sshfl [vmem:[#allocation1 + $0x8] sm:$0xff pattern:$0x75316420] }
  0x48   : > { %367 = vst [vmem:[#allocation1] ss:$2 sm:$0xff] %v808_v0  ;;  %v372_v26 = vld.sshfl [vmem:[#allocation1 + $0x10] sm:$0xff pattern:$0x75316420]  ;;  %v729_v31 = vpack.i.bf16 %v349_v23, %v348_v25 }
  0x49   : > { %393 = vst [vmem:[#allocation1 + $0x11] ss:$2 sm:$0xff] %v199_v1 }
  0x4f   : > { %v370_v27 = vld.sshfl [vmem:[#allocation1] sm:$0xff pattern:$0x75316420]  ;;  %v371_v28 = vld.sshfl [vmem:[#allocation1 + $0x8] sm:$0xff pattern:$0x75316420] }
  0x50   : > { %373 = vrot.lane.b32.xlu1 %v370_v27, %s763_s26  ;;  %v719_v29 = vpack.i.bf16 %v372_v26, %v371_v28  ;;  %391 = vst [vmem:[#allocation1 + $0x1] ss:$2 sm:$0xff] %v808_v0  ;;  %v396_v30 = vld.sshfl [vmem:[#allocation1 + $0x10] sm:$0xff pattern:$0x75316420] }
  0x52   : > { %720 = vrot.lane.b32.xlu0 %v719_v29, %s763_s26 }
  0x57   : > { %v394_v32 = vld.sshfl [vmem:[#allocation1] sm:$0xff pattern:$0x75316420]  ;;  %v395_v33 = vld.sshfl [vmem:[#allocation1 + $0x8] sm:$0xff pattern:$0x75316420] }
  0x58   : > { %397 = vrot.lane.b32.xlu1 %v394_v32, %s764_s27  ;;  %v724_v34 = vpack.i.bf16 %v396_v30, %v395_v33 }
  0x5a   : > { %730 = vrot.lane.b32.xlu0 %v729_v31, %s765_s28  ;;  %725 = vrot.lane.b32.xlu2 %v724_v34, %s764_s27 }
  0x60   : > { %350 = vrot.lane.b32.xlu1 %v347_v24, %s765_s28 }
  0x62   : > { %254 = vrot.lane.b32.xlu2 %v816_v5, %s758_s21  ;;  %546 = vperm.xlu0 %735, %v543_v60  }
  0x6a   : > { %538 = vperm.xlu2 %734, %v535_v61  }
  0x7c   : > { %v828_v35 = vpop.permute.xlu2 %700 }
  0x7d   : > { %v703_v11 = vunpack.i.h.bf16 %v828_v35  ;;  %v702_v12 = vunpack.i.l.bf16 %v828_v35 }
  0x7f   : > { %v262_v19 = vsel %vm260_vm9, %v702_v12, %v703_v11 }
  0x80   : > { %v266_v27 = vsel %vm848_vm2, 0.0, %v262_v19 }
  0x92   : > { %v832_v37 = vpop.permute.xlu2 %311 }
  0x9a   : > { %v331_v42 = vpop.permute.xlu2 %330 }
  0x9c   : > { %v830_v36 = vpop.permute.xlu0 %705 }
  0x9d   : > { %v708_v7 = vunpack.i.h.bf16 %v830_v36  ;;  %v707_v8 = vunpack.i.l.bf16 %v830_v36 }
  0x9f   : > { %v281_v14 = vsel %vm279_vm7, %v707_v8, %v708_v7 }
  0xa0   : > { %v285_v17 = vsel %vm852_vm4, 0.0, %v281_v14 }
  0xa1   : > { %v364_v24 = vrot.slane %v285_v17, 4 }
  0xa3   : > { %v412_v35 = vsel %vm408_vm3, %v266_v27, %v364_v24 }
  0xa4   : > { %v834_v38 = vpop.permute.xlu1 %710  ;;  %v836_v40 = vpop.permute.xlu0 %273 }
  0xa5   : > { %v713_v9 = vunpack.i.h.bf16 %v834_v38  ;;  %v712_v10 = vunpack.i.l.bf16 %v834_v38  ;;  %v280_v29 = vsel %vm279_vm7, %v836_v40, %v707_v8 }
  0xa6   : > { %v284_v36 = vsel %vm890_vm11, 0.0, %v280_v29 }
  0xa7   : > { %v300_v13 = vsel %vm298_vm8, %v712_v10, %v713_v9  ;;  %v363_v47 = vrot.slane %v284_v36, 4 }
  0xa8   : > { %v304_v16 = vsel %vm848_vm2, 0.0, %v300_v13 }
  0xa9   : > { %v387_v23 = vrot.slane %v304_v16, 4 }
  0xac   : > { %v293_v43 = vpop.permute.xlu1 %292  ;;  %v335_v44 = vpop.permute.xlu0 %334 }
  0xad   : > { %v299_v22 = vsel %vm298_vm8, %v293_v43, %v712_v10 }
  0xae   : > { %v303_v32 = vsel %vm842_vm0, 0.0, %v299_v22 }
  0xaf   : > { %v386_v40 = vrot.slane %v303_v32, 4 }
  0xb4   : > { %v846_v49 = vpop.permute.xlu2 %725  ;;  %v716_v50 = vpop.permute.xlu1 %715 }
  0xb5   : > { %v728_v53 = vunpack.i.h.bf16 %v846_v49  ;;  %v727_v54 = vunpack.i.l.bf16 %v846_v49  ;;  %v718_v55 = vunpack.i.h.bf16 %v716_v50  ;;  %v717_v56 = vunpack.i.l.bf16 %v716_v50  ;;  %v333_v57 = vpop.permute.xlu0 %332 }
  0xb6   : > { %v338_v58 = vsel %vm336_vm1, %v333_v57, %v335_v44  ;;  %v337_v59 = vsel %vm336_vm1, %v331_v42, %v333_v57 }
  0xb7   : > { %v342_v62 = vsel %vm848_vm2, 0.0, %v338_v58  ;;  %v319_v63 = vsel %vm317_vm6, %v717_v56, %v718_v55  ;;  %v405_v0 = vsel %vm403_vm5, %v727_v54, %v728_v53  ;;  %v341_v1 = vsel %vm842_vm0, 0.0, %v337_v59 }
  0xb8   : > { %674 = vmatpush.msk.msra.mxu1 %vm408_vm3, %v342_v62  ;;  %v323_v5 = vsel %vm852_vm4, 0.0, %v319_v63  ;;  %672 = vmatpush.msk.msra.mxu0 %vm408_vm3, %v341_v1  ;;  %v318_v31 = vsel %vm317_vm6, %v832_v37, %v717_v56  ;;  %v767_v56 = vmov 4.0  }
  0xb9   : > { %v416_v6 = vsel %vm408_vm3, %v323_v5, %v405_v0  ;;  %v322_v39 = vsel %vm890_vm11, 0.0, %v318_v31  ;;  %736 = vrcp.f32 %v767_v56 }
  0xba   : > { %460 = vmatpush.msra.mxu1 %v416_v6 }
  0xbc   : > { %v255_v25 = vpop.permute.xlu2 %254 }
  0xbd   : > { %v261_v33 = vsel %vm260_vm9, %v255_v25, %v702_v12 }
  0xbe   : > { %v265_v45 = vsel %vm842_vm0, 0.0, %v261_v33 }
  0xbf   : > { %v411_v53 = vsel %vm408_vm3, %v265_v45, %v363_v47  ;;  %v737_v57 = vpop.eup %736 }
  0xc0   : > { %v483_v58 = vmul.f32 4.0, %v737_v57  ;;  %vm487_vm14 = vweird.f32 %v737_v57 }
  0xc2   : > { %v374_v15 = vpop.permute.xlu1 %373  ;;  %v484_v59 = vsub.f32 1.0, %v483_v58 }
  0xc4   : > { %v721_v18 = vpop.permute.xlu0 %720  ;;  %v485_v63 = vmul.f32 %v737_v57, %v484_v59 }
  0xc5   : > { %v723_v20 = vunpack.i.h.bf16 %v721_v18  ;;  %v722_v21 = vunpack.i.l.bf16 %v721_v18 }
  0xc6   : > { %v486_v6 = vadd.f32 %v737_v57, %v485_v63 }
  0xc7   : > { %v381_v26 = vsel %vm379_vm10, %v722_v21, %v723_v20  ;;  %v380_v37 = vsel %vm379_vm10, %v374_v15, %v722_v21 }
  0xc8   : > { %v414_v30 = vsel %vm408_vm3, %v381_v26, %v387_v23  ;;  %v413_v49 = vsel %vm408_vm3, %v380_v37, %v386_v40  ;;  %v488_v11 = vsel %vm487_vm14, %v737_v57, %v486_v6 }
  0xc9   : > { %461 = vmatpush.msra.mxu1 %v414_v30 }
  0xca   : > { %v398_v34 = vpop.permute.xlu1 %397 }
  0xcb   : > { %v404_v38 = vsel %vm403_vm5, %v398_v34, %v727_v54  ;;  %462 = vmatpush.msra.mxu1 %v412_v35 }
  0xcc   : > { %v731_v41 = vpop.permute.xlu0 %730  ;;  %v415_v42 = vsel %vm408_vm3, %v322_v39, %v404_v38 }
  0xcd   : > { %v733_v43 = vunpack.i.h.bf16 %v731_v41  ;;  %v732_v44 = vunpack.i.l.bf16 %v731_v41  ;;  %440 = vmatpush.msra.mxu0 %v415_v42 }
  0xcf   : > { %441 = vmatpush.msra.mxu0 %v413_v49  ;;  %v358_v50 = vsel %vm356_vm12, %v732_v44, %v733_v43 }
  0xd0   : > { %v410_v48 = vsel %vm408_vm3, %v240_v46, %v358_v50 }
  0xd1   : > { %442 = vmatpush.msra.mxu0 %v411_v53  ;;  %463 = vmatpush.msra.mxu1 %v410_v48 }
  0xd2   : > { %675 = vmatmul.msk.f32.vlgmr.msra.gmra.mxu1 %vm418_vm13, %v417_v51  ;;  %v351_v52 = vpop.permute.xlu1 %350 }
  0xd3   : > { %v357_v54 = vsel %vm356_vm12, %v351_v52, %v732_v44 }
  0xd4   : > { %v409_v55 = vsel %vm408_vm3, %v239_v3, %v357_v54  ;;  %v547_v54 = vpop.permute.xlu0 %546 }
  0xd5   : > { %443 = vmatpush.msra.mxu0 %v409_v55 }
  0xd6   : > { %673 = vmatmul.msk.f32.vlgmr.msra.gmra.mxu0 %vm418_vm13, %v417_v51  ;;  %v539_v51 = vpop.permute.xlu2 %538 }
 0x14f   : > { %v465_v60 = vpop.f32.mrf.mxu1 }
 0x150   : > { %v475_v61 = vsel %vm408_vm3, %v465_v60, 0.0 }
 0x151   : > { %v476_v62 = vrot.slane %v475_v61, 4 }
 0x153   : > { %v477_v0 = vadd.f32 %v476_v62, %v475_v61  ;;  %v445_v2 = vpop.f32.mrf.mxu0 }
 0x154   : > { %v468_v1 = vsel %vm408_vm3, %v445_v2, 0.0 }
 0x155   : > { %v478_v4 = vrot.slane %v477_v0, 2  ;;  %v469_v5 = vrot.slane %v468_v1, 4 }
 0x157   : > { %v479_v7 = vadd.f32 %v478_v4, %v477_v0  ;;  %v470_v8 = vadd.f32 %v469_v5, %v468_v1 }
 0x159   : > { %v480_v9 = vrot.slane %v479_v7, 1  ;;  %v471_v10 = vrot.slane %v470_v8, 2 }
 0x15b   : > { %v481_v12 = vadd.f32 %v480_v9, %v479_v7  ;;  %v472_v13 = vadd.f32 %v471_v10, %v470_v8 }
 0x15d   : > { %v490_v14 = vmul.f32 %v488_v11, %v481_v12  ;;  %v473_v15 = vrot.slane %v472_v13, 1 }
 0x15f   : > { %v492_v16 = vsub.f32 %v465_v60, %v490_v14  ;;  %v474_v17 = vadd.f32 %v473_v15, %v472_v13 }
 0x161   : > { %v494_v18 = vmul.f32 %v492_v16, %v492_v16  ;;  %v489_v19 = vmul.f32 %v488_v11, %v474_v17 }
 0x163   : > { %v502_v20 = vsel %vm408_vm3, %v494_v18, 0.0  ;;  %v491_v21 = vsub.f32 %v445_v2, %v489_v19 }
 0x164   : > { %v503_v22 = vrot.slane %v502_v20, 4 }
 0x165   : > { %v493_v23 = vmul.f32 %v491_v21, %v491_v21 }
 0x166   : > { %v504_v24 = vadd.f32 %v503_v22, %v502_v20 }
 0x167   : > { %v495_v25 = vsel %vm408_vm3, %v493_v23, 0.0 }
 0x168   : > { %v505_v26 = vrot.slane %v504_v24, 2  ;;  %v496_v27 = vrot.slane %v495_v25, 4 }
 0x16a   : > { %v506_v28 = vadd.f32 %v505_v26, %v504_v24  ;;  %v497_v29 = vadd.f32 %v496_v27, %v495_v25 }
 0x16c   : > { %v507_v30 = vrot.slane %v506_v28, 1  ;;  %v498_v31 = vrot.slane %v497_v29, 2 }
 0x16e   : > { %v508_v32 = vadd.f32 %v507_v30, %v506_v28  ;;  %v499_v33 = vadd.f32 %v498_v31, %v497_v29 }
 0x170   : > { %v510_v34 = vmul.f32 %v508_v32, %v488_v11  ;;  %v500_v35 = vrot.slane %v499_v33, 1 }
 0x172   : > { %v512_v36 = vadd.f32 1e-05, %v510_v34  ;;  %v501_v38 = vadd.f32 %v500_v35, %v499_v33 }
 0x174   : > { %738 = vrsqrt.f32 %v512_v36  ;;  %v509_v39 = vmul.f32 %v501_v38, %v488_v11  ;;  %vm529_vm0 = vweird.f32 %v512_v36 }
 0x176   : > { %v511_v37 = vadd.f32 1e-05, %v509_v39 }
 0x178   : > { %740 = vrsqrt.f32 %v511_v37  ;;  %vm519_vm4 = vweird.f32 %v511_v37 }
 0x17a   : > { %v739_v40 = vpop.eup %738 }
 0x17b   : > { %v524_v41 = vmul.f32 %v739_v40, %v512_v36  ;;  %vm530_vm15 = vweird.f32 %v739_v40  ;;  %v768_v36 = vmov 1.0  }
 0x17c   : > { %vm531_vm1 = vmor %vm529_vm0, %vm530_vm15 }
 0x17d   : > { %v525_v42 = vmul.f32 %v739_v40, %v524_v41 }
 0x17e   : > { %v741_v43 = vpop.eup %740 }
 0x17f   : > { %v514_v44 = vmul.f32 %v741_v43, %v511_v37  ;;  %v526_v45 = vmul.f32 0.5, %v525_v42  ;;  %vm520_vm2 = vweird.f32 %v741_v43 }
 0x180   : > { %vm521_vm5 = vmor %vm519_vm4, %vm520_vm2 }
 0x181   : > { %v515_v46 = vmul.f32 %v741_v43, %v514_v44  ;;  %v527_v47 = vsub.f32 1.5, %v526_v45 }
 0x183   : > { %v516_v49 = vmul.f32 0.5, %v515_v46  ;;  %v528_v50 = vmul.f32 %v739_v40, %v527_v47 }
 0x185   : > { %v517_v53 = vsub.f32 1.5, %v516_v49  ;;  %v532_v48 = vsel %vm531_vm1, %v739_v40, %v528_v50 }
 0x186   : > { %v534_v3 = vmul.f32 %v532_v48, %v492_v16 }
 0x187   : > { %v518_v52 = vmul.f32 %v741_v43, %v517_v53 }
 0x188   : > { %v542_v55 = vmul.f32 %v539_v51, %v534_v3 }
 0x189   : > { %v522_v56 = vsel %vm521_vm5, %v741_v43, %v518_v52 }
 0x18a   : > { %v533_v57 = vmul.f32 %v522_v56, %v491_v21  ;;  %v550_v58 = vadd.f32 %v547_v54, %v542_v55 }
 0x18c   : > { %v541_v59 = vmul.f32 %v539_v51, %v533_v57  ;;  %v554_v60 = vmul.f32 0.70710677, %v550_v58  ;;  %v552_v40 = vmul.f32 0.5, %v550_v58 }
 0x18e   : > { %v549_v61 = vadd.f32 %v547_v54, %v541_v59  ;;  %v560_v62 = vand.u32 2147483647, %v554_v60  ;;  %vm556_vm6 = vcmp.lt.f32.partialorder %v554_v60, 0.0 }
 0x18f   : > { %v558_v38 = vsel %vm556_vm6, -1.0, %v768_v36 }
 0x190   : > { %v553_v63 = vmul.f32 0.70710677, %v549_v61  ;;  %v562_v0 = vmul.f32 0.3275911, %v560_v62  ;;  %v586_v7 = vsub.f32 0.0, %v560_v62  ;;  %v551_v46 = vmul.f32 0.5, %v549_v61 }
 0x192   : > { %v559_v2 = vand.u32 2147483647, %v553_v63  ;;  %v564_v1 = vadd.f32 1.0, %v562_v0  ;;  %v588_v12 = vmul.f32 %v586_v7, %v560_v62  ;;  %vm555_vm7 = vcmp.lt.f32.partialorder %v553_v63, 0.0 }
 0x193   : > { %v557_v43 = vsel %vm555_vm7, -1.0, %v768_v36 }
 0x194   : > { %v561_v4 = vmul.f32 0.3275911, %v559_v2  ;;  %742 = vrcp.f32 %v564_v1  ;;  %v585_v11 = vsub.f32 0.0, %v559_v2  ;;  %v591_v18 = vmul.f32 1.442695, %v588_v12 }
 0x196   : > { %v563_v5 = vadd.f32 1.0, %v561_v4  ;;  %v587_v17 = vmul.f32 %v585_v11, %v559_v2 }
 0x198   : > { %744 = vrcp.f32 %v563_v5  ;;  %v589_v23 = vmul.f32 1.442695, %v587_v17 }
 0x199   : > { %746 = vpow2.f32 %v591_v18 }
 0x19a   : > { %v743_v6 = vpop.eup %742  ;;  %748 = vpow2.f32 %v589_v23 }
 0x19b   : > { %v568_v8 = vmul.f32 1.0614054, %v743_v6 }
 0x19d   : > { %v570_v9 = vadd.f32 -1.4531521, %v568_v8 }
 0x19e   : > { %v745_v10 = vpop.eup %744 }
 0x19f   : > { %v567_v13 = vmul.f32 1.0614054, %v745_v10  ;;  %v572_v14 = vmul.f32 %v743_v6, %v570_v9  ;;  %v747_v30 = vpop.eup %746 }
 0x1a0   : > { %v749_v35 = vpop.eup %748 }
 0x1a1   : > { %v569_v15 = vadd.f32 -1.4531521, %v567_v13  ;;  %v574_v16 = vadd.f32 1.4214138, %v572_v14 }
 0x1a3   : > { %v571_v19 = vmul.f32 %v745_v10, %v569_v15  ;;  %v576_v20 = vmul.f32 %v743_v6, %v574_v16 }
 0x1a5   : > { %v573_v21 = vadd.f32 1.4214138, %v571_v19  ;;  %v578_v22 = vadd.f32 -0.28449672, %v576_v20 }
 0x1a7   : > { %v575_v24 = vmul.f32 %v745_v10, %v573_v21  ;;  %v580_v25 = vmul.f32 %v743_v6, %v578_v22 }
 0x1a9   : > { %v577_v26 = vadd.f32 -0.28449672, %v575_v24  ;;  %v582_v27 = vadd.f32 0.2548296, %v580_v25 }
 0x1ab   : > { %v579_v28 = vmul.f32 %v745_v10, %v577_v26  ;;  %v584_v29 = vmul.f32 %v743_v6, %v582_v27 }
 0x1ad   : > { %v581_v31 = vadd.f32 0.2548296, %v579_v28  ;;  %v594_v32 = vmul.f32 %v747_v30, %v584_v29 }
 0x1af   : > { %v583_v33 = vmul.f32 %v745_v10, %v581_v31  ;;  %v596_v34 = vsub.f32 1.0, %v594_v32 }
 0x1b1   : > { %v593_v39 = vmul.f32 %v749_v35, %v583_v33  ;;  %v598_v37 = vmul.f32 %v596_v34, %v558_v38 }
 0x1b3   : > { %v595_v41 = vsub.f32 1.0, %v593_v39  ;;  %v600_v42 = vadd.f32 1.0, %v598_v37 }
 0x1b5   : > { %v597_v44 = vmul.f32 %v595_v41, %v557_v43  ;;  %v602_v45 = vmul.f32 %v600_v42, %v552_v40 }
 0x1b7   : > { %v599_v47 = vadd.f32 1.0, %v597_v44  ;;  %v605_v50 = vrot.slane %v602_v45, 4 }
 0x1b9   : > { %v601_v49 = vmul.f32 %v599_v47, %v551_v46 }
 0x1bb   : > { %v606_v51 = vsel %vm408_vm3, %v601_v49, %v605_v50 }
 0x1bc   : > { %608 = vst [vmem:[%s197_s12] sm:$0xff] %v606_v51 }
 0x1bd PF: > { %s14_s15 = sadd.s32 1, %s756_s15  }
 0x1be   : > { %p11_p4 = scmp.ge.s32.totalorder %s14_s15, 4  }
 0x1c0   :  { %13 = sbr.rel (!%p11_p4) target bundleno = 1 (0x1), region = 76 }

// kernel: _lambda_.18
= control target key start
LH: loop header
LB: loop body
LE: loop exit
PB: predicated region body
PF: predicated region fallthrough
CT: control target
= control target key end

     0   :  { %s786_s15 = smov 0   ;;  %s903_s0 = inlined_call_operand.vmem [shape: f32[2,4,290], index: 0, kind: input, shape index: {}]   ;;  %s904_s1 = inlined_call_operand.vmem [shape: f32[8,36], index: 1, kind: input, shape index: {}]   ;;  %s905_s2 = inlined_call_operand.vmem [shape: f32[8,1], index: 2, kind: input, shape index: {}]   ;;  %s906_s3 = inlined_call_operand.vmem [shape: f32[8,1], index: 3, kind: input, shape index: {}]   ;;  %s907_s4 = inlined_call_operand.vmem [shape: f32[2,8,256], index: 4, kind: output, shape index: {}]  }
   0x1 LB: > { %s656_s16 = sadd.s32 4294967295, %s748_s15   ;;  %p660_p0 = scmp.ge.s32.totalorder %s748_s15, 1  ;;  %s748_s15 = sphi %s786_s15, %s14_s15  }
   0x2   : > { %p162_p1 = scmp.lt.s32.totalorder %s748_s15, 3 }
   0x4   : > { %p163_p2 = pnand %p660_p0, %p162_p1 }
   0x5   : > { %p188_p3 = scmp.lt.s32.totalorder (!%p163_p2), %s656_s16, 1  ;;  %s750_s21 = smov (!%p163_p2), 112  }
   0x6   : > { %166 = sbr.rel (%p163_p2) target bundleno = 447 (0x1bf), region = 36  ;;  %s751_s22 = smov (!%p163_p2), 126  }
   0x7   : > { %s752_s23 = smov (!%p163_p2), 110   ;;  %s753_s24 = smov (!%p163_p2), 96  }
   0x8   : > { %s754_s25 = smov (!%p163_p2), 94   ;;  %s755_s26 = smov (!%p163_p2), 95  }
   0x9   : > { %s756_s27 = smov (!%p163_p2), 111   ;;  %s757_s28 = smov (!%p163_p2), 127  }
   0xb   : > { %s917_s16 = smov (!%p188_p3, %s656_s16), 1  ;;  %v200_v41 = vlaneseq  ;;  %vm336_vm0 = vcmask 769024   ;;  %v539_v48 = vld [vmem:[%s906_s3] sm:$0xff]  ;;  %v758_v52 = vmov 0   ;;  %vm408_vm3 = vcmask 1043456  }
   0xc   : > { %s671_s17 = smul.u32 12, %s917_s16  ;;  %v531_v49 = vld [vmem:[%s905_s2] sm:$0xff]  ;;  %727 = vset.pattern.permute.xlu0 %v758_v52  ;;  %726 = vset.pattern.permute.xlu2 %v758_v52  ;;  %vm317_vm4 = vcmask 785408   ;;  %vm298_vm5 = vcmask 900096   ;;  %vm279_vm6 = vcmask 916480   ;;  %vm260_vm7 = vcmask 1031168  }
   0xd   : > { %v201_v43 = vand.u32 127, %v200_v41  ;;  %vm379_vm10 = vcmask 908288   ;;  %vm403_vm11 = vcmask 777216   ;;  %vm356_vm12 = vcmask 1039360   ;;  %v417_v54 = vld [vmem:[%s904_s1] sm:$0xff]  ;;  %s670_s9 = sshll.u32 %s917_s16, 4 }
   0xe   : > { %s192_s20 = scalar_lea.vmem %s903_s0, %s671_s17  ;;  %vm418_vm13 = vcmask 293888   ;;  %s197_s12 = scalar_lea.vmem %s907_s4, %s670_s9 }
   0xf   : > { %v199_v0 = vld [vmem:[%s192_s20 + $0x8] sm:$0xf]  ;;  %v800_v1 = vld [vmem:[%s192_s20] sm:$0xff]  ;;  %v202_v45 = vadd.s32 128, %v201_v43  ;;  %v207_v50 = vand.u32 15, %v201_v43 }
  0x10   : > { %250 = vst [vmem:[#allocation1 + $0x10] ss:$2 sm:$0xff] %v199_v0 }
  0x11   : > { %234 = vst [vmem:[#allocation1] ss:$2 sm:$0xff] %v800_v1  ;;  %v214_v51 = vand.u32 15, %v202_v45  ;;  %vm830_vm1 = vcmp.eq.s32.totalorder %v207_v50, 15  ;;  %vm847_vm8 = vcmp.eq.s32.totalorder %v207_v50, 0 }
  0x13   : > { %vm834_vm2 = vcmp.eq.s32.totalorder %v214_v51, 15  ;;  %vm851_vm9 = vcmp.eq.s32.totalorder %v214_v51, 0 }
  0x17   : > { %v803_v2 = vld.sshfl [vmem:[#allocation1 + $0x10] sm:$0xff pattern:$0x75316420] }
  0x18   : > { %269 = vst [vmem:[#allocation1 + $0x10] ss:$2 sm:$0xff] %v199_v0  ;;  %v805_v3 = vld.sshfl [vmem:[#allocation1] sm:$0xff pattern:$0x75316420] }
  0x19   : > { %v807_v4 = vld.sshfl [vmem:[#allocation1 + $0x8] sm:$0xff pattern:$0x75316420] }
  0x1a   : > { %248 = vst [vmem:[#allocation1] ss:$2 sm:$0xff] %v800_v1 }
  0x1f   : > { %v272_v5 = vld.sshfl [vmem:[#allocation1 + $0x10] sm:$0xff pattern:$0x75316420] }
  0x20   : > { %277 = vrot.lane.b32.xlu1 %v272_v5, %s750_s21  ;;  %288 = vst [vmem:[#allocation1 + $0x10] ss:$2 sm:$0xff] %v199_v0 }
  0x21   : > { %v251_v6 = vld.sshfl [vmem:[#allocation1] sm:$0xff pattern:$0x75316420]  ;;  %v252_v7 = vld.sshfl [vmem:[#allocation1 + $0x8] sm:$0xff pattern:$0x75316420] }
  0x22   : > { %267 = vst [vmem:[#allocation1] ss:$2 sm:$0xff] %v800_v1  ;;  %v691_v8 = vpack.i.bf16 %v252_v7, %v251_v6 }
  0x27   : > { %v291_v9 = vld.sshfl [vmem:[#allocation1 + $0x10] sm:$0xff pattern:$0x75316420] }
  0x28   : > { %692 = vrot.lane.b32.xlu1 %v691_v8, %s751_s22  ;;  %307 = vst [vmem:[#allocation1 + $0x10] ss:$2 sm:$0xff] %v199_v0  ;;  %296 = vrot.lane.b32.xlu2 %v291_v9, %s752_s23 }
  0x29   : > { %v270_v10 = vld.sshfl [vmem:[#allocation1] sm:$0xff pattern:$0x75316420]  ;;  %v271_v11 = vld.sshfl [vmem:[#allocation1 + $0x8] sm:$0xff pattern:$0x75316420] }
  0x2a   : > { %v696_v12 = vpack.i.bf16 %v271_v11, %v270_v10  ;;  %286 = vst [vmem:[#allocation1] ss:$2 sm:$0xff] %v800_v1 }
  0x2c   : > { %697 = vrot.lane.b32.xlu0 %v696_v12, %s750_s21 }
  0x2f   : > { %v310_v13 = vld.sshfl [vmem:[#allocation1 + $0x10] sm:$0xff pattern:$0x75316420] }
  0x30   : > { %326 = vst [vmem:[#allocation1 + $0x10] ss:$2 sm:$0xff] %v199_v0 }
  0x31   : > { %v289_v14 = vld.sshfl [vmem:[#allocation1] sm:$0xff pattern:$0x75316420]  ;;  %v290_v15 = vld.sshfl [vmem:[#allocation1 + $0x8] sm:$0xff pattern:$0x75316420] }
  0x32   : > { %v701_v16 = vpack.i.bf16 %v290_v15, %v289_v14  ;;  %305 = vst [vmem:[#allocation1] ss:$2 sm:$0xff] %v800_v1 }
  0x34   : > { %315 = vrot.lane.b32.xlu0 %v310_v13, %s753_s24  ;;  %702 = vrot.lane.b32.xlu1 %v701_v16, %s752_s23 }
  0x37   : > { %v329_v17 = vld.sshfl [vmem:[#allocation1 + $0x10] sm:$0xff pattern:$0x75316420] }
  0x38   : > { %346 = vst [vmem:[#allocation1 + $0x11] ss:$2 sm:$0xff] %v199_v0 }
  0x39   : > { %v308_v18 = vld.sshfl [vmem:[#allocation1] sm:$0xff pattern:$0x75316420]  ;;  %v309_v19 = vld.sshfl [vmem:[#allocation1 + $0x8] sm:$0xff pattern:$0x75316420] }
  0x3a   : > { %324 = vst [vmem:[#allocation1] ss:$2 sm:$0xff] %v800_v1  ;;  %v706_v20 = vpack.i.bf16 %v309_v19, %v308_v18 }
  0x3c   : > { %707 = vrot.lane.b32.xlu2 %v706_v20, %s753_s24  ;;  %334 = vrot.lane.b32.xlu1 %v329_v17, %s754_s25 }
  0x3f   : > { %v349_v21 = vld.sshfl [vmem:[#allocation1 + $0x10] sm:$0xff pattern:$0x75316420] }
  0x40   : > { %369 = vst [vmem:[#allocation1 + $0x10] ss:$2 sm:$0xff] %v199_v0 }
  0x41   : > { %v327_v22 = vld.sshfl [vmem:[#allocation1] sm:$0xff pattern:$0x75316420]  ;;  %v328_v23 = vld.sshfl [vmem:[#allocation1 + $0x8] sm:$0xff pattern:$0x75316420] }
  0x42   : > { %330 = vrot.lane.b32.xlu0 %v327_v22, %s754_s25  ;;  %344 = vst [vmem:[#allocation1 + $0x1] ss:$2 sm:$0xff] %v800_v1 }
  0x47   : > { %v372_v24 = vld.sshfl [vmem:[#allocation1 + $0x10] sm:$0xff pattern:$0x75316420] }
  0x48   : > { %393 = vst [vmem:[#allocation1 + $0x11] ss:$2 sm:$0xff] %v199_v0 }
  0x49   : > { %v347_v25 = vld.sshfl [vmem:[#allocation1] sm:$0xff pattern:$0x75316420]  ;;  %v348_v26 = vld.sshfl [vmem:[#allocation1 + $0x8] sm:$0xff pattern:$0x75316420] }
  0x4a   : > { %332 = vrot.lane.b32.xlu0 %v328_v23, %s754_s25  ;;  %367 = vst [vmem:[#allocation1] ss:$2 sm:$0xff] %v800_v1  ;;  %v716_v31 = vpack.i.bf16 %v348_v26, %v347_v25 }
  0x4f   : > { %v396_v27 = vld.sshfl [vmem:[#allocation1 + $0x10] sm:$0xff pattern:$0x75316420] }
  0x50   : > { %401 = vrot.lane.b32.xlu2 %v396_v27, %s755_s26 }
  0x51   : > { %v370_v28 = vld.sshfl [vmem:[#allocation1] sm:$0xff pattern:$0x75316420]  ;;  %v371_v29 = vld.sshfl [vmem:[#allocation1 + $0x8] sm:$0xff pattern:$0x75316420] }
  0x52   : > { %377 = vrot.lane.b32.xlu0 %v372_v24, %s756_s27  ;;  %391 = vst [vmem:[#allocation1 + $0x1] ss:$2 sm:$0xff] %v800_v1  ;;  %v711_v30 = vpack.i.bf16 %v371_v29, %v370_v28 }
  0x58   : > { %712 = vrot.lane.b32.xlu2 %v711_v30, %s756_s27 }
  0x59   : > { %v394_v32 = vld.sshfl [vmem:[#allocation1] sm:$0xff pattern:$0x75316420]  ;;  %v395_v33 = vld.sshfl [vmem:[#allocation1 + $0x8] sm:$0xff pattern:$0x75316420] }
  0x5a   : > { %v721_v34 = vpack.i.bf16 %v395_v33, %v394_v32  ;;  %717 = vrot.lane.b32.xlu0 %v716_v31, %s757_s28 }
  0x5c   : > { %722 = vrot.lane.b32.xlu1 %v721_v34, %s755_s26 }
  0x60   : > { %258 = vrot.lane.b32.xlu2 %v803_v2, %s751_s22 }
  0x62   : > { %542 = vperm.xlu0 %727, %v539_v48  }
  0x64   : > { %354 = vrot.lane.b32.xlu1 %v349_v21, %s757_s28 }
  0x68   : > { %534 = vperm.xlu2 %726, %v531_v49   ;;  %v240_v49 = vsel %vm851_vm9, 0.0, %v807_v4  ;;  %v759_v4 = vmov 8.0  }
  0x69   : > { %728 = vrcp.f32 %v759_v4 }
  0x6f   : > { %v729_v56 = vpop.eup %728 }
  0x70   : > { %vm485_vm14 = vweird.f32 %v729_v56 }
  0x82   : > { %v297_v37 = vpop.permute.xlu2 %296 }
  0x92   : > { %v278_v35 = vpop.permute.xlu1 %277 }
  0x96   : > { %v708_v40 = vpop.permute.xlu2 %707 }
  0x97   : > { %v709_v62 = vunpack.i.l.bf16 %v708_v40  ;;  %v710_v2 = vunpack.i.h.bf16 %v708_v40 }
  0x99   : > { %v318_v8 = vsel %vm317_vm4, %v709_v62, %v710_v2 }
  0x9a   : > { %v820_v38 = vpop.permute.xlu1 %692  ;;  %v322_v15 = vsel %vm847_vm8, 0.0, %v318_v8 }
  0x9b   : > { %v695_v6 = vunpack.i.h.bf16 %v820_v38  ;;  %v694_v7 = vunpack.i.l.bf16 %v820_v38 }
  0x9d   : > { %v261_v17 = vsel %vm260_vm7, %v694_v7, %v695_v6 }
  0x9e   : > { %v698_v36 = vpop.permute.xlu0 %697 }
  0x9f   : > { %v700_v0 = vunpack.i.h.bf16 %v698_v36  ;;  %v699_v1 = vunpack.i.l.bf16 %v698_v36 }
  0xa1   : > { %v280_v13 = vsel %vm279_vm6, %v699_v1, %v700_v0  ;;  %v281_v14 = vsel %vm279_vm6, %v700_v0, %v278_v35 }
  0xa2   : > { %v284_v25 = vsel %vm847_vm8, 0.0, %v280_v13  ;;  %v285_v26 = vsel %vm851_vm9, 0.0, %v281_v14 }
  0xa3   : > { %v363_v41 = vrot.slane %v284_v25, 4  ;;  %v364_v48 = vrot.slane %v285_v26, 4 }
  0xa6   : > { %v316_v39 = vpop.permute.xlu0 %315  ;;  %v703_v42 = vpop.permute.xlu1 %702 }
  0xa7   : > { %v704_v63 = vunpack.i.l.bf16 %v703_v42  ;;  %v705_v5 = vunpack.i.h.bf16 %v703_v42  ;;  %v319_v18 = vsel %vm317_vm4, %v710_v2, %v316_v39  ;;  %v265_v42 = vsel %vm830_vm1, 0.0, %v261_v17 }
  0xa8   : > { %v323_v32 = vsel %vm851_vm9, 0.0, %v319_v18  ;;  %v411_v51 = vsel %vm408_vm3, %v265_v42, %v363_v41 }
  0xa9   : > { %v299_v9 = vsel %vm298_vm5, %v704_v63, %v705_v5  ;;  %v300_v11 = vsel %vm298_vm5, %v705_v5, %v297_v37 }
  0xaa   : > { %v822_v46 = vpop.permute.xlu2 %401  ;;  %v303_v22 = vsel %vm830_vm1, 0.0, %v299_v9  ;;  %v304_v23 = vsel %vm834_vm2, 0.0, %v300_v11 }
  0xab   : > { %v386_v33 = vrot.slane %v303_v22, 4  ;;  %v387_v40 = vrot.slane %v304_v23, 4 }
  0xae   : > { %v335_v47 = vpop.permute.xlu1 %334 }
  0xb2   : > { %v713_v60 = vpop.permute.xlu2 %712 }
  0xb3   : > { %v715_v19 = vunpack.i.h.bf16 %v713_v60  ;;  %v714_v20 = vunpack.i.l.bf16 %v713_v60 }
  0xb4   : > { %v331_v44 = vpop.permute.xlu0 %330 }
  0xb5   : > { %v380_v37 = vsel %vm379_vm10, %v714_v20, %v715_v19 }
  0xba   : > { %v259_v21 = vpop.permute.xlu2 %258 }
  0xbb   : > { %v262_v31 = vsel %vm260_vm7, %v695_v6, %v259_v21 }
  0xbc   : > { %v333_v53 = vpop.permute.xlu0 %332  ;;  %v266_v43 = vsel %vm834_vm2, 0.0, %v262_v31 }
  0xbd   : > { %v337_v55 = vsel %vm336_vm0, %v331_v44, %v333_v53  ;;  %v338_v57 = vsel %vm336_vm0, %v333_v53, %v335_v47  ;;  %v239_v44 = vsel %vm847_vm8, 0.0, %v805_v3  ;;  %v412_v52 = vsel %vm408_vm3, %v266_v43, %v364_v48 }
  0xbe   : > { %v341_v58 = vsel %vm830_vm1, 0.0, %v337_v55  ;;  %v342_v59 = vsel %vm834_vm2, 0.0, %v338_v57  ;;  %v481_v57 = vmul.f32 8.0, %v729_v56 }
  0xbf   : > { %664 = vmatpush.msk.msra.mxu0 %vm408_vm3, %v341_v58  ;;  %666 = vmatpush.msk.msra.mxu1 %vm408_vm3, %v342_v59 }
  0xc0   : > { %v482_v58 = vsub.f32 1.0, %v481_v57 }
  0xc2   : > { %v483_v63 = vmul.f32 %v729_v56, %v482_v58  ;;  %v535_v48 = vpop.permute.xlu2 %534 }
  0xc4   : > { %v378_v61 = vpop.permute.xlu0 %377  ;;  %v484_v6 = vadd.f32 %v729_v56, %v483_v63 }
  0xc5   : > { %v381_v34 = vsel %vm379_vm10, %v715_v19, %v378_v61 }
  0xc6   : > { %v414_v47 = vsel %vm408_vm3, %v381_v34, %v387_v40  ;;  %v486_v11 = vsel %vm485_vm14, %v729_v56, %v484_v6 }
  0xcc   : > { %v718_v16 = vpop.permute.xlu0 %717 }
  0xcd   : > { %v720_v29 = vunpack.i.h.bf16 %v718_v16  ;;  %v719_v30 = vunpack.i.l.bf16 %v718_v16 }
  0xce   : > { %v723_v24 = vpop.permute.xlu1 %722 }
  0xcf   : > { %v725_v27 = vunpack.i.h.bf16 %v723_v24  ;;  %v724_v28 = vunpack.i.l.bf16 %v723_v24  ;;  %v357_v45 = vsel %vm356_vm12, %v719_v30, %v720_v29 }
  0xd0   : > { %v409_v3 = vsel %vm408_vm3, %v239_v44, %v357_v45 }
  0xd1   : > { %v404_v35 = vsel %vm403_vm11, %v724_v28, %v725_v27  ;;  %v405_v36 = vsel %vm403_vm11, %v725_v27, %v822_v46  ;;  %v413_v46 = vsel %vm408_vm3, %v380_v37, %v386_v33 }
  0xd2   : > { %v415_v38 = vsel %vm408_vm3, %v322_v15, %v404_v35  ;;  %v416_v39 = vsel %vm408_vm3, %v323_v32, %v405_v36 }
  0xd3   : > { %440 = vmatpush.msra.mxu0 %v415_v38  ;;  %460 = vmatpush.msra.mxu1 %v416_v39 }
  0xd5   : > { %441 = vmatpush.msra.mxu0 %v413_v46  ;;  %461 = vmatpush.msra.mxu1 %v414_v47 }
  0xd6   : > { %v355_v50 = vpop.permute.xlu1 %354 }
  0xd7   : > { %v358_v53 = vsel %vm356_vm12, %v720_v29, %v355_v50  ;;  %442 = vmatpush.msra.mxu0 %v411_v51  ;;  %462 = vmatpush.msra.mxu1 %v412_v52 }
  0xd8   : > { %v410_v55 = vsel %vm408_vm3, %v240_v49, %v358_v53 }
  0xd9   : > { %443 = vmatpush.msra.mxu0 %v409_v3  ;;  %463 = vmatpush.msra.mxu1 %v410_v55  ;;  %v543_v3 = vpop.permute.xlu0 %542 }
  0xda   : > { %665 = vmatmul.msk.f32.vlgmr.msra.gmra.mxu0 %vm418_vm13, %v417_v54  ;;  %667 = vmatmul.msk.f32.vlgmr.msra.gmra.mxu1 %vm418_vm13, %v417_v54 }
 0x157   : > { %v445_v59 = vpop.f32.mrf.mxu0  ;;  %v465_v60 = vpop.f32.mrf.mxu1 }
 0x158   : > { %v468_v61 = vrot.slane %v445_v59, 4  ;;  %v474_v62 = vrot.slane %v465_v60, 4 }
 0x15a   : > { %v469_v0 = vadd.f32 %v468_v61, %v445_v59  ;;  %v475_v1 = vadd.f32 %v474_v62, %v465_v60 }
 0x15c   : > { %v470_v2 = vrot.slane %v469_v0, 2  ;;  %v476_v5 = vrot.slane %v475_v1, 2 }
 0x15e   : > { %v471_v7 = vadd.f32 %v470_v2, %v469_v0  ;;  %v477_v8 = vadd.f32 %v476_v5, %v475_v1 }
 0x160   : > { %v472_v9 = vrot.slane %v471_v7, 1  ;;  %v478_v10 = vrot.slane %v477_v8, 1 }
 0x162   : > { %v473_v12 = vadd.f32 %v472_v9, %v471_v7  ;;  %v479_v13 = vadd.f32 %v478_v10, %v477_v8 }
 0x164   : > { %v487_v14 = vmul.f32 %v486_v11, %v473_v12  ;;  %v488_v15 = vmul.f32 %v486_v11, %v479_v13 }
 0x166   : > { %v489_v16 = vsub.f32 %v445_v59, %v487_v14  ;;  %v490_v17 = vsub.f32 %v465_v60, %v488_v15 }
 0x168   : > { %v491_v18 = vmul.f32 %v489_v16, %v489_v16  ;;  %v492_v19 = vmul.f32 %v490_v17, %v490_v17 }
 0x16a   : > { %v493_v20 = vrot.slane %v491_v18, 4  ;;  %v499_v21 = vrot.slane %v492_v19, 4 }
 0x16c   : > { %v494_v22 = vadd.f32 %v493_v20, %v491_v18  ;;  %v500_v23 = vadd.f32 %v499_v21, %v492_v19 }
 0x16e   : > { %v495_v24 = vrot.slane %v494_v22, 2  ;;  %v501_v25 = vrot.slane %v500_v23, 2 }
 0x170   : > { %v496_v26 = vadd.f32 %v495_v24, %v494_v22  ;;  %v502_v27 = vadd.f32 %v501_v25, %v500_v23 }
 0x172   : > { %v497_v28 = vrot.slane %v496_v26, 1  ;;  %v503_v29 = vrot.slane %v502_v27, 1 }
 0x174   : > { %v498_v30 = vadd.f32 %v497_v28, %v496_v26  ;;  %v504_v31 = vadd.f32 %v503_v29, %v502_v27 }
 0x176   : > { %v505_v32 = vmul.f32 %v498_v30, %v486_v11  ;;  %v506_v33 = vmul.f32 %v504_v31, %v486_v11 }
 0x178   : > { %v507_v34 = vadd.f32 1e-05, %v505_v32  ;;  %v508_v35 = vadd.f32 1e-05, %v506_v33  ;;  %v760_v33 = vmov 1.0  }
 0x17a   : > { %730 = vrsqrt.f32 %v507_v34  ;;  %vm515_vm1 = vweird.f32 %v507_v34  ;;  %vm525_vm3 = vweird.f32 %v508_v35 }
 0x17b   : > { %732 = vrsqrt.f32 %v508_v35 }
 0x180   : > { %v731_v36 = vpop.eup %730 }
 0x181   : > { %v733_v37 = vpop.eup %732  ;;  %v510_v38 = vmul.f32 %v731_v36, %v507_v34  ;;  %vm516_vm15 = vweird.f32 %v731_v36 }
 0x182   : > { %v520_v39 = vmul.f32 %v733_v37, %v508_v35  ;;  %vm526_vm0 = vweird.f32 %v733_v37  ;;  %vm517_vm2 = vmor %vm515_vm1, %vm516_vm15 }
 0x183   : > { %v511_v40 = vmul.f32 %v731_v36, %v510_v38  ;;  %vm527_vm4 = vmor %vm525_vm3, %vm526_vm0 }
 0x184   : > { %v521_v41 = vmul.f32 %v733_v37, %v520_v39 }
 0x185   : > { %v512_v42 = vmul.f32 0.5, %v511_v40 }
 0x186   : > { %v522_v43 = vmul.f32 0.5, %v521_v41 }
 0x187   : > { %v513_v44 = vsub.f32 1.5, %v512_v42 }
 0x188   : > { %v523_v45 = vsub.f32 1.5, %v522_v43 }
 0x189   : > { %v514_v46 = vmul.f32 %v731_v36, %v513_v44 }
 0x18a   : > { %v524_v47 = vmul.f32 %v733_v37, %v523_v45 }
 0x18b   : > { %v518_v49 = vsel %vm517_vm2, %v731_v36, %v514_v46 }
 0x18c   : > { %v528_v50 = vsel %vm527_vm4, %v733_v37, %v524_v47  ;;  %v529_v51 = vmul.f32 %v518_v49, %v489_v16 }
 0x18d   : > { %v530_v52 = vmul.f32 %v528_v50, %v490_v17 }
 0x18e   : > { %v537_v53 = vmul.f32 %v535_v48, %v529_v51 }
 0x18f   : > { %v538_v54 = vmul.f32 %v535_v48, %v530_v52 }
 0x190   : > { %v545_v55 = vadd.f32 %v543_v3, %v537_v53 }
 0x191   : > { %v546_v4 = vadd.f32 %v543_v3, %v538_v54 }
 0x192   : > { %v549_v56 = vmul.f32 0.70710677, %v545_v55  ;;  %v547_v39 = vmul.f32 0.5, %v545_v55 }
 0x193   : > { %v550_v57 = vmul.f32 0.70710677, %v546_v4  ;;  %v548_v41 = vmul.f32 0.5, %v546_v4 }
 0x194   : > { %v555_v58 = vand.u32 2147483647, %v549_v56  ;;  %vm551_vm5 = vcmp.lt.f32.partialorder %v549_v56, 0.0 }
 0x195   : > { %v556_v59 = vand.u32 2147483647, %v550_v57  ;;  %vm552_vm6 = vcmp.lt.f32.partialorder %v550_v57, 0.0  ;;  %v553_v34 = vsel %vm551_vm5, -1.0, %v760_v33 }
 0x196   : > { %v557_v60 = vmul.f32 0.3275911, %v555_v58  ;;  %v581_v1 = vsub.f32 0.0, %v555_v58  ;;  %v554_v36 = vsel %vm552_vm6, -1.0, %v760_v33 }
 0x197   : > { %v558_v61 = vmul.f32 0.3275911, %v556_v59  ;;  %v582_v6 = vsub.f32 0.0, %v556_v59 }
 0x198   : > { %v559_v62 = vadd.f32 1.0, %v557_v60  ;;  %v583_v10 = vmul.f32 %v581_v1, %v555_v58 }
 0x199   : > { %v560_v63 = vadd.f32 1.0, %v558_v61  ;;  %v584_v12 = vmul.f32 %v582_v6, %v556_v59 }
 0x19a   : > { %734 = vrcp.f32 %v559_v62  ;;  %v585_v16 = vmul.f32 1.442695, %v583_v10 }
 0x19b   : > { %736 = vrcp.f32 %v560_v63  ;;  %v587_v18 = vmul.f32 1.442695, %v584_v12 }
 0x19c   : > { %738 = vpow2.f32 %v585_v16 }
 0x19d   : > { %740 = vpow2.f32 %v587_v18 }
 0x1a0   : > { %v735_v0 = vpop.eup %734 }
 0x1a1   : > { %v737_v2 = vpop.eup %736  ;;  %v563_v5 = vmul.f32 1.0614054, %v735_v0 }
 0x1a2   : > { %v564_v7 = vmul.f32 1.0614054, %v737_v2  ;;  %v739_v27 = vpop.eup %738 }
 0x1a3   : > { %v565_v8 = vadd.f32 -1.4531521, %v563_v5  ;;  %v741_v29 = vpop.eup %740 }
 0x1a4   : > { %v566_v9 = vadd.f32 -1.4531521, %v564_v7 }
 0x1a5   : > { %v567_v11 = vmul.f32 %v735_v0, %v565_v8 }
 0x1a6   : > { %v568_v13 = vmul.f32 %v737_v2, %v566_v9 }
 0x1a7   : > { %v569_v14 = vadd.f32 1.4214138, %v567_v11 }
 0x1a8   : > { %v570_v15 = vadd.f32 1.4214138, %v568_v13 }
 0x1a9   : > { %v571_v17 = vmul.f32 %v735_v0, %v569_v14 }
 0x1aa   : > { %v572_v19 = vmul.f32 %v737_v2, %v570_v15 }
 0x1ab   : > { %v573_v20 = vadd.f32 -0.28449672, %v571_v17 }
 0x1ac   : > { %v574_v21 = vadd.f32 -0.28449672, %v572_v19 }
 0x1ad   : > { %v575_v22 = vmul.f32 %v735_v0, %v573_v20 }
 0x1ae   : > { %v576_v23 = vmul.f32 %v737_v2, %v574_v21 }
 0x1af   : > { %v577_v24 = vadd.f32 0.2548296, %v575_v22 }
 0x1b0   : > { %v578_v25 = vadd.f32 0.2548296, %v576_v23 }
 0x1b1   : > { %v579_v26 = vmul.f32 %v735_v0, %v577_v24 }
 0x1b2   : > { %v580_v28 = vmul.f32 %v737_v2, %v578_v25 }
 0x1b3   : > { %v589_v30 = vmul.f32 %v739_v27, %v579_v26 }
 0x1b4   : > { %v590_v31 = vmul.f32 %v741_v29, %v580_v28 }
 0x1b5   : > { %v591_v32 = vsub.f32 1.0, %v589_v30 }
 0x1b6   : > { %v592_v35 = vsub.f32 1.0, %v590_v31 }
 0x1b7   : > { %v593_v37 = vmul.f32 %v591_v32, %v553_v34 }
 0x1b8   : > { %v594_v38 = vmul.f32 %v592_v35, %v554_v36 }
 0x1b9   : > { %v595_v40 = vadd.f32 1.0, %v593_v37 }
 0x1ba   : > { %v596_v42 = vadd.f32 1.0, %v594_v38 }
 0x1bb   : > { %v597_v43 = vmul.f32 %v595_v40, %v547_v39 }
 0x1bc   : > { %v598_v44 = vmul.f32 %v596_v42, %v548_v41 }
 0x1bd   : > { %599 = vst [vmem:[%s197_s12] sm:$0xff] %v597_v43 }
 0x1be   : > { %600 = vst [vmem:[%s197_s12 + $0x8] sm:$0xff] %v598_v44 }
 0x1bf PF: > { %s14_s15 = sadd.s32 1, %s748_s15  }
 0x1c0   : > { %p11_p4 = scmp.ge.s32.totalorder %s14_s15, 4  }
 0x1c2   :  { %13 = sbr.rel (!%p11_p4) target bundleno = 1 (0x1), region = 76 }

// kernel: _lambda_.20
= control target key start
LH: loop header
LB: loop body
LE: loop exit
PB: predicated region body
PF: predicated region fallthrough
CT: control target
= control target key end

     0   :  { %s721_s18 = smov 0   ;;  %s814_s0 = inlined_call_operand.vmem [shape: f32[2,8,290], index: 0, kind: input, shape index: {}]   ;;  %s815_s1 = inlined_call_operand.vmem [shape: f32[8,72], index: 1, kind: input, shape index: {}]   ;;  %s816_s2 = inlined_call_operand.vmem [shape: f32[8,1], index: 2, kind: input, shape index: {}]   ;;  %s817_s3 = inlined_call_operand.vmem [shape: f32[8,1], index: 3, kind: input, shape index: {}]   ;;  %s818_s4 = inlined_call_operand.vmem [shape: f32[2,8,256], index: 4, kind: input, shape index: {}]   ;;  %s819_s5 = inlined_call_operand.vmem [shape: f32[2,8,256], index: 5, kind: output, shape index: {}]  }
   0x1 LB: > { %s587_s19 = sadd.s32 4294967295, %s679_s18   ;;  %p591_p0 = scmp.ge.s32.totalorder %s679_s18, 1  ;;  %s679_s18 = sphi %s721_s18, %s15_s18  }
   0x2   : > { %p197_p1 = scmp.lt.s32.totalorder %s679_s18, 3 }
   0x4   : > { %p198_p2 = pnand %p591_p0, %p197_p1 }
   0x5   : > { %p230_p3 = scmp.lt.s32.totalorder (!%p198_p2), %s587_s19, 1  ;;  %s681_s24 = smov (!%p198_p2), 94  }
   0x6   : > { %201 = sbr.rel (%p198_p2) target bundleno = 373 (0x175), region = 40  ;;  %s682_s25 = smov (!%p198_p2), 95  }
   0x7   : > { %s683_s26 = smov (!%p198_p2), 96   ;;  %s684_s27 = smov (!%p198_p2), 110  }
   0x8   : > { %s685_s28 = smov (!%p198_p2), 111   ;;  %s686_s29 = smov (!%p198_p2), 112  }
   0x9   : > { %s687_s30 = smov (!%p198_p2), 126   ;;  %s688_s6 = smov (!%p198_p2), 127  }
   0xb   : > { %s829_s19 = smov (!%p230_p3, %s587_s19), 1  ;;  %v248_v5 = vlaneseq  ;;  %vm350_vm0 = vcmask 769024   ;;  %vm385_vm3 = vcmask 777216   ;;  %vm337_vm4 = vcmask 785408   ;;  %v498_v33 = vld [vmem:[%s816_s2] sm:$0xff] }
   0xc   : > { %s631_s20 = smul.u32 24, %s829_s19  ;;  %vm324_vm7 = vcmask 900096   ;;  %vm374_vm8 = vcmask 908288   ;;  %v506_v34 = vld [vmem:[%s817_s3] sm:$0xff]  ;;  %v689_v37 = vmov 0   ;;  %vm311_vm9 = vcmask 916480  }
   0xd   : > { %v249_v6 = vand.u32 127, %v248_v5  ;;  %665 = vset.pattern.permute.xlu0 %v689_v37  ;;  %666 = vset.pattern.permute.xlu1 %v689_v37  ;;  %vm298_vm10 = vcmask 1031168   ;;  %vm363_vm11 = vcmask 1039360   ;;  %v390_v59 = vld [vmem:[%s815_s1] sm:$0xff]  ;;  %vm391_vm12 = vcmask 588800   ;;  %s625_s13 = sshll.u32 %s829_s19, 4 }
   0xe   : > { %s234_s23 = scalar_lea.vmem %s814_s0, %s631_s20  ;;  %v690_v60 = vmov 8.0   ;;  %s239_s16 = scalar_lea.vmem %s818_s4, %s625_s13 }
   0xf   : > { %v247_v0 = vld [vmem:[%s234_s23 + $0x10] sm:$0xff]  ;;  %v735_v1 = vld [vmem:[%s234_s23] sm:$0xff]  ;;  %v738_v2 = vld [vmem:[%s234_s23 + $0x8] sm:$0xff]  ;;  %v250_v8 = vadd.s32 128, %v249_v6  ;;  %v255_v11 = vand.u32 15, %v249_v6  ;;  %667 = vrcp.f32 %v690_v60  ;;  %s244_s20 = scalar_lea.vmem %s819_s5, %s625_s13 }
  0x10   : > { %348 = vrot.lane.b32.xlu1 %v247_v0, %s681_s24  ;;  %344 = vrot.lane.b32.xlu0 %v735_v1, %s681_s24  ;;  %v650_v3 = vpack.i.bf16 %v738_v2, %v735_v1  ;;  %v515_v60 = vld [vmem:[%s239_s16 + $0x8] sm:$0xff] }
  0x11   : > { %383 = vrot.lane.b32.xlu2 %v247_v0, %s682_s25  ;;  %v262_v12 = vand.u32 15, %v250_v8  ;;  %vm751_vm1 = vcmp.ne.s32.totalorder %v255_v11, 15  ;;  %vm763_vm5 = vcmp.ne.s32.totalorder %v255_v11, 0 }
  0x13   : > { %vm755_vm2 = vcmp.ne.s32.totalorder %v262_v12, 15  ;;  %vm767_vm6 = vcmp.ne.s32.totalorder %v262_v12, 0 }
  0x15   : > { %v668_v61 = vpop.eup %667 }
  0x16   : > { %v448_v62 = vmul.f32 8.0, %v668_v61  ;;  %vm452_vm13 = vweird.f32 %v668_v61 }
  0x18   : > { %651 = vrot.lane.b32.xlu1 %v650_v3, %s682_s25  ;;  %346 = vrot.lane.b32.xlu0 %v738_v2, %s681_s24  ;;  %v449_v63 = vsub.f32 1.0, %v448_v62 }
  0x19   : > { %331 = vrot.lane.b32.xlu2 %v735_v1, %s683_s26 }
  0x1a   : > { %v450_v6 = vmul.f32 %v668_v61, %v449_v63 }
  0x20   : > { %335 = vrot.lane.b32.xlu1 %v247_v0, %s683_s26  ;;  %333 = vrot.lane.b32.xlu0 %v738_v2, %s683_s26 }
  0x21   : > { %318 = vrot.lane.b32.xlu2 %v735_v1, %s684_s27 }
  0x28   : > { %322 = vrot.lane.b32.xlu1 %v247_v0, %s684_s27  ;;  %320 = vrot.lane.b32.xlu0 %v738_v2, %s684_s27 }
  0x29   : > { %656 = vrot.lane.b32.xlu2 %v650_v3, %s685_s28 }
  0x30   : > { %305 = vrot.lane.b32.xlu1 %v735_v1, %s686_s29  ;;  %372 = vrot.lane.b32.xlu0 %v247_v0, %s685_s28 }
  0x31   : > { %307 = vrot.lane.b32.xlu2 %v738_v2, %s686_s29 }
  0x38   : > { %292 = vrot.lane.b32.xlu1 %v735_v1, %s687_s30  ;;  %309 = vrot.lane.b32.xlu0 %v247_v0, %s686_s29 }
  0x39   : > { %294 = vrot.lane.b32.xlu2 %v738_v2, %s687_s30 }
  0x40   : > { %661 = vrot.lane.b32.xlu1 %v650_v3, %s688_s6  ;;  %296 = vrot.lane.b32.xlu0 %v247_v0, %s687_s30 }
  0x41   : > { %361 = vrot.lane.b32.xlu2 %v247_v0, %s688_s6 }
  0x48   : > { %501 = vperm.xlu0 %665, %v498_v33   ;;  %509 = vperm.xlu1 %666, %v506_v34  }
  0x6b   : > { %v384_v4 = vpop.permute.xlu2 %383 }
  0x73   : > { %v332_v7 = vpop.permute.xlu2 %331 }
  0x7b   : > { %v319_v15 = vpop.permute.xlu2 %318 }
  0x82   : > { %v349_v9 = vpop.permute.xlu1 %348  ;;  %v345_v10 = vpop.permute.xlu0 %344 }
  0x83   : > { %v657_v30 = vpop.permute.xlu2 %656 }
  0x84   : > { %v659_v31 = vunpack.i.h.bf16 %v657_v30  ;;  %v658_v32 = vunpack.i.l.bf16 %v657_v30 }
  0x86   : > { %v375_v40 = vsel %vm374_vm8, %v658_v32, %v659_v31 }
  0x8a   : > { %v652_v16 = vpop.permute.xlu1 %651  ;;  %v347_v17 = vpop.permute.xlu0 %346 }
  0x8b   : > { %v654_v18 = vunpack.i.h.bf16 %v652_v16  ;;  %v653_v19 = vunpack.i.l.bf16 %v652_v16  ;;  %v351_v20 = vsel %vm350_vm0, %v345_v10, %v347_v17  ;;  %v352_v21 = vsel %vm350_vm0, %v347_v17, %v349_v9  ;;  %v308_v41 = vpop.permute.xlu2 %307 }
  0x8c   : > { %598 = vmatpush.msk.msra.mxu0 %vm751_vm1, %v351_v20  ;;  %611 = vmatpush.msk.msra.mxu1 %vm755_vm2, %v352_v21  ;;  %v451_v10 = vadd.f32 %v668_v61, %v450_v6 }
  0x8d   : > { %v386_v22 = vsel %vm385_vm3, %v653_v19, %v654_v18  ;;  %v387_v23 = vsel %vm385_vm3, %v654_v18, %v384_v4 }
  0x8e   : > { %403 = vmatpush.msra.mxu0 %v386_v22  ;;  %423 = vmatpush.msra.mxu1 %v387_v23  ;;  %v453_v14 = vsel %vm452_vm13, %v668_v61, %v451_v10 }
  0x92   : > { %v336_v26 = vpop.permute.xlu1 %335  ;;  %v334_v27 = vpop.permute.xlu0 %333 }
  0x93   : > { %v338_v28 = vsel %vm337_vm4, %v332_v7, %v334_v27  ;;  %v339_v29 = vsel %vm337_vm4, %v334_v27, %v336_v26  ;;  %v295_v46 = vpop.permute.xlu2 %294 }
  0x94   : > { %600 = vmatpush.msk.msra.mxu0 %vm763_vm5, %v338_v28  ;;  %613 = vmatpush.msk.msra.mxu1 %vm767_vm6, %v339_v29 }
  0x9a   : > { %v323_v35 = vpop.permute.xlu1 %322  ;;  %v321_v36 = vpop.permute.xlu0 %320 }
  0x9b   : > { %v325_v38 = vsel %vm324_vm7, %v319_v15, %v321_v36  ;;  %v326_v39 = vsel %vm324_vm7, %v321_v36, %v323_v35  ;;  %v362_v51 = vpop.permute.xlu2 %361 }
  0x9c   : > { %602 = vmatpush.msk.msra.mxu0 %vm751_vm1, %v325_v38  ;;  %615 = vmatpush.msk.msra.mxu1 %vm755_vm2, %v326_v39 }
  0x9e   : > { %406 = vmatpush.msra.mxu0 %v375_v40 }
  0xa2   : > { %v306_v42 = vpop.permute.xlu1 %305  ;;  %v373_v43 = vpop.permute.xlu0 %372 }
  0xa3   : > { %v312_v44 = vsel %vm311_vm9, %v306_v42, %v308_v41  ;;  %v376_v45 = vsel %vm374_vm8, %v659_v31, %v373_v43 }
  0xa4   : > { %604 = vmatpush.msk.msra.mxu0 %vm763_vm5, %v312_v44  ;;  %426 = vmatpush.msra.mxu1 %v376_v45 }
  0xaa   : > { %v293_v47 = vpop.permute.xlu1 %292  ;;  %v310_v48 = vpop.permute.xlu0 %309 }
  0xab   : > { %v299_v49 = vsel %vm298_vm10, %v293_v47, %v295_v46  ;;  %v313_v50 = vsel %vm311_vm9, %v308_v41, %v310_v48 }
  0xac   : > { %606 = vmatpush.msk.msra.mxu0 %vm751_vm1, %v299_v49  ;;  %617 = vmatpush.msk.msra.mxu1 %vm767_vm6, %v313_v50 }
  0xb2   : > { %v662_v52 = vpop.permute.xlu1 %661  ;;  %v297_v53 = vpop.permute.xlu0 %296 }
  0xb3   : > { %v664_v54 = vunpack.i.h.bf16 %v662_v52  ;;  %v663_v55 = vunpack.i.l.bf16 %v662_v52  ;;  %v300_v56 = vsel %vm298_vm10, %v295_v46, %v297_v53 }
  0xb4   : > { %619 = vmatpush.msk.msra.mxu1 %vm755_vm2, %v300_v56 }
  0xb5   : > { %v364_v57 = vsel %vm363_vm11, %v663_v55, %v664_v54  ;;  %v365_v58 = vsel %vm363_vm11, %v664_v54, %v362_v51 }
  0xb6   : > { %409 = vmatpush.msra.mxu0 %v364_v57  ;;  %429 = vmatpush.msra.mxu1 %v365_v58 }
  0xb8   : > { %608 = vmatpush.msk.msra.mxu0 %vm763_vm5, %v735_v1  ;;  %621 = vmatpush.msk.msra.mxu1 %vm767_vm6, %v738_v2 }
  0xb9   : > { %609 = vmatmul.msk.f32.vlgmr.msra.gmra.mxu0 %vm391_vm12, %v390_v59  ;;  %622 = vmatmul.msk.f32.vlgmr.msra.gmra.mxu1 %vm391_vm12, %v390_v59  ;;  %v514_v59 = vld [vmem:[%s239_s16] sm:$0xff] }
  0xba   : > { %v502_v52 = vpop.permute.xlu0 %501  ;;  %v510_v56 = vpop.permute.xlu1 %509 }
 0x136   : > { %v412_v0 = vpop.f32.mrf.mxu0  ;;  %v432_v3 = vpop.f32.mrf.mxu1 }
 0x137   : > { %v435_v4 = vrot.slane %v412_v0, 4  ;;  %v441_v5 = vrot.slane %v432_v3, 4 }
 0x139   : > { %v436_v7 = vadd.f32 %v435_v4, %v412_v0  ;;  %v442_v8 = vadd.f32 %v441_v5, %v432_v3 }
 0x13b   : > { %v437_v9 = vrot.slane %v436_v7, 2  ;;  %v443_v1 = vrot.slane %v442_v8, 2 }
 0x13d   : > { %v438_v11 = vadd.f32 %v437_v9, %v436_v7  ;;  %v444_v2 = vadd.f32 %v443_v1, %v442_v8 }
 0x13f   : > { %v439_v12 = vrot.slane %v438_v11, 1  ;;  %v445_v13 = vrot.slane %v444_v2, 1 }
 0x141   : > { %v440_v15 = vadd.f32 %v439_v12, %v438_v11  ;;  %v446_v16 = vadd.f32 %v445_v13, %v444_v2 }
 0x143   : > { %v454_v17 = vmul.f32 %v453_v14, %v440_v15  ;;  %v455_v18 = vmul.f32 %v453_v14, %v446_v16 }
 0x145   : > { %v456_v19 = vsub.f32 %v412_v0, %v454_v17  ;;  %v457_v20 = vsub.f32 %v432_v3, %v455_v18 }
 0x147   : > { %v458_v21 = vmul.f32 %v456_v19, %v456_v19  ;;  %v459_v22 = vmul.f32 %v457_v20, %v457_v20 }
 0x149   : > { %v460_v23 = vrot.slane %v458_v21, 4  ;;  %v466_v24 = vrot.slane %v459_v22, 4 }
 0x14b   : > { %v461_v25 = vadd.f32 %v460_v23, %v458_v21  ;;  %v467_v26 = vadd.f32 %v466_v24, %v459_v22 }
 0x14d   : > { %v462_v27 = vrot.slane %v461_v25, 2  ;;  %v468_v28 = vrot.slane %v467_v26, 2 }
 0x14f   : > { %v463_v29 = vadd.f32 %v462_v27, %v461_v25  ;;  %v469_v30 = vadd.f32 %v468_v28, %v467_v26 }
 0x151   : > { %v464_v31 = vrot.slane %v463_v29, 1  ;;  %v470_v32 = vrot.slane %v469_v30, 1 }
 0x153   : > { %v465_v33 = vadd.f32 %v464_v31, %v463_v29  ;;  %v471_v34 = vadd.f32 %v470_v32, %v469_v30 }
 0x155   : > { %v472_v35 = vmul.f32 %v465_v33, %v453_v14  ;;  %v473_v36 = vmul.f32 %v471_v34, %v453_v14 }
 0x157   : > { %v474_v37 = vadd.f32 1e-05, %v472_v35  ;;  %v475_v38 = vadd.f32 1e-05, %v473_v36 }
 0x159   : > { %669 = vrsqrt.f32 %v474_v37  ;;  %vm482_vm0 = vweird.f32 %v474_v37  ;;  %vm492_vm2 = vweird.f32 %v475_v38 }
 0x15a   : > { %671 = vrsqrt.f32 %v475_v38 }
 0x15f   : > { %v670_v39 = vpop.eup %669 }
 0x160   : > { %v672_v40 = vpop.eup %671  ;;  %v477_v41 = vmul.f32 %v670_v39, %v474_v37  ;;  %vm483_vm14 = vweird.f32 %v670_v39 }
 0x161   : > { %v487_v42 = vmul.f32 %v672_v40, %v475_v38  ;;  %vm493_vm15 = vweird.f32 %v672_v40  ;;  %vm484_vm1 = vmor %vm482_vm0, %vm483_vm14 }
 0x162   : > { %v478_v43 = vmul.f32 %v670_v39, %v477_v41  ;;  %vm494_vm3 = vmor %vm492_vm2, %vm493_vm15 }
 0x163   : > { %v488_v44 = vmul.f32 %v672_v40, %v487_v42 }
 0x164   : > { %v479_v45 = vmul.f32 0.5, %v478_v43 }
 0x165   : > { %v489_v46 = vmul.f32 0.5, %v488_v44 }
 0x166   : > { %v480_v47 = vsub.f32 1.5, %v479_v45 }
 0x167   : > { %v490_v48 = vsub.f32 1.5, %v489_v46 }
 0x168   : > { %v481_v49 = vmul.f32 %v670_v39, %v480_v47 }
 0x169   : > { %v491_v50 = vmul.f32 %v672_v40, %v490_v48 }
 0x16a   : > { %v485_v51 = vsel %vm484_vm1, %v670_v39, %v481_v49 }
 0x16b   : > { %v495_v53 = vsel %vm494_vm3, %v672_v40, %v491_v50  ;;  %v496_v54 = vmul.f32 %v485_v51, %v456_v19 }
 0x16c   : > { %v497_v55 = vmul.f32 %v495_v53, %v457_v20 }
 0x16d   : > { %v504_v57 = vmul.f32 %v502_v52, %v496_v54 }
 0x16e   : > { %v505_v58 = vmul.f32 %v502_v52, %v497_v55 }
 0x16f   : > { %v512_v61 = vadd.f32 %v510_v56, %v504_v57 }
 0x170   : > { %v513_v62 = vadd.f32 %v510_v56, %v505_v58 }
 0x171   : > { %v516_v63 = vadd.f32 %v514_v59, %v512_v61 }
 0x172   : > { %v517_v0 = vadd.f32 %v515_v60, %v513_v62 }
 0x173   : > { %518 = vst [vmem:[%s244_s20] sm:$0xff] %v516_v63 }
 0x174   : > { %519 = vst [vmem:[%s244_s20 + $0x8] sm:$0xff] %v517_v0 }
 0x175 PF: > { %s15_s18 = sadd.s32 1, %s679_s18  }
 0x176   : > { %p12_p4 = scmp.ge.s32.totalorder %s15_s18, 4  }
 0x178   :  { %14 = sbr.rel (!%p12_p4) target bundleno = 1 (0x1), region = 73 }

// kernel: _lambda_.19
= control target key start
LH: loop header
LB: loop body
LE: loop exit
PB: predicated region body
PF: predicated region fallthrough
CT: control target
= control target key end

     0   :  { %s712_s15 = smov 0   ;;  %s802_s0 = inlined_call_operand.vmem [shape: f32[2,8,290], index: 0, kind: input, shape index: {}]   ;;  %s803_s1 = inlined_call_operand.vmem [shape: f32[8,72], index: 1, kind: input, shape index: {}]   ;;  %s804_s2 = inlined_call_operand.vmem [shape: f32[8,1], index: 2, kind: input, shape index: {}]   ;;  %s805_s3 = inlined_call_operand.vmem [shape: f32[8,1], index: 3, kind: input, shape index: {}]   ;;  %s806_s4 = inlined_call_operand.vmem [shape: f32[2,8,256], index: 4, kind: output, shape index: {}]  }
   0x1 LB: > { %s576_s16 = sadd.s32 4294967295, %s674_s15   ;;  %p580_p0 = scmp.ge.s32.totalorder %s674_s15, 1  ;;  %s674_s15 = sphi %s712_s15, %s14_s15  }
   0x2   : > { %p162_p1 = scmp.lt.s32.totalorder %s674_s15, 3 }
   0x4   : > { %p163_p2 = pnand %p580_p0, %p162_p1 }
   0x5   : > { %p188_p3 = scmp.lt.s32.totalorder (!%p163_p2), %s576_s16, 1  ;;  %s676_s21 = smov (!%p163_p2), 94  }
   0x6   : > { %166 = sbr.rel (%p163_p2) target bundleno = 414 (0x19e), region = 36  ;;  %s677_s22 = smov (!%p163_p2), 95  }
   0x7   : > { %s678_s23 = smov (!%p163_p2), 96   ;;  %s679_s24 = smov (!%p163_p2), 110  }
   0x8   : > { %s680_s25 = smov (!%p163_p2), 111   ;;  %s681_s26 = smov (!%p163_p2), 112  }
   0x9   : > { %s682_s27 = smov (!%p163_p2), 126   ;;  %s683_s28 = smov (!%p163_p2), 127  }
   0xb   : > { %s816_s16 = smov (!%p188_p3, %s576_s16), 1  ;;  %v201_v5 = vlaneseq  ;;  %vm303_vm0 = vcmask 769024   ;;  %vm338_vm3 = vcmask 777216   ;;  %vm290_vm4 = vcmask 785408   ;;  %v451_v33 = vld [vmem:[%s804_s2] sm:$0xff] }
   0xc   : > { %s617_s17 = smul.u32 24, %s816_s16  ;;  %vm277_vm7 = vcmask 900096   ;;  %vm327_vm8 = vcmask 908288   ;;  %v459_v34 = vld [vmem:[%s805_s3] sm:$0xff]  ;;  %v684_v37 = vmov 0   ;;  %vm264_vm9 = vcmask 916480  }
   0xd   : > { %v202_v6 = vand.u32 127, %v201_v5  ;;  %652 = vset.pattern.permute.xlu0 %v684_v37  ;;  %653 = vset.pattern.permute.xlu1 %v684_v37  ;;  %vm251_vm10 = vcmask 1031168   ;;  %vm316_vm11 = vcmask 1039360   ;;  %v343_v59 = vld [vmem:[%s803_s1] sm:$0xff]  ;;  %vm344_vm12 = vcmask 588800   ;;  %s612_s9 = sshll.u32 %s816_s16, 4 }
   0xe   : > { %s192_s20 = scalar_lea.vmem %s802_s0, %s617_s17  ;;  %v685_v60 = vmov 8.0   ;;  %s197_s12 = scalar_lea.vmem %s806_s4, %s612_s9 }
   0xf   : > { %v200_v0 = vld [vmem:[%s192_s20 + $0x10] sm:$0xff]  ;;  %v726_v1 = vld [vmem:[%s192_s20] sm:$0xff]  ;;  %v729_v2 = vld [vmem:[%s192_s20 + $0x8] sm:$0xff]  ;;  %v203_v8 = vadd.s32 128, %v202_v6  ;;  %v208_v11 = vand.u32 15, %v202_v6  ;;  %654 = vrcp.f32 %v685_v60 }
  0x10   : > { %301 = vrot.lane.b32.xlu1 %v200_v0, %s676_s21  ;;  %297 = vrot.lane.b32.xlu0 %v726_v1, %s676_s21  ;;  %v637_v3 = vpack.i.bf16 %v729_v2, %v726_v1 }
  0x11   : > { %336 = vrot.lane.b32.xlu2 %v200_v0, %s677_s22  ;;  %v215_v12 = vand.u32 15, %v203_v8  ;;  %vm742_vm1 = vcmp.ne.s32.totalorder %v208_v11, 15  ;;  %vm754_vm5 = vcmp.ne.s32.totalorder %v208_v11, 0 }
  0x13   : > { %vm746_vm2 = vcmp.ne.s32.totalorder %v215_v12, 15  ;;  %vm758_vm6 = vcmp.ne.s32.totalorder %v215_v12, 0 }
  0x15   : > { %v655_v61 = vpop.eup %654 }
  0x16   : > { %v401_v62 = vmul.f32 8.0, %v655_v61  ;;  %vm405_vm13 = vweird.f32 %v655_v61 }
  0x18   : > { %638 = vrot.lane.b32.xlu1 %v637_v3, %s677_s22  ;;  %299 = vrot.lane.b32.xlu0 %v729_v2, %s676_s21  ;;  %v402_v63 = vsub.f32 1.0, %v401_v62 }
  0x19   : > { %284 = vrot.lane.b32.xlu2 %v726_v1, %s678_s23 }
  0x1a   : > { %v403_v6 = vmul.f32 %v655_v61, %v402_v63 }
  0x20   : > { %288 = vrot.lane.b32.xlu1 %v200_v0, %s678_s23  ;;  %286 = vrot.lane.b32.xlu0 %v729_v2, %s678_s23 }
  0x21   : > { %271 = vrot.lane.b32.xlu2 %v726_v1, %s679_s24 }
  0x28   : > { %275 = vrot.lane.b32.xlu1 %v200_v0, %s679_s24  ;;  %273 = vrot.lane.b32.xlu0 %v729_v2, %s679_s24 }
  0x29   : > { %643 = vrot.lane.b32.xlu2 %v637_v3, %s680_s25 }
  0x30   : > { %258 = vrot.lane.b32.xlu1 %v726_v1, %s681_s26  ;;  %325 = vrot.lane.b32.xlu0 %v200_v0, %s680_s25 }
  0x31   : > { %260 = vrot.lane.b32.xlu2 %v729_v2, %s681_s26 }
  0x38   : > { %245 = vrot.lane.b32.xlu1 %v726_v1, %s682_s27  ;;  %262 = vrot.lane.b32.xlu0 %v200_v0, %s681_s26 }
  0x39   : > { %247 = vrot.lane.b32.xlu2 %v729_v2, %s682_s27 }
  0x40   : > { %648 = vrot.lane.b32.xlu1 %v637_v3, %s683_s28  ;;  %249 = vrot.lane.b32.xlu0 %v200_v0, %s682_s27 }
  0x41   : > { %314 = vrot.lane.b32.xlu2 %v200_v0, %s683_s28 }
  0x48   : > { %454 = vperm.xlu0 %652, %v451_v33   ;;  %462 = vperm.xlu1 %653, %v459_v34  }
  0x6b   : > { %v337_v4 = vpop.permute.xlu2 %336 }
  0x73   : > { %v285_v7 = vpop.permute.xlu2 %284 }
  0x7b   : > { %v272_v15 = vpop.permute.xlu2 %271 }
  0x82   : > { %v302_v9 = vpop.permute.xlu1 %301  ;;  %v298_v10 = vpop.permute.xlu0 %297 }
  0x83   : > { %v644_v30 = vpop.permute.xlu2 %643 }
  0x84   : > { %v646_v31 = vunpack.i.h.bf16 %v644_v30  ;;  %v645_v32 = vunpack.i.l.bf16 %v644_v30 }
  0x86   : > { %v328_v40 = vsel %vm327_vm8, %v645_v32, %v646_v31 }
  0x8a   : > { %v639_v16 = vpop.permute.xlu1 %638  ;;  %v300_v17 = vpop.permute.xlu0 %299 }
  0x8b   : > { %v641_v18 = vunpack.i.h.bf16 %v639_v16  ;;  %v640_v19 = vunpack.i.l.bf16 %v639_v16  ;;  %v304_v20 = vsel %vm303_vm0, %v298_v10, %v300_v17  ;;  %v305_v21 = vsel %vm303_vm0, %v300_v17, %v302_v9  ;;  %v261_v41 = vpop.permute.xlu2 %260 }
  0x8c   : > { %585 = vmatpush.msk.msra.mxu0 %vm742_vm1, %v304_v20  ;;  %598 = vmatpush.msk.msra.mxu1 %vm746_vm2, %v305_v21  ;;  %v404_v10 = vadd.f32 %v655_v61, %v403_v6 }
  0x8d   : > { %v339_v22 = vsel %vm338_vm3, %v640_v19, %v641_v18  ;;  %v340_v23 = vsel %vm338_vm3, %v641_v18, %v337_v4 }
  0x8e   : > { %356 = vmatpush.msra.mxu0 %v339_v22  ;;  %376 = vmatpush.msra.mxu1 %v340_v23  ;;  %v406_v14 = vsel %vm405_vm13, %v655_v61, %v404_v10 }
  0x92   : > { %v289_v26 = vpop.permute.xlu1 %288  ;;  %v287_v27 = vpop.permute.xlu0 %286 }
  0x93   : > { %v291_v28 = vsel %vm290_vm4, %v285_v7, %v287_v27  ;;  %v292_v29 = vsel %vm290_vm4, %v287_v27, %v289_v26  ;;  %v248_v46 = vpop.permute.xlu2 %247 }
  0x94   : > { %587 = vmatpush.msk.msra.mxu0 %vm754_vm5, %v291_v28  ;;  %600 = vmatpush.msk.msra.mxu1 %vm758_vm6, %v292_v29 }
  0x9a   : > { %v276_v35 = vpop.permute.xlu1 %275  ;;  %v274_v36 = vpop.permute.xlu0 %273 }
  0x9b   : > { %v278_v38 = vsel %vm277_vm7, %v272_v15, %v274_v36  ;;  %v279_v39 = vsel %vm277_vm7, %v274_v36, %v276_v35  ;;  %v315_v51 = vpop.permute.xlu2 %314 }
  0x9c   : > { %589 = vmatpush.msk.msra.mxu0 %vm742_vm1, %v278_v38  ;;  %602 = vmatpush.msk.msra.mxu1 %vm746_vm2, %v279_v39 }
  0x9e   : > { %359 = vmatpush.msra.mxu0 %v328_v40 }
  0xa2   : > { %v259_v42 = vpop.permute.xlu1 %258  ;;  %v326_v43 = vpop.permute.xlu0 %325 }
  0xa3   : > { %v265_v44 = vsel %vm264_vm9, %v259_v42, %v261_v41  ;;  %v329_v45 = vsel %vm327_vm8, %v646_v31, %v326_v43 }
  0xa4   : > { %591 = vmatpush.msk.msra.mxu0 %vm754_vm5, %v265_v44  ;;  %379 = vmatpush.msra.mxu1 %v329_v45 }
  0xaa   : > { %v246_v47 = vpop.permute.xlu1 %245  ;;  %v263_v48 = vpop.permute.xlu0 %262 }
  0xab   : > { %v252_v49 = vsel %vm251_vm10, %v246_v47, %v248_v46  ;;  %v266_v50 = vsel %vm264_vm9, %v261_v41, %v263_v48 }
  0xac   : > { %593 = vmatpush.msk.msra.mxu0 %vm742_vm1, %v252_v49  ;;  %604 = vmatpush.msk.msra.mxu1 %vm758_vm6, %v266_v50 }
  0xb2   : > { %v649_v52 = vpop.permute.xlu1 %648  ;;  %v250_v53 = vpop.permute.xlu0 %249 }
  0xb3   : > { %v651_v54 = vunpack.i.h.bf16 %v649_v52  ;;  %v650_v55 = vunpack.i.l.bf16 %v649_v52  ;;  %v253_v56 = vsel %vm251_vm10, %v248_v46, %v250_v53 }
  0xb4   : > { %606 = vmatpush.msk.msra.mxu1 %vm746_vm2, %v253_v56 }
  0xb5   : > { %v317_v57 = vsel %vm316_vm11, %v650_v55, %v651_v54  ;;  %v318_v58 = vsel %vm316_vm11, %v651_v54, %v315_v51 }
  0xb6   : > { %362 = vmatpush.msra.mxu0 %v317_v57  ;;  %382 = vmatpush.msra.mxu1 %v318_v58 }
  0xb8   : > { %595 = vmatpush.msk.msra.mxu0 %vm754_vm5, %v726_v1  ;;  %608 = vmatpush.msk.msra.mxu1 %vm758_vm6, %v729_v2 }
  0xb9   : > { %596 = vmatmul.msk.f32.vlgmr.msra.gmra.mxu0 %vm344_vm12, %v343_v59  ;;  %609 = vmatmul.msk.f32.vlgmr.msra.gmra.mxu1 %vm344_vm12, %v343_v59 }
  0xba   : > { %v455_v52 = vpop.permute.xlu0 %454  ;;  %v463_v56 = vpop.permute.xlu1 %462 }
 0x136   : > { %v365_v0 = vpop.f32.mrf.mxu0  ;;  %v385_v3 = vpop.f32.mrf.mxu1 }
 0x137   : > { %v388_v4 = vrot.slane %v365_v0, 4  ;;  %v394_v5 = vrot.slane %v385_v3, 4 }
 0x139   : > { %v389_v7 = vadd.f32 %v388_v4, %v365_v0  ;;  %v395_v8 = vadd.f32 %v394_v5, %v385_v3 }
 0x13b   : > { %v390_v9 = vrot.slane %v389_v7, 2  ;;  %v396_v1 = vrot.slane %v395_v8, 2 }
 0x13d   : > { %v391_v11 = vadd.f32 %v390_v9, %v389_v7  ;;  %v397_v2 = vadd.f32 %v396_v1, %v395_v8 }
 0x13f   : > { %v392_v12 = vrot.slane %v391_v11, 1  ;;  %v398_v13 = vrot.slane %v397_v2, 1 }
 0x141   : > { %v393_v15 = vadd.f32 %v392_v12, %v391_v11  ;;  %v399_v16 = vadd.f32 %v398_v13, %v397_v2 }
 0x143   : > { %v407_v17 = vmul.f32 %v406_v14, %v393_v15  ;;  %v408_v18 = vmul.f32 %v406_v14, %v399_v16 }
 0x145   : > { %v409_v19 = vsub.f32 %v365_v0, %v407_v17  ;;  %v410_v20 = vsub.f32 %v385_v3, %v408_v18 }
 0x147   : > { %v411_v21 = vmul.f32 %v409_v19, %v409_v19  ;;  %v412_v22 = vmul.f32 %v410_v20, %v410_v20 }
 0x149   : > { %v413_v23 = vrot.slane %v411_v21, 4  ;;  %v419_v24 = vrot.slane %v412_v22, 4 }
 0x14b   : > { %v414_v25 = vadd.f32 %v413_v23, %v411_v21  ;;  %v420_v26 = vadd.f32 %v419_v24, %v412_v22 }
 0x14d   : > { %v415_v27 = vrot.slane %v414_v25, 2  ;;  %v421_v28 = vrot.slane %v420_v26, 2 }
 0x14f   : > { %v416_v29 = vadd.f32 %v415_v27, %v414_v25  ;;  %v422_v30 = vadd.f32 %v421_v28, %v420_v26 }
 0x151   : > { %v417_v31 = vrot.slane %v416_v29, 1  ;;  %v423_v32 = vrot.slane %v422_v30, 1 }
 0x153   : > { %v418_v33 = vadd.f32 %v417_v31, %v416_v29  ;;  %v424_v34 = vadd.f32 %v423_v32, %v422_v30 }
 0x155   : > { %v425_v35 = vmul.f32 %v418_v33, %v406_v14  ;;  %v426_v36 = vmul.f32 %v424_v34, %v406_v14 }
 0x157   : > { %v427_v37 = vadd.f32 1e-05, %v425_v35  ;;  %v428_v38 = vadd.f32 1e-05, %v426_v36  ;;  %v686_v36 = vmov 1.0  }
 0x159   : > { %656 = vrsqrt.f32 %v427_v37  ;;  %vm435_vm0 = vweird.f32 %v427_v37  ;;  %vm445_vm2 = vweird.f32 %v428_v38 }
 0x15a   : > { %658 = vrsqrt.f32 %v428_v38 }
 0x15f   : > { %v657_v39 = vpop.eup %656 }
 0x160   : > { %v659_v40 = vpop.eup %658  ;;  %v430_v41 = vmul.f32 %v657_v39, %v427_v37  ;;  %vm436_vm14 = vweird.f32 %v657_v39 }
 0x161   : > { %v440_v42 = vmul.f32 %v659_v40, %v428_v38  ;;  %vm446_vm15 = vweird.f32 %v659_v40  ;;  %vm437_vm1 = vmor %vm435_vm0, %vm436_vm14 }
 0x162   : > { %v431_v43 = vmul.f32 %v657_v39, %v430_v41  ;;  %vm447_vm3 = vmor %vm445_vm2, %vm446_vm15 }
 0x163   : > { %v441_v44 = vmul.f32 %v659_v40, %v440_v42 }
 0x164   : > { %v432_v45 = vmul.f32 0.5, %v431_v43 }
 0x165   : > { %v442_v46 = vmul.f32 0.5, %v441_v44 }
 0x166   : > { %v433_v47 = vsub.f32 1.5, %v432_v45 }
 0x167   : > { %v443_v48 = vsub.f32 1.5, %v442_v46 }
 0x168   : > { %v434_v49 = vmul.f32 %v657_v39, %v433_v47 }
 0x169   : > { %v444_v50 = vmul.f32 %v659_v40, %v443_v48 }
 0x16a   : > { %v438_v51 = vsel %vm437_vm1, %v657_v39, %v434_v49 }
 0x16b   : > { %v448_v53 = vsel %vm447_vm3, %v659_v40, %v444_v50  ;;  %v449_v54 = vmul.f32 %v438_v51, %v409_v19 }
 0x16c   : > { %v450_v55 = vmul.f32 %v448_v53, %v410_v20 }
 0x16d   : > { %v457_v57 = vmul.f32 %v455_v52, %v449_v54 }
 0x16e   : > { %v458_v58 = vmul.f32 %v455_v52, %v450_v55 }
 0x16f   : > { %v465_v59 = vadd.f32 %v463_v56, %v457_v57 }
 0x170   : > { %v466_v60 = vadd.f32 %v463_v56, %v458_v58 }
 0x171   : > { %v469_v61 = vmul.f32 0.70710677, %v465_v59  ;;  %v467_v42 = vmul.f32 0.5, %v465_v59 }
 0x172   : > { %v470_v62 = vmul.f32 0.70710677, %v466_v60  ;;  %v468_v44 = vmul.f32 0.5, %v466_v60 }
 0x173   : > { %v475_v63 = vand.u32 2147483647, %v469_v61  ;;  %vm471_vm4 = vcmp.lt.f32.partialorder %v469_v61, 0.0 }
 0x174   : > { %v476_v0 = vand.u32 2147483647, %v470_v62  ;;  %vm472_vm5 = vcmp.lt.f32.partialorder %v470_v62, 0.0  ;;  %v473_v37 = vsel %vm471_vm4, -1.0, %v686_v36 }
 0x175   : > { %v477_v3 = vmul.f32 0.3275911, %v475_v63  ;;  %v501_v8 = vsub.f32 0.0, %v475_v63  ;;  %v474_v39 = vsel %vm472_vm5, -1.0, %v686_v36 }
 0x176   : > { %v478_v4 = vmul.f32 0.3275911, %v476_v0  ;;  %v502_v10 = vsub.f32 0.0, %v476_v0 }
 0x177   : > { %v479_v5 = vadd.f32 1.0, %v477_v3  ;;  %v503_v13 = vmul.f32 %v501_v8, %v475_v63 }
 0x178   : > { %v480_v6 = vadd.f32 1.0, %v478_v4  ;;  %v504_v15 = vmul.f32 %v502_v10, %v476_v0 }
 0x179   : > { %660 = vrcp.f32 %v479_v5  ;;  %v505_v19 = vmul.f32 1.442695, %v503_v13 }
 0x17a   : > { %662 = vrcp.f32 %v480_v6  ;;  %v507_v21 = vmul.f32 1.442695, %v504_v15 }
 0x17b   : > { %664 = vpow2.f32 %v505_v19 }
 0x17c   : > { %666 = vpow2.f32 %v507_v21 }
 0x17f   : > { %v661_v7 = vpop.eup %660 }
 0x180   : > { %v663_v9 = vpop.eup %662  ;;  %v483_v1 = vmul.f32 1.0614054, %v661_v7 }
 0x181   : > { %v484_v11 = vmul.f32 1.0614054, %v663_v9  ;;  %v665_v30 = vpop.eup %664 }
 0x182   : > { %v485_v2 = vadd.f32 -1.4531521, %v483_v1  ;;  %v667_v32 = vpop.eup %666 }
 0x183   : > { %v486_v12 = vadd.f32 -1.4531521, %v484_v11 }
 0x184   : > { %v487_v14 = vmul.f32 %v661_v7, %v485_v2 }
 0x185   : > { %v488_v16 = vmul.f32 %v663_v9, %v486_v12 }
 0x186   : > { %v489_v17 = vadd.f32 1.4214138, %v487_v14 }
 0x187   : > { %v490_v18 = vadd.f32 1.4214138, %v488_v16 }
 0x188   : > { %v491_v20 = vmul.f32 %v661_v7, %v489_v17 }
 0x189   : > { %v492_v22 = vmul.f32 %v663_v9, %v490_v18 }
 0x18a   : > { %v493_v23 = vadd.f32 -0.28449672, %v491_v20 }
 0x18b   : > { %v494_v24 = vadd.f32 -0.28449672, %v492_v22 }
 0x18c   : > { %v495_v25 = vmul.f32 %v661_v7, %v493_v23 }
 0x18d   : > { %v496_v26 = vmul.f32 %v663_v9, %v494_v24 }
 0x18e   : > { %v497_v27 = vadd.f32 0.2548296, %v495_v25 }
 0x18f   : > { %v498_v28 = vadd.f32 0.2548296, %v496_v26 }
 0x190   : > { %v499_v29 = vmul.f32 %v661_v7, %v497_v27 }
 0x191   : > { %v500_v31 = vmul.f32 %v663_v9, %v498_v28 }
 0x192   : > { %v509_v33 = vmul.f32 %v665_v30, %v499_v29 }
 0x193   : > { %v510_v34 = vmul.f32 %v667_v32, %v500_v31 }
 0x194   : > { %v511_v35 = vsub.f32 1.0, %v509_v33 }
 0x195   : > { %v512_v38 = vsub.f32 1.0, %v510_v34 }
 0x196   : > { %v513_v40 = vmul.f32 %v511_v35, %v473_v37 }
 0x197   : > { %v514_v41 = vmul.f32 %v512_v38, %v474_v39 }
 0x198   : > { %v515_v43 = vadd.f32 1.0, %v513_v40 }
 0x199   : > { %v516_v45 = vadd.f32 1.0, %v514_v41 }
 0x19a   : > { %v517_v46 = vmul.f32 %v515_v43, %v467_v42 }
 0x19b   : > { %v518_v47 = vmul.f32 %v516_v45, %v468_v44 }
 0x19c   : > { %519 = vst [vmem:[%s197_s12] sm:$0xff] %v517_v46 }
 0x19d   : > { %520 = vst [vmem:[%s197_s12 + $0x8] sm:$0xff] %v518_v47 }
 0x19e PF: > { %s14_s15 = sadd.s32 1, %s674_s15  }
 0x19f   : > { %p11_p4 = scmp.ge.s32.totalorder %s14_s15, 4  }
 0x1a1   :  { %13 = sbr.rel (!%p11_p4) target bundleno = 1 (0x1), region = 66 }

// kernel: _lambda_.29
= control target key start
LH: loop header
LB: loop body
LE: loop exit
PB: predicated region body
PF: predicated region fallthrough
CT: control target
= control target key end

     0   :  { %s499_s15 = smov 0   ;;  %s545_s0 = inlined_call_operand.vmem [shape: f32[2,8,82], index: 0, kind: input, shape index: {}]   ;;  %s546_s1 = inlined_call_operand.vmem [shape: f32[8,72], index: 1, kind: input, shape index: {}]   ;;  %s547_s2 = inlined_call_operand.vmem [shape: f32[8,1], index: 2, kind: input, shape index: {}]   ;;  %s548_s3 = inlined_call_operand.vmem [shape: f32[8,1], index: 3, kind: input, shape index: {}]   ;;  %s549_s4 = inlined_call_operand.vmem [shape: f32[2,8,64], index: 4, kind: output, shape index: {}]  }
   0x1 LB: > { %s402_s16 = sadd.s32 4294967295, %s461_s15   ;;  %p406_p0 = scmp.ge.s32.totalorder %s461_s15, 1  ;;  %s461_s15 = sphi %s499_s15, %s14_s15  }
   0x2   : > { %p161_p1 = scmp.lt.s32.totalorder %s461_s15, 3 }
   0x4   : > { %p162_p2 = pnand %p406_p0, %p161_p1 }
   0x5   : > { %p185_p3 = scmp.lt.s32.totalorder (!%p162_p2), %s402_s16, 1  ;;  %s463_s21 = smov (!%p162_p2), 110  }
   0x6   : > { %165 = sbr.rel (%p162_p2) target bundleno = 383 (0x17f), region = 36  ;;  %s464_s22 = smov (!%p162_p2), 112  }
   0x7   : > { %s465_s23 = smov (!%p162_p2), 119   ;;  %s466_s24 = smov (!%p162_p2), 111  }
   0x8   : > { %s467_s25 = smov (!%p162_p2), 118   ;;  %s468_s26 = smov (!%p162_p2), 120  }
   0x9   : > { %s469_s27 = smov (!%p162_p2), 126   ;;  %s470_s28 = smov (!%p162_p2), 127  }
   0xb   : > { %s553_s16 = smov (!%p185_p3, %s402_s16), 1  ;;  %v194_v1 = vlaneseq  ;;  %v315_v3 = vld [vmem:[%s548_s3] sm:$0xff]  ;;  %v471_v5 = vmov 0   ;;  %vm246_vm2 = vcmask 588800   ;;  %v472_v17 = vmov 8.0  }
   0xc   : > { %s407_s17 = sshll.u32 %s553_s16, 3  ;;  %v308_v4 = vld [vmem:[%s547_s2] sm:$0xff]  ;;  %446 = vset.pattern.permute.xlu0 %v471_v5  ;;  %445 = vset.pattern.permute.xlu2 %v471_v5  ;;  %447 = vrcp.f32 %v472_v17  ;;  %vm270_vm3 = vcmask 523264  }
   0xd   : > { %s188_s20 = scalar_lea.vmem %s545_s0, %s407_s17  ;;  %v195_v2 = vand.u32 127, %v194_v1  ;;  %v245_v16 = vld [vmem:[%s546_s1] sm:$0xff]  ;;  %s192_s11 = scalar_lea.vmem %s549_s4, %s407_s17 }
   0xe   : > { %v193_v0 = vld [vmem:[%s188_s20] sm:$0xff] }
   0xf   : > { %232 = vrot.lane.b32.xlu0 %v193_v0, %s463_s21  ;;  %228 = vrot.lane.b32.xlu1 %v193_v0, %s464_s22  ;;  %v200_v6 = vand.u32 7, %v195_v2 }
  0x10   : > { %239 = vrot.lane.b32.xlu2 %v193_v0, %s465_s23 }
  0x11   : > { %vm521_vm0 = vcmp.ne.s32.totalorder %v200_v6, 7  ;;  %vm425_vm1 = vcmp.ne.s32.totalorder %v200_v6, 0 }
  0x12   : > { %v448_v18 = vpop.eup %447 }
  0x13   : > { %v279_v19 = vmul.f32 8.0, %v448_v18  ;;  %vm283_vm4 = vweird.f32 %v448_v18 }
  0x15   : > { %v280_v20 = vsub.f32 1.0, %v279_v19 }
  0x17   : > { %242 = vrot.lane.b32.xlu0 %v193_v0, %s466_s24  ;;  %224 = vrot.lane.b32.xlu1 %v193_v0, %s467_s25  ;;  %v281_v24 = vmul.f32 %v448_v18, %v280_v20 }
  0x18   : > { %220 = vrot.lane.b32.xlu2 %v193_v0, %s468_s26 }
  0x19   : > { %v282_v27 = vadd.f32 %v448_v18, %v281_v24 }
  0x1b   : > { %v284_v30 = vsel %vm283_vm4, %v448_v18, %v282_v27 }
  0x1f   : > { %216 = vrot.lane.b32.xlu0 %v193_v0, %s469_s27  ;;  %236 = vrot.lane.b32.xlu1 %v193_v0, %s470_s28 }
  0x20   : > { %311 = vperm.xlu2 %445, %v308_v4  }
  0x27   : > { %318 = vperm.xlu0 %446, %v315_v3  }
  0x6a   : > { %v240_v10 = vpop.permute.xlu2 %239 }
  0x72   : > { %v221_v13 = vpop.permute.xlu2 %220 }
  0x7a   : > { %v312_v50 = vpop.permute.xlu2 %311 }
  0x81   : > { %v233_v8 = vpop.permute.xlu0 %232  ;;  %v229_v9 = vpop.permute.xlu1 %228 }
  0x82   : > { %410 = vmatpush.msk.msra.mxu0 %vm521_vm0, %v233_v8 }
  0x89   : > { %v243_v11 = vpop.permute.xlu0 %242  ;;  %v225_v12 = vpop.permute.xlu1 %224 }
  0x8a   : > { %258 = vmatpush.msra.mxu0 %v243_v11 }
  0x8c   : > { %412 = vmatpush.msk.msra.mxu0 %vm425_vm1, %v229_v9 }
  0x8e   : > { %414 = vmatpush.msk.msra.mxu0 %vm521_vm0, %v225_v12  ;;  %v473_v12 = vmov 1.0  }
  0x90   : > { %261 = vmatpush.msra.mxu0 %v240_v10 }
  0x91   : > { %v217_v14 = vpop.permute.xlu0 %216  ;;  %v237_v15 = vpop.permute.xlu1 %236 }
  0x92   : > { %416 = vmatpush.msk.msra.mxu0 %vm425_vm1, %v221_v13 }
  0x94   : > { %418 = vmatpush.msk.msra.mxu0 %vm521_vm0, %v217_v14 }
  0x96   : > { %264 = vmatpush.msra.mxu0 %v237_v15 }
  0x98   : > { %420 = vmatpush.msk.msra.mxu0 %vm425_vm1, %v193_v0 }
  0x99   : > { %421 = vmatmul.msk.f32.vlgmr.msra.gmra.mxu0 %vm246_vm2, %v245_v16  ;;  %v319_v53 = vpop.permute.xlu0 %318 }
 0x116   : > { %v267_v21 = vpop.f32.mrf.mxu0 }
 0x117   : > { %v271_v22 = vsel %vm270_vm3, %v267_v21, 0.0 }
 0x118   : > { %v272_v23 = vrot.slane %v271_v22, 4 }
 0x11a   : > { %v273_v25 = vadd.f32 %v272_v23, %v271_v22 }
 0x11c   : > { %v274_v26 = vrot.slane %v273_v25, 2 }
 0x11e   : > { %v275_v28 = vadd.f32 %v274_v26, %v273_v25 }
 0x120   : > { %v276_v29 = vrot.slane %v275_v28, 1 }
 0x122   : > { %v277_v31 = vadd.f32 %v276_v29, %v275_v28 }
 0x124   : > { %v285_v32 = vmul.f32 %v284_v30, %v277_v31 }
 0x126   : > { %v286_v33 = vsub.f32 %v267_v21, %v285_v32 }
 0x128   : > { %v287_v34 = vmul.f32 %v286_v33, %v286_v33 }
 0x12a   : > { %v288_v35 = vsel %vm270_vm3, %v287_v34, 0.0 }
 0x12b   : > { %v289_v36 = vrot.slane %v288_v35, 4 }
 0x12d   : > { %v290_v37 = vadd.f32 %v289_v36, %v288_v35 }
 0x12f   : > { %v291_v38 = vrot.slane %v290_v37, 2 }
 0x131   : > { %v292_v39 = vadd.f32 %v291_v38, %v290_v37 }
 0x133   : > { %v293_v40 = vrot.slane %v292_v39, 1 }
 0x135   : > { %v294_v41 = vadd.f32 %v293_v40, %v292_v39 }
 0x137   : > { %v295_v42 = vmul.f32 %v294_v41, %v284_v30 }
 0x139   : > { %v296_v43 = vadd.f32 1e-05, %v295_v42 }
 0x13b   : > { %449 = vrsqrt.f32 %v296_v43  ;;  %vm303_vm6 = vweird.f32 %v296_v43 }
 0x141   : > { %v450_v44 = vpop.eup %449 }
 0x142   : > { %v298_v45 = vmul.f32 %v450_v44, %v296_v43  ;;  %vm304_vm5 = vweird.f32 %v450_v44 }
 0x143   : > { %vm305_vm7 = vmor %vm303_vm6, %vm304_vm5 }
 0x144   : > { %v299_v46 = vmul.f32 %v450_v44, %v298_v45 }
 0x146   : > { %v300_v47 = vmul.f32 0.5, %v299_v46 }
 0x148   : > { %v301_v48 = vsub.f32 1.5, %v300_v47 }
 0x14a   : > { %v302_v49 = vmul.f32 %v450_v44, %v301_v48 }
 0x14c   : > { %v306_v51 = vsel %vm305_vm7, %v450_v44, %v302_v49 }
 0x14d   : > { %v307_v52 = vmul.f32 %v306_v51, %v286_v33 }
 0x14f   : > { %v314_v54 = vmul.f32 %v312_v50, %v307_v52 }
 0x151   : > { %v321_v55 = vadd.f32 %v319_v53, %v314_v54 }
 0x153   : > { %v323_v56 = vmul.f32 0.70710677, %v321_v55  ;;  %v322_v15 = vmul.f32 0.5, %v321_v55 }
 0x155   : > { %v326_v57 = vand.u32 2147483647, %v323_v56  ;;  %vm324_vm8 = vcmp.lt.f32.partialorder %v323_v56, 0.0 }
 0x156   : > { %v325_v13 = vsel %vm324_vm8, -1.0, %v473_v12 }
 0x157   : > { %v327_v58 = vmul.f32 0.3275911, %v326_v57  ;;  %v339_v61 = vsub.f32 0.0, %v326_v57 }
 0x159   : > { %v328_v59 = vadd.f32 1.0, %v327_v58  ;;  %v340_v0 = vmul.f32 %v339_v61, %v326_v57 }
 0x15b   : > { %451 = vrcp.f32 %v328_v59  ;;  %v341_v3 = vmul.f32 1.442695, %v340_v0 }
 0x15d   : > { %453 = vpow2.f32 %v341_v3 }
 0x161   : > { %v452_v60 = vpop.eup %451 }
 0x162   : > { %v330_v62 = vmul.f32 1.0614054, %v452_v60 }
 0x163   : > { %v454_v9 = vpop.eup %453 }
 0x164   : > { %v331_v63 = vadd.f32 -1.4531521, %v330_v62 }
 0x166   : > { %v332_v1 = vmul.f32 %v452_v60, %v331_v63 }
 0x168   : > { %v333_v2 = vadd.f32 1.4214138, %v332_v1 }
 0x16a   : > { %v334_v4 = vmul.f32 %v452_v60, %v333_v2 }
 0x16c   : > { %v335_v5 = vadd.f32 -0.28449672, %v334_v4 }
 0x16e   : > { %v336_v6 = vmul.f32 %v452_v60, %v335_v5 }
 0x170   : > { %v337_v7 = vadd.f32 0.2548296, %v336_v6 }
 0x172   : > { %v338_v8 = vmul.f32 %v452_v60, %v337_v7 }
 0x174   : > { %v343_v10 = vmul.f32 %v454_v9, %v338_v8 }
 0x176   : > { %v344_v11 = vsub.f32 1.0, %v343_v10 }
 0x178   : > { %v345_v14 = vmul.f32 %v344_v11, %v325_v13 }
 0x17a   : > { %v346_v16 = vadd.f32 1.0, %v345_v14 }
 0x17c   : > { %v347_v17 = vmul.f32 %v346_v16, %v322_v15 }
 0x17e   : > { %348 = vst.msk [vmem:[%s192_s11] sm:$0xff] %vm270_vm3, %v347_v17 }
 0x17f PF: > { %s14_s15 = sadd.s32 1, %s461_s15  }
 0x180   : > { %p11_p4 = scmp.ge.s32.totalorder %s14_s15, 4  }
 0x182   :  { %13 = sbr.rel (!%p11_p4) target bundleno = 1 (0x1), region = 66 }

// kernel: _lambda_.30
= control target key start
LH: loop header
LB: loop body
LE: loop exit
PB: predicated region body
PF: predicated region fallthrough
CT: control target
= control target key end

     0   :  { %s499_s15 = smov 0   ;;  %s545_s0 = inlined_call_operand.vmem [shape: f32[2,8,26], index: 0, kind: input, shape index: {}]   ;;  %s546_s1 = inlined_call_operand.vmem [shape: f32[8,72], index: 1, kind: input, shape index: {}]   ;;  %s547_s2 = inlined_call_operand.vmem [shape: f32[8,1], index: 2, kind: input, shape index: {}]   ;;  %s548_s3 = inlined_call_operand.vmem [shape: f32[8,1], index: 3, kind: input, shape index: {}]   ;;  %s549_s4 = inlined_call_operand.vmem [shape: f32[2,8,16], index: 4, kind: output, shape index: {}]  }
   0x1 LB: > { %s402_s16 = sadd.s32 4294967295, %s461_s15   ;;  %p406_p0 = scmp.ge.s32.totalorder %s461_s15, 1  ;;  %s461_s15 = sphi %s499_s15, %s14_s15  }
   0x2   : > { %p161_p1 = scmp.lt.s32.totalorder %s461_s15, 3 }
   0x4   : > { %p162_p2 = pnand %p406_p0, %p161_p1 }
   0x5   : > { %p185_p3 = scmp.lt.s32.totalorder (!%p162_p2), %s402_s16, 1  ;;  %s463_s21 = smov (!%p162_p2), 118  }
   0x6   : > { %165 = sbr.rel (%p162_p2) target bundleno = 383 (0x17f), region = 36  ;;  %s464_s22 = smov (!%p162_p2), 120  }
   0x7   : > { %s465_s23 = smov (!%p162_p2), 123   ;;  %s466_s24 = smov (!%p162_p2), 119  }
   0x8   : > { %s467_s25 = smov (!%p162_p2), 122   ;;  %s468_s26 = smov (!%p162_p2), 124  }
   0x9   : > { %s469_s27 = smov (!%p162_p2), 126   ;;  %s470_s28 = smov (!%p162_p2), 127  }
   0xb   : > { %s553_s16 = smov (!%p185_p3, %s402_s16), 1  ;;  %v194_v1 = vlaneseq  ;;  %v315_v3 = vld [vmem:[%s548_s3] sm:$0xff]  ;;  %v471_v5 = vmov 0   ;;  %vm246_vm2 = vcmask 588800   ;;  %v472_v17 = vmov 8.0  }
   0xc   : > { %s407_s17 = sshll.u32 %s553_s16, 3  ;;  %v308_v4 = vld [vmem:[%s547_s2] sm:$0xff]  ;;  %446 = vset.pattern.permute.xlu0 %v471_v5  ;;  %445 = vset.pattern.permute.xlu2 %v471_v5  ;;  %447 = vrcp.f32 %v472_v17  ;;  %vm270_vm3 = vcmask 130048  }
   0xd   : > { %s188_s20 = scalar_lea.vmem %s545_s0, %s407_s17  ;;  %v195_v2 = vand.u32 127, %v194_v1  ;;  %v245_v16 = vld [vmem:[%s546_s1] sm:$0xff]  ;;  %s192_s11 = scalar_lea.vmem %s549_s4, %s407_s17 }
   0xe   : > { %v193_v0 = vld [vmem:[%s188_s20] sm:$0xff] }
   0xf   : > { %232 = vrot.lane.b32.xlu0 %v193_v0, %s463_s21  ;;  %228 = vrot.lane.b32.xlu1 %v193_v0, %s464_s22  ;;  %v200_v6 = vand.u32 3, %v195_v2 }
  0x10   : > { %239 = vrot.lane.b32.xlu2 %v193_v0, %s465_s23 }
  0x11   : > { %vm521_vm0 = vcmp.ne.s32.totalorder %v200_v6, 3  ;;  %vm425_vm1 = vcmp.ne.s32.totalorder %v200_v6, 0 }
  0x12   : > { %v448_v18 = vpop.eup %447 }
  0x13   : > { %v279_v19 = vmul.f32 8.0, %v448_v18  ;;  %vm283_vm4 = vweird.f32 %v448_v18 }
  0x15   : > { %v280_v20 = vsub.f32 1.0, %v279_v19 }
  0x17   : > { %242 = vrot.lane.b32.xlu0 %v193_v0, %s466_s24  ;;  %224 = vrot.lane.b32.xlu1 %v193_v0, %s467_s25  ;;  %v281_v24 = vmul.f32 %v448_v18, %v280_v20 }
  0x18   : > { %220 = vrot.lane.b32.xlu2 %v193_v0, %s468_s26 }
  0x19   : > { %v282_v27 = vadd.f32 %v448_v18, %v281_v24 }
  0x1b   : > { %v284_v30 = vsel %vm283_vm4, %v448_v18, %v282_v27 }
  0x1f   : > { %216 = vrot.lane.b32.xlu0 %v193_v0, %s469_s27  ;;  %236 = vrot.lane.b32.xlu1 %v193_v0, %s470_s28 }
  0x20   : > { %311 = vperm.xlu2 %445, %v308_v4  }
  0x27   : > { %318 = vperm.xlu0 %446, %v315_v3  }
  0x6a   : > { %v240_v10 = vpop.permute.xlu2 %239 }
  0x72   : > { %v221_v13 = vpop.permute.xlu2 %220 }
  0x7a   : > { %v312_v50 = vpop.permute.xlu2 %311 }
  0x81   : > { %v233_v8 = vpop.permute.xlu0 %232  ;;  %v229_v9 = vpop.permute.xlu1 %228 }
  0x82   : > { %410 = vmatpush.msk.msra.mxu0 %vm521_vm0, %v233_v8 }
  0x89   : > { %v243_v11 = vpop.permute.xlu0 %242  ;;  %v225_v12 = vpop.permute.xlu1 %224 }
  0x8a   : > { %258 = vmatpush.msra.mxu0 %v243_v11 }
  0x8c   : > { %412 = vmatpush.msk.msra.mxu0 %vm425_vm1, %v229_v9 }
  0x8e   : > { %414 = vmatpush.msk.msra.mxu0 %vm521_vm0, %v225_v12  ;;  %v473_v12 = vmov 1.0  }
  0x90   : > { %261 = vmatpush.msra.mxu0 %v240_v10 }
  0x91   : > { %v217_v14 = vpop.permute.xlu0 %216  ;;  %v237_v15 = vpop.permute.xlu1 %236 }
  0x92   : > { %416 = vmatpush.msk.msra.mxu0 %vm425_vm1, %v221_v13 }
  0x94   : > { %418 = vmatpush.msk.msra.mxu0 %vm521_vm0, %v217_v14 }
  0x96   : > { %264 = vmatpush.msra.mxu0 %v237_v15 }
  0x98   : > { %420 = vmatpush.msk.msra.mxu0 %vm425_vm1, %v193_v0 }
  0x99   : > { %421 = vmatmul.msk.f32.vlgmr.msra.gmra.mxu0 %vm246_vm2, %v245_v16  ;;  %v319_v53 = vpop.permute.xlu0 %318 }
 0x116   : > { %v267_v21 = vpop.f32.mrf.mxu0 }
 0x117   : > { %v271_v22 = vsel %vm270_vm3, %v267_v21, 0.0 }
 0x118   : > { %v272_v23 = vrot.slane %v271_v22, 4 }
 0x11a   : > { %v273_v25 = vadd.f32 %v272_v23, %v271_v22 }
 0x11c   : > { %v274_v26 = vrot.slane %v273_v25, 2 }
 0x11e   : > { %v275_v28 = vadd.f32 %v274_v26, %v273_v25 }
 0x120   : > { %v276_v29 = vrot.slane %v275_v28, 1 }
 0x122   : > { %v277_v31 = vadd.f32 %v276_v29, %v275_v28 }
 0x124   : > { %v285_v32 = vmul.f32 %v284_v30, %v277_v31 }
 0x126   : > { %v286_v33 = vsub.f32 %v267_v21, %v285_v32 }
 0x128   : > { %v287_v34 = vmul.f32 %v286_v33, %v286_v33 }
 0x12a   : > { %v288_v35 = vsel %vm270_vm3, %v287_v34, 0.0 }
 0x12b   : > { %v289_v36 = vrot.slane %v288_v35, 4 }
 0x12d   : > { %v290_v37 = vadd.f32 %v289_v36, %v288_v35 }
 0x12f   : > { %v291_v38 = vrot.slane %v290_v37, 2 }
 0x131   : > { %v292_v39 = vadd.f32 %v291_v38, %v290_v37 }
 0x133   : > { %v293_v40 = vrot.slane %v292_v39, 1 }
 0x135   : > { %v294_v41 = vadd.f32 %v293_v40, %v292_v39 }
 0x137   : > { %v295_v42 = vmul.f32 %v294_v41, %v284_v30 }
 0x139   : > { %v296_v43 = vadd.f32 1e-05, %v295_v42 }
 0x13b   : > { %449 = vrsqrt.f32 %v296_v43  ;;  %vm303_vm6 = vweird.f32 %v296_v43 }
 0x141   : > { %v450_v44 = vpop.eup %449 }
 0x142   : > { %v298_v45 = vmul.f32 %v450_v44, %v296_v43  ;;  %vm304_vm5 = vweird.f32 %v450_v44 }
 0x143   : > { %vm305_vm7 = vmor %vm303_vm6, %vm304_vm5 }
 0x144   : > { %v299_v46 = vmul.f32 %v450_v44, %v298_v45 }
 0x146   : > { %v300_v47 = vmul.f32 0.5, %v299_v46 }
 0x148   : > { %v301_v48 = vsub.f32 1.5, %v300_v47 }
 0x14a   : > { %v302_v49 = vmul.f32 %v450_v44, %v301_v48 }
 0x14c   : > { %v306_v51 = vsel %vm305_vm7, %v450_v44, %v302_v49 }
 0x14d   : > { %v307_v52 = vmul.f32 %v306_v51, %v286_v33 }
 0x14f   : > { %v314_v54 = vmul.f32 %v312_v50, %v307_v52 }
 0x151   : > { %v321_v55 = vadd.f32 %v319_v53, %v314_v54 }
 0x153   : > { %v323_v56 = vmul.f32 0.70710677, %v321_v55  ;;  %v322_v15 = vmul.f32 0.5, %v321_v55 }
 0x155   : > { %v326_v57 = vand.u32 2147483647, %v323_v56  ;;  %vm324_vm8 = vcmp.lt.f32.partialorder %v323_v56, 0.0 }
 0x156   : > { %v325_v13 = vsel %vm324_vm8, -1.0, %v473_v12 }
 0x157   : > { %v327_v58 = vmul.f32 0.3275911, %v326_v57  ;;  %v339_v61 = vsub.f32 0.0, %v326_v57 }
 0x159   : > { %v328_v59 = vadd.f32 1.0, %v327_v58  ;;  %v340_v0 = vmul.f32 %v339_v61, %v326_v57 }
 0x15b   : > { %451 = vrcp.f32 %v328_v59  ;;  %v341_v3 = vmul.f32 1.442695, %v340_v0 }
 0x15d   : > { %453 = vpow2.f32 %v341_v3 }
 0x161   : > { %v452_v60 = vpop.eup %451 }
 0x162   : > { %v330_v62 = vmul.f32 1.0614054, %v452_v60 }
 0x163   : > { %v454_v9 = vpop.eup %453 }
 0x164   : > { %v331_v63 = vadd.f32 -1.4531521, %v330_v62 }
 0x166   : > { %v332_v1 = vmul.f32 %v452_v60, %v331_v63 }
 0x168   : > { %v333_v2 = vadd.f32 1.4214138, %v332_v1 }
 0x16a   : > { %v334_v4 = vmul.f32 %v452_v60, %v333_v2 }
 0x16c   : > { %v335_v5 = vadd.f32 -0.28449672, %v334_v4 }
 0x16e   : > { %v336_v6 = vmul.f32 %v452_v60, %v335_v5 }
 0x170   : > { %v337_v7 = vadd.f32 0.2548296, %v336_v6 }
 0x172   : > { %v338_v8 = vmul.f32 %v452_v60, %v337_v7 }
 0x174   : > { %v343_v10 = vmul.f32 %v454_v9, %v338_v8 }
 0x176   : > { %v344_v11 = vsub.f32 1.0, %v343_v10 }
 0x178   : > { %v345_v14 = vmul.f32 %v344_v11, %v325_v13 }
 0x17a   : > { %v346_v16 = vadd.f32 1.0, %v345_v14 }
 0x17c   : > { %v347_v17 = vmul.f32 %v346_v16, %v322_v15 }
 0x17e   : > { %348 = vst.msk [vmem:[%s192_s11] sm:$0xff] %vm270_vm3, %v347_v17 }
 0x17f PF: > { %s14_s15 = sadd.s32 1, %s461_s15  }
 0x180   : > { %p11_p4 = scmp.ge.s32.totalorder %s14_s15, 4  }
 0x182   :  { %13 = sbr.rel (!%p11_p4) target bundleno = 1 (0x1), region = 66 }

// kernel: _lambda_.31
= control target key start
LH: loop header
LB: loop body
LE: loop exit
PB: predicated region body
PF: predicated region fallthrough
CT: control target
= control target key end

     0   :  { %s489_s15 = smov 0   ;;  %s525_s0 = inlined_call_operand.vmem [shape: f32[2,8,10], index: 0, kind: input, shape index: {}]   ;;  %s526_s1 = inlined_call_operand.vmem [shape: f32[8,72], index: 1, kind: input, shape index: {}]   ;;  %s527_s2 = inlined_call_operand.vmem [shape: f32[8,1], index: 2, kind: input, shape index: {}]   ;;  %s528_s3 = inlined_call_operand.vmem [shape: f32[8,1], index: 3, kind: input, shape index: {}]   ;;  %s529_s4 = inlined_call_operand.vmem [shape: f32[2,8,4], index: 4, kind: output, shape index: {}]  }
   0x1 LB: > { %s396_s16 = sadd.s32 4294967295, %s453_s15   ;;  %p400_p0 = scmp.ge.s32.totalorder %s453_s15, 1  ;;  %s453_s15 = sphi %s489_s15, %s14_s15  }
   0x2   : > { %p161_p1 = scmp.lt.s32.totalorder %s453_s15, 3 }
   0x4   : > { %p162_p2 = pnand %p400_p0, %p161_p1 }
   0x5   : > { %p185_p3 = scmp.lt.s32.totalorder (!%p162_p2), %s396_s16, 1  ;;  %s455_s21 = smov (!%p162_p2), 122  }
   0x6   : > { %165 = sbr.rel (%p162_p2) target bundleno = 383 (0x17f), region = 36  ;;  %s456_s22 = smov (!%p162_p2), 124  }
   0x7   : > { %s457_s23 = smov (!%p162_p2), 126   ;;  %s458_s24 = smov (!%p162_p2), 123  }
   0x8   : > { %s459_s25 = smov (!%p162_p2), 125   ;;  %s460_s26 = smov (!%p162_p2), 127  }
   0xb   : > { %s531_s16 = smov (!%p185_p3, %s396_s16), 1  ;;  %v194_v1 = vlaneseq  ;;  %v302_v3 = vld [vmem:[%s527_s2] sm:$0xff]  ;;  %v461_v5 = vmov 0   ;;  %vm240_vm2 = vcmask 588800   ;;  %v462_v14 = vmov 8.0  }
   0xc   : > { %s401_s17 = sshll.u32 %s531_s16, 3  ;;  %v309_v4 = vld [vmem:[%s528_s3] sm:$0xff]  ;;  %437 = vset.pattern.permute.xlu0 %v461_v5  ;;  %438 = vset.pattern.permute.xlu1 %v461_v5  ;;  %439 = vrcp.f32 %v462_v14  ;;  %vm264_vm3 = vcmask 31744  }
   0xd   : > { %s188_s20 = scalar_lea.vmem %s525_s0, %s401_s17  ;;  %v195_v2 = vand.u32 127, %v194_v1  ;;  %v239_v13 = vld [vmem:[%s526_s1] sm:$0xff]  ;;  %s192_s9 = scalar_lea.vmem %s529_s4, %s401_s17 }
   0xe   : > { %v193_v0 = vld [vmem:[%s188_s20] sm:$0xff] }
   0xf   : > { %226 = vrot.lane.b32.xlu0 %v193_v0, %s455_s21  ;;  %221 = vrot.lane.b32.xlu1 %v193_v0, %s456_s22  ;;  %v200_v6 = vand.u32 1, %v195_v2 }
  0x10   : > { %216 = vrot.lane.b32.xlu2 %v193_v0, %s457_s23 }
  0x11   : > { %vm418_vm0 = vcmp.ne.s32.totalorder %v200_v6, 1  ;;  %vm419_vm1 = vcmp.ne.s32.totalorder %v200_v6, 0 }
  0x12   : > { %v440_v15 = vpop.eup %439 }
  0x13   : > { %v273_v16 = vmul.f32 8.0, %v440_v15  ;;  %vm277_vm4 = vweird.f32 %v440_v15 }
  0x15   : > { %v274_v17 = vsub.f32 1.0, %v273_v16 }
  0x17   : > { %236 = vrot.lane.b32.xlu0 %v193_v0, %s458_s24  ;;  %233 = vrot.lane.b32.xlu1 %v193_v0, %s459_s25  ;;  %v275_v21 = vmul.f32 %v440_v15, %v274_v17 }
  0x18   : > { %230 = vrot.lane.b32.xlu2 %v193_v0, %s460_s26 }
  0x19   : > { %v276_v24 = vadd.f32 %v440_v15, %v275_v21 }
  0x1b   : > { %v278_v27 = vsel %vm277_vm4, %v440_v15, %v276_v24 }
  0x1f   : > { %305 = vperm.xlu0 %437, %v302_v3   ;;  %312 = vperm.xlu1 %438, %v309_v4  }
  0x6a   : > { %v217_v10 = vpop.permute.xlu2 %216 }
  0x72   : > { %v231_v12 = vpop.permute.xlu2 %230 }
  0x81   : > { %v227_v7 = vpop.permute.xlu0 %226  ;;  %v222_v8 = vpop.permute.xlu1 %221 }
  0x82   : > { %404 = vmatpush.msk.msra.mxu0 %vm418_vm0, %v227_v7 }
  0x89   : > { %v237_v9 = vpop.permute.xlu0 %236  ;;  %v234_v11 = vpop.permute.xlu1 %233 }
  0x8a   : > { %252 = vmatpush.msra.mxu0 %v237_v9  ;;  %v463_v9 = vmov 1.0  }
  0x8c   : > { %406 = vmatpush.msk.msra.mxu0 %vm419_vm1, %v222_v8 }
  0x8e   : > { %408 = vmatpush.msk.msra.mxu0 %vm418_vm0, %v222_v8 }
  0x90   : > { %255 = vmatpush.msra.mxu0 %v234_v11 }
  0x91   : > { %v306_v48 = vpop.permute.xlu0 %305  ;;  %v313_v50 = vpop.permute.xlu1 %312 }
  0x92   : > { %410 = vmatpush.msk.msra.mxu0 %vm419_vm1, %v217_v10 }
  0x94   : > { %412 = vmatpush.msk.msra.mxu0 %vm418_vm0, %v217_v10 }
  0x96   : > { %258 = vmatpush.msra.mxu0 %v231_v12 }
  0x98   : > { %414 = vmatpush.msk.msra.mxu0 %vm419_vm1, %v193_v0 }
  0x99   : > { %415 = vmatmul.msk.f32.vlgmr.msra.gmra.mxu0 %vm240_vm2, %v239_v13 }
 0x116   : > { %v261_v18 = vpop.f32.mrf.mxu0 }
 0x117   : > { %v265_v19 = vsel %vm264_vm3, %v261_v18, 0.0 }
 0x118   : > { %v266_v20 = vrot.slane %v265_v19, 4 }
 0x11a   : > { %v267_v22 = vadd.f32 %v266_v20, %v265_v19 }
 0x11c   : > { %v268_v23 = vrot.slane %v267_v22, 2 }
 0x11e   : > { %v269_v25 = vadd.f32 %v268_v23, %v267_v22 }
 0x120   : > { %v270_v26 = vrot.slane %v269_v25, 1 }
 0x122   : > { %v271_v28 = vadd.f32 %v270_v26, %v269_v25 }
 0x124   : > { %v279_v29 = vmul.f32 %v278_v27, %v271_v28 }
 0x126   : > { %v280_v30 = vsub.f32 %v261_v18, %v279_v29 }
 0x128   : > { %v281_v31 = vmul.f32 %v280_v30, %v280_v30 }
 0x12a   : > { %v282_v32 = vsel %vm264_vm3, %v281_v31, 0.0 }
 0x12b   : > { %v283_v33 = vrot.slane %v282_v32, 4 }
 0x12d   : > { %v284_v34 = vadd.f32 %v283_v33, %v282_v32 }
 0x12f   : > { %v285_v35 = vrot.slane %v284_v34, 2 }
 0x131   : > { %v286_v36 = vadd.f32 %v285_v35, %v284_v34 }
 0x133   : > { %v287_v37 = vrot.slane %v286_v36, 1 }
 0x135   : > { %v288_v38 = vadd.f32 %v287_v37, %v286_v36 }
 0x137   : > { %v289_v39 = vmul.f32 %v288_v38, %v278_v27 }
 0x139   : > { %v290_v40 = vadd.f32 1e-05, %v289_v39 }
 0x13b   : > { %441 = vrsqrt.f32 %v290_v40  ;;  %vm297_vm6 = vweird.f32 %v290_v40 }
 0x141   : > { %v442_v41 = vpop.eup %441 }
 0x142   : > { %v292_v42 = vmul.f32 %v442_v41, %v290_v40  ;;  %vm298_vm5 = vweird.f32 %v442_v41 }
 0x143   : > { %vm299_vm7 = vmor %vm297_vm6, %vm298_vm5 }
 0x144   : > { %v293_v43 = vmul.f32 %v442_v41, %v292_v42 }
 0x146   : > { %v294_v44 = vmul.f32 0.5, %v293_v43 }
 0x148   : > { %v295_v45 = vsub.f32 1.5, %v294_v44 }
 0x14a   : > { %v296_v46 = vmul.f32 %v442_v41, %v295_v45 }
 0x14c   : > { %v300_v47 = vsel %vm299_vm7, %v442_v41, %v296_v46 }
 0x14d   : > { %v301_v49 = vmul.f32 %v300_v47, %v280_v30 }
 0x14f   : > { %v308_v51 = vmul.f32 %v306_v48, %v301_v49 }
 0x151   : > { %v315_v52 = vadd.f32 %v313_v50, %v308_v51 }
 0x153   : > { %v317_v53 = vmul.f32 0.70710677, %v315_v52  ;;  %v316_v12 = vmul.f32 0.5, %v315_v52 }
 0x155   : > { %v320_v54 = vand.u32 2147483647, %v317_v53  ;;  %vm318_vm8 = vcmp.lt.f32.partialorder %v317_v53, 0.0 }
 0x156   : > { %v319_v10 = vsel %vm318_vm8, -1.0, %v463_v9 }
 0x157   : > { %v321_v55 = vmul.f32 0.3275911, %v320_v54  ;;  %v333_v58 = vsub.f32 0.0, %v320_v54 }
 0x159   : > { %v322_v56 = vadd.f32 1.0, %v321_v55  ;;  %v334_v61 = vmul.f32 %v333_v58, %v320_v54 }
 0x15b   : > { %443 = vrcp.f32 %v322_v56  ;;  %v335_v0 = vmul.f32 1.442695, %v334_v61 }
 0x15d   : > { %445 = vpow2.f32 %v335_v0 }
 0x161   : > { %v444_v57 = vpop.eup %443 }
 0x162   : > { %v324_v59 = vmul.f32 1.0614054, %v444_v57 }
 0x163   : > { %v446_v6 = vpop.eup %445 }
 0x164   : > { %v325_v60 = vadd.f32 -1.4531521, %v324_v59 }
 0x166   : > { %v326_v62 = vmul.f32 %v444_v57, %v325_v60 }
 0x168   : > { %v327_v63 = vadd.f32 1.4214138, %v326_v62 }
 0x16a   : > { %v328_v1 = vmul.f32 %v444_v57, %v327_v63 }
 0x16c   : > { %v329_v2 = vadd.f32 -0.28449672, %v328_v1 }
 0x16e   : > { %v330_v3 = vmul.f32 %v444_v57, %v329_v2 }
 0x170   : > { %v331_v4 = vadd.f32 0.2548296, %v330_v3 }
 0x172   : > { %v332_v5 = vmul.f32 %v444_v57, %v331_v4 }
 0x174   : > { %v337_v7 = vmul.f32 %v446_v6, %v332_v5 }
 0x176   : > { %v338_v8 = vsub.f32 1.0, %v337_v7 }
 0x178   : > { %v339_v11 = vmul.f32 %v338_v8, %v319_v10 }
 0x17a   : > { %v340_v13 = vadd.f32 1.0, %v339_v11 }
 0x17c   : > { %v341_v14 = vmul.f32 %v340_v13, %v316_v12 }
 0x17e   : > { %342 = vst.msk [vmem:[%s192_s9] sm:$0xff] %vm264_vm3, %v341_v14 }
 0x17f PF: > { %s14_s15 = sadd.s32 1, %s453_s15  }
 0x180   : > { %p11_p4 = scmp.ge.s32.totalorder %s14_s15, 4  }
 0x182   :  { %13 = sbr.rel (!%p11_p4) target bundleno = 1 (0x1), region = 66 }

// kernel: _lambda_.32
= control target key start
LH: loop header
LB: loop body
LE: loop exit
PB: predicated region body
PF: predicated region fallthrough
CT: control target
= control target key end

     0   :  { %s422_s15 = smov 0   ;;  %s458_s0 = inlined_call_operand.vmem [shape: f32[2,8,5], index: 0, kind: input, shape index: {}]   ;;  %s459_s1 = inlined_call_operand.vmem [shape: f32[8,72], index: 1, kind: input, shape index: {}]   ;;  %s460_s2 = inlined_call_operand.vmem [shape: f32[8,1], index: 2, kind: input, shape index: {}]   ;;  %s461_s3 = inlined_call_operand.vmem [shape: f32[8,1], index: 3, kind: input, shape index: {}]   ;;  %s462_s4 = inlined_call_operand.vmem [shape: f32[2,8,1], index: 4, kind: output, shape index: {}]  }
   0x1 LB: > { %s351_s16 = sadd.s32 4294967295, %s389_s15   ;;  %p355_p0 = scmp.ge.s32.totalorder %s389_s15, 1  ;;  %s389_s15 = sphi %s422_s15, %s14_s15  }
   0x2   : > { %p161_p1 = scmp.lt.s32.totalorder %s389_s15, 3 }
   0x4   : > { %p162_p2 = pnand %p355_p0, %p161_p1 }
   0x5   : > { %p185_p3 = scmp.lt.s32.totalorder (!%p162_p2), %s351_s16, 1  ;;  %s391_s21 = smov (!%p162_p2), 125  }
   0x6   : > { %165 = sbr.rel (%p162_p2) target bundleno = 377 (0x179), region = 36  ;;  %s392_s22 = smov (!%p162_p2), 127  }
   0x7   : > { %s393_s23 = smov (!%p162_p2), 126  }
   0xb   : > { %s464_s16 = smov (!%p185_p3, %s351_s16), 1  ;;  %v394_v2 = vmov 0.0   ;;  %v204_v5 = vld [vmem:[%s459_s1] sm:$0xff]  ;;  %vm205_vm0 = vcmask 588800   ;;  %v395_v6 = vmov 8.0   ;;  %vm229_vm1 = vcmask 7168  }
   0xc   : > { %s356_s17 = sshll.u32 %s464_s16, 3  ;;  %375 = vrcp.f32 %v395_v6  ;;  %v267_v40 = vld [vmem:[%s460_s2] sm:$0xff] }
   0xd   : > { %s188_s20 = scalar_lea.vmem %s458_s0, %s356_s17  ;;  %v269_v42 = vld [vmem:[%s461_s3] sm:$0xff]  ;;  %s192_s6 = scalar_lea.vmem %s462_s4, %s356_s17 }
   0xe   : > { %v193_v0 = vld [vmem:[%s188_s20] sm:$0xff] }
   0xf   : > { %201 = vrot.lane.b32.xlu0 %v193_v0, %s391_s21  ;;  %195 = vrot.lane.b32.xlu1 %v193_v0, %s392_s22 }
  0x12   : > { %v376_v7 = vpop.eup %375 }
  0x13   : > { %v238_v8 = vmul.f32 8.0, %v376_v7  ;;  %vm242_vm2 = vweird.f32 %v376_v7 }
  0x15   : > { %v239_v9 = vsub.f32 1.0, %v238_v8 }
  0x17   : > { %198 = vrot.lane.b32.xlu0 %v193_v0, %s393_s23  ;;  %v240_v13 = vmul.f32 %v376_v7, %v239_v9 }
  0x19   : > { %v241_v16 = vadd.f32 %v376_v7, %v240_v13 }
  0x1b   : > { %v243_v19 = vsel %vm242_vm2, %v376_v7, %v241_v16 }
  0x81   : > { %v202_v1 = vpop.permute.xlu0 %201  ;;  %v196_v4 = vpop.permute.xlu1 %195 }
  0x82   : > { %217 = vmatpush.msra.mxu0 %v202_v1  ;;  %v396_v1 = vmov 1.0  }
  0x84   : > { %218 = vmatpush.msra.mxu0 %v394_v2 }
  0x86   : > { %219 = vmatpush.msra.mxu0 %v394_v2 }
  0x89   : > { %v199_v3 = vpop.permute.xlu0 %198 }
  0x8a   : > { %220 = vmatpush.msra.mxu0 %v199_v3 }
  0x8c   : > { %221 = vmatpush.msra.mxu0 %v394_v2 }
  0x8e   : > { %222 = vmatpush.msra.mxu0 %v394_v2 }
  0x90   : > { %223 = vmatpush.msra.mxu0 %v196_v4 }
  0x92   : > { %224 = vmatpush.msra.mxu0 %v394_v2 }
  0x93   : > { %358 = vmatmul.msk.f32.vlgmr.msra.gmra.mxu0 %vm205_vm0, %v204_v5 }
 0x110   : > { %v226_v10 = vpop.f32.mrf.mxu0 }
 0x111   : > { %v230_v11 = vsel %vm229_vm1, %v226_v10, 0.0 }
 0x112   : > { %v231_v12 = vrot.slane %v230_v11, 4 }
 0x114   : > { %v232_v14 = vadd.f32 %v231_v12, %v230_v11 }
 0x116   : > { %v233_v15 = vrot.slane %v232_v14, 2 }
 0x118   : > { %v234_v17 = vadd.f32 %v233_v15, %v232_v14 }
 0x11a   : > { %v235_v18 = vrot.slane %v234_v17, 1 }
 0x11c   : > { %v236_v20 = vadd.f32 %v235_v18, %v234_v17 }
 0x11e   : > { %v244_v21 = vmul.f32 %v243_v19, %v236_v20 }
 0x120   : > { %v245_v22 = vsub.f32 %v226_v10, %v244_v21 }
 0x122   : > { %v246_v23 = vmul.f32 %v245_v22, %v245_v22 }
 0x124   : > { %v247_v24 = vsel %vm229_vm1, %v246_v23, 0.0 }
 0x125   : > { %v248_v25 = vrot.slane %v247_v24, 4 }
 0x127   : > { %v249_v26 = vadd.f32 %v248_v25, %v247_v24 }
 0x129   : > { %v250_v27 = vrot.slane %v249_v26, 2 }
 0x12b   : > { %v251_v28 = vadd.f32 %v250_v27, %v249_v26 }
 0x12d   : > { %v252_v29 = vrot.slane %v251_v28, 1 }
 0x12f   : > { %v253_v30 = vadd.f32 %v252_v29, %v251_v28 }
 0x131   : > { %v254_v31 = vmul.f32 %v253_v30, %v243_v19 }
 0x133   : > { %v255_v32 = vadd.f32 1e-05, %v254_v31 }
 0x135   : > { %377 = vrsqrt.f32 %v255_v32  ;;  %vm262_vm4 = vweird.f32 %v255_v32 }
 0x13b   : > { %v378_v33 = vpop.eup %377 }
 0x13c   : > { %v257_v34 = vmul.f32 %v378_v33, %v255_v32  ;;  %vm263_vm3 = vweird.f32 %v378_v33 }
 0x13d   : > { %vm264_vm5 = vmor %vm262_vm4, %vm263_vm3 }
 0x13e   : > { %v258_v35 = vmul.f32 %v378_v33, %v257_v34 }
 0x140   : > { %v259_v36 = vmul.f32 0.5, %v258_v35 }
 0x142   : > { %v260_v37 = vsub.f32 1.5, %v259_v36 }
 0x144   : > { %v261_v38 = vmul.f32 %v378_v33, %v260_v37 }
 0x146   : > { %v265_v39 = vsel %vm264_vm5, %v378_v33, %v261_v38 }
 0x147   : > { %v266_v41 = vmul.f32 %v265_v39, %v245_v22 }
 0x149   : > { %v268_v43 = vmul.f32 %v267_v40, %v266_v41 }
 0x14b   : > { %v270_v44 = vadd.f32 %v269_v42, %v268_v43 }
 0x14d   : > { %v272_v45 = vmul.f32 0.70710677, %v270_v44  ;;  %v271_v4 = vmul.f32 0.5, %v270_v44 }
 0x14f   : > { %v275_v46 = vand.u32 2147483647, %v272_v45  ;;  %vm273_vm6 = vcmp.lt.f32.partialorder %v272_v45, 0.0 }
 0x150   : > { %v274_v2 = vsel %vm273_vm6, -1.0, %v396_v1 }
 0x151   : > { %v276_v47 = vmul.f32 0.3275911, %v275_v46  ;;  %v288_v50 = vsub.f32 0.0, %v275_v46 }
 0x153   : > { %v277_v48 = vadd.f32 1.0, %v276_v47  ;;  %v289_v53 = vmul.f32 %v288_v50, %v275_v46 }
 0x155   : > { %379 = vrcp.f32 %v277_v48  ;;  %v290_v56 = vmul.f32 1.442695, %v289_v53 }
 0x157   : > { %381 = vpow2.f32 %v290_v56 }
 0x15b   : > { %v380_v49 = vpop.eup %379 }
 0x15c   : > { %v279_v51 = vmul.f32 1.0614054, %v380_v49 }
 0x15d   : > { %v382_v62 = vpop.eup %381 }
 0x15e   : > { %v280_v52 = vadd.f32 -1.4531521, %v279_v51 }
 0x160   : > { %v281_v54 = vmul.f32 %v380_v49, %v280_v52 }
 0x162   : > { %v282_v55 = vadd.f32 1.4214138, %v281_v54 }
 0x164   : > { %v283_v57 = vmul.f32 %v380_v49, %v282_v55 }
 0x166   : > { %v284_v58 = vadd.f32 -0.28449672, %v283_v57 }
 0x168   : > { %v285_v59 = vmul.f32 %v380_v49, %v284_v58 }
 0x16a   : > { %v286_v60 = vadd.f32 0.2548296, %v285_v59 }
 0x16c   : > { %v287_v61 = vmul.f32 %v380_v49, %v286_v60 }
 0x16e   : > { %v292_v63 = vmul.f32 %v382_v62, %v287_v61 }
 0x170   : > { %v293_v0 = vsub.f32 1.0, %v292_v63 }
 0x172   : > { %v294_v3 = vmul.f32 %v293_v0, %v274_v2 }
 0x174   : > { %v295_v5 = vadd.f32 1.0, %v294_v3 }
 0x176   : > { %v296_v6 = vmul.f32 %v295_v5, %v271_v4 }
 0x178   : > { %297 = vst.msk [vmem:[%s192_s6] sm:$0xff] %vm229_vm1, %v296_v6 }
 0x179 PF: > { %s14_s15 = sadd.s32 1, %s389_s15  }
 0x17a   : > { %p11_p4 = scmp.ge.s32.totalorder %s14_s15, 4  }
 0x17c   :  { %13 = sbr.rel (!%p11_p4) target bundleno = 1 (0x1), region = 66 }

// kernel: _lambda_.33
= control target key start
LH: loop header
LB: loop body
LE: loop exit
PB: predicated region body
PF: predicated region fallthrough
CT: control target
= control target key end

     0   :  { %s1569_s18 = smov 0   ;;  %s2373_s0 = inlined_call_operand.vmem [shape: f32[2,40,290], index: 0, kind: input, shape index: {}]   ;;  %s2374_s1 = inlined_call_operand.vmem [shape: f32[16,360], index: 1, kind: input, shape index: {}]   ;;  %s2375_s2 = inlined_call_operand.vmem [shape: f32[16,1], index: 2, kind: input, shape index: {}]   ;;  %s2376_s3 = inlined_call_operand.vmem [shape: f32[16,1], index: 3, kind: input, shape index: {}]   ;;  %s2377_s4 = inlined_call_operand.vmem [shape: f32[4,16], index: 4, kind: input, shape index: {}]   ;;  %s2378_s5 = inlined_call_operand.vmem [shape: f32[2,4,256], index: 5, kind: output, shape index: {}]  }
   0x1 LB: > { %s1229_s19 = sadd.s32 4294967295, %s1526_s18   ;;  %p1233_p0 = scmp.ge.s32.totalorder %s1526_s18, 1  ;;  %s1526_s18 = sphi %s1569_s18, %s15_s18  }
   0x2   : > { %p187_p1 = scmp.lt.s32.totalorder %s1526_s18, 3 }
   0x4   : > { %p188_p2 = pnand %p1233_p0, %p187_p1 }
   0x5   : > { %p215_p3 = scmp.lt.s32.totalorder (!%p188_p2), %s1229_s19, 1  ;;  %s1528_s24 = smov (!%p188_p2), 94  }
   0x6   : > { %191 = sbr.rel (%p188_p2) target bundleno = 767 (0x2ff), region = 40  ;;  %s1529_s25 = smov (!%p188_p2), 112  }
   0x7   : > { %s1530_s26 = smov (!%p188_p2), 126   ;;  %s1531_s27 = smov (!%p188_p2), 96  }
   0x8   : > { %s1532_s28 = smov (!%p188_p2), 95   ;;  %s1533_s29 = smov (!%p188_p2), 110  }
   0x9   : > { %s1534_s30 = smov (!%p188_p2), 127   ;;  %s1535_s6 = smov (!%p188_p2), 111  }
   0xb   : > { %s2388_s19 = smov (!%p215_p3, %s1229_s19), 1  ;;  %v240_v23 = vlaneseq  ;;  %vm395_vm0 = vcmask 916480   ;;  %vm578_vm3 = vcmask 769024   ;;  %vm334_vm4 = vcmask 1031168  }
   0xc   : > { %s1370_s20 = smul.u32 120, %s2388_s19  ;;  %vm741_vm7 = vcmask 777216   ;;  %vm517_vm8 = vcmask 785408   ;;  %vm639_vm9 = vcmask 1039360   ;;  %vm456_vm10 = vcmask 900096  }
   0xd   : > { %v241_v24 = vand.u32 127, %v240_v23  ;;  %vm690_vm11 = vcmask 908288   ;;  %vm768_vm12 = vcmask 850944  }
   0xe   : > { %s1583_s23 = scalar_lea.vmem %s2373_s0, %s1370_s20 }
   0xf   : > { %v1586_v0 = vld [vmem:[%s1583_s23 + $0x60] sm:$0xff]  ;;  %v1589_v1 = vld [vmem:[%s1583_s23 + $0x48] sm:$0xff]  ;;  %v1604_v4 = vld [vmem:[%s1583_s23 + $0x50] sm:$0xff]  ;;  %v247_v28 = vand.u32 15, %v241_v24  ;;  %v242_v37 = vadd.s32 128, %v241_v24 }
  0x10   : > { %v1592_v2 = vld [vmem:[%s1583_s23] sm:$0xff]  ;;  %572 = vrot.lane.b32.xlu0 %v1586_v0, %s1528_s24  ;;  %566 = vrot.lane.b32.xlu2 %v1589_v1, %s1528_s24  ;;  %v1601_v3 = vld [vmem:[%s1583_s23 + $0x68] sm:$0xff]  ;;  %v1395_v14 = vpack.i.bf16 %v1604_v4, %v1589_v1 }
  0x11   : > { %365 = vrot.lane.b32.xlu1 %v1592_v2, %s1529_s25  ;;  %v1607_v5 = vld [vmem:[%s1583_s23 + $0x8] sm:$0xff]  ;;  %v1616_v6 = vld [vmem:[%s1583_s23 + $0x30] sm:$0xff]  ;;  %v1625_v7 = vld [vmem:[%s1583_s23 + $0x38] sm:$0xff]  ;;  %v1390_v11 = vpack.i.bf16 %v1601_v3, %v1586_v0  ;;  %vm1732_vm1 = vcmp.ne.s32.totalorder %v247_v28, 15  ;;  %vm1738_vm2 = vcmp.ne.s32.totalorder %v247_v28, 0  ;;  %v254_v42 = vand.u32 15, %v242_v37 }
  0x12   : > { %v1634_v8 = vld [vmem:[%s1583_s23 + $0x18] sm:$0xff]  ;;  %v1637_v9 = vld [vmem:[%s1583_s23 + $0x20] sm:$0xff]  ;;  %v1652_v10 = vld [vmem:[%s1583_s23 + $0x10] sm:$0xff]  ;;  %v1405_v17 = vpack.i.bf16 %v1625_v7, %v1616_v6  ;;  %v1425_v22 = vpack.i.bf16 %v1607_v5, %v1592_v2 }
  0x13   : > { %v1663_v12 = vld [vmem:[%s1583_s23 + $0x28] sm:$0xff]  ;;  %v1671_v13 = vld [vmem:[%s1583_s23 + $0x70] sm:$0xff]  ;;  %v1687_v15 = vld [vmem:[%s1583_s23 + $0x58] sm:$0xff]  ;;  %v1415_v20 = vpack.i.bf16 %v1637_v9, %v1634_v8  ;;  %vm1769_vm5 = vcmp.ne.s32.totalorder %v254_v42, 0  ;;  %vm1811_vm6 = vcmp.ne.s32.totalorder %v254_v42, 15 }
  0x14   : > { %v1696_v16 = vld [vmem:[%s1583_s23 + $0x40] sm:$0xff]  ;;  %v1786_v50 = vpack.i.bf16 %v1687_v15, %v1671_v13  ;;  %v1455_v24 = vpack.i.bf16 %v1687_v15, %v1604_v4 }
  0x18   : > { %574 = vrot.lane.b32.xlu0 %v1601_v3, %s1528_s24  ;;  %568 = vrot.lane.b32.xlu2 %v1604_v4, %s1528_s24 }
  0x19   : > { %367 = vrot.lane.b32.xlu1 %v1607_v5, %s1529_s25 }
  0x20   : > { %328 = vrot.lane.b32.xlu0 %v1586_v0, %s1530_s26  ;;  %560 = vrot.lane.b32.xlu2 %v1616_v6, %s1528_s24 }
  0x21   : > { %330 = vrot.lane.b32.xlu1 %v1601_v3, %s1530_s26 }
  0x28   : > { %562 = vrot.lane.b32.xlu0 %v1625_v7, %s1528_s24  ;;  %324 = vrot.lane.b32.xlu2 %v1604_v4, %s1530_s26 }
  0x29   : > { %322 = vrot.lane.b32.xlu1 %v1589_v1, %s1530_s26 }
  0x30   : > { %316 = vrot.lane.b32.xlu2 %v1616_v6, %s1530_s26  ;;  %554 = vrot.lane.b32.xlu0 %v1634_v8, %s1528_s24 }
  0x31   : > { %556 = vrot.lane.b32.xlu1 %v1637_v9, %s1528_s24 }
  0x38   : > { %318 = vrot.lane.b32.xlu0 %v1625_v7, %s1530_s26  ;;  %550 = vrot.lane.b32.xlu2 %v1607_v5, %s1528_s24 }
  0x39   : > { %548 = vrot.lane.b32.xlu1 %v1592_v2, %s1528_s24 }
  0x40   : > { %310 = vrot.lane.b32.xlu0 %v1634_v8, %s1530_s26  ;;  %369 = vrot.lane.b32.xlu2 %v1652_v10, %s1529_s25 }
  0x41   : > { %312 = vrot.lane.b32.xlu1 %v1637_v9, %s1530_s26 }
  0x48   : > { %495 = vrot.lane.b32.xlu0 %v1637_v9, %s1531_s27  ;;  %1391 = vrot.lane.b32.xlu2 %v1390_v11, %s1532_s28 }
  0x49   : > { %497 = vrot.lane.b32.xlu1 %v1663_v12, %s1531_s27 }
  0x50   : > { %332 = vrot.lane.b32.xlu2 %v1671_v13, %s1530_s26  ;;  %304 = vrot.lane.b32.xlu0 %v1592_v2, %s1530_s26 }
  0x51   : > { %306 = vrot.lane.b32.xlu1 %v1607_v5, %s1530_s26 }
  0x58   : > { %1396 = vrot.lane.b32.xlu2 %v1395_v14, %s1532_s28  ;;  %489 = vrot.lane.b32.xlu0 %v1607_v5, %s1531_s27 }
  0x59   : > { %491 = vrot.lane.b32.xlu1 %v1652_v10, %s1531_s27 }
  0x60   : > { %454 = vrot.lane.b32.xlu2 %v1671_v13, %s1533_s29  ;;  %326 = vrot.lane.b32.xlu0 %v1687_v15, %s1530_s26 }
  0x61   : > { %452 = vrot.lane.b32.xlu1 %v1601_v3, %s1533_s29 }
  0x68   : > { %320 = vrot.lane.b32.xlu2 %v1696_v16, %s1530_s26  ;;  %1401 = vrot.lane.b32.xlu0 %v1390_v11, %s1534_s30 }
  0x69   : > { %1406 = vrot.lane.b32.xlu1 %v1405_v17, %s1532_s28 }
  0x6a   : > { %v567_v18 = vpop.permute.xlu2 %566 }
  0x70   : > { %1411 = vrot.lane.b32.xlu2 %v1395_v14, %s1534_s30  ;;  %446 = vrot.lane.b32.xlu0 %v1604_v4, %s1533_s29  ;;  %v1445_v14 = vpack.i.bf16 %v1671_v13, %v1601_v3 }
  0x71   : > { %448 = vrot.lane.b32.xlu1 %v1687_v15, %s1533_s29 }
  0x72   : > { %v1709_v19 = vpop.permute.xlu2 %568 }
  0x73   : > { %v585_v36 = vsel %vm578_vm3, %v567_v18, %v1709_v19 }
  0x78   : > { %440 = vrot.lane.b32.xlu2 %v1625_v7, %s1533_s29  ;;  %1416 = vrot.lane.b32.xlu0 %v1415_v20, %s1532_s28 }
  0x79   : > { %314 = vrot.lane.b32.xlu1 %v1663_v12, %s1530_s26 }
  0x7a   : > { %v561_v21 = vpop.permute.xlu2 %560 }
  0x80   : > { %1426 = vrot.lane.b32.xlu2 %v1425_v22, %s1532_s28  ;;  %442 = vrot.lane.b32.xlu0 %v1696_v16, %s1533_s29 }
  0x81   : > { %1421 = vrot.lane.b32.xlu1 %v1405_v17, %s1534_s30 }
  0x82   : > { %v573_v25 = vpop.permute.xlu0 %572  ;;  %v1724_v26 = vpop.permute.xlu2 %324 }
  0x83   : > { %v366_v27 = vpop.permute.xlu1 %365 }
  0x88   : > { %436 = vrot.lane.b32.xlu2 %v1663_v12, %s1533_s29  ;;  %308 = vrot.lane.b32.xlu0 %v1652_v10, %s1530_s26 }
  0x89   : > { %434 = vrot.lane.b32.xlu1 %v1637_v9, %s1533_s29 }
  0x8a   : > { %v1736_v30 = vpop.permute.xlu0 %574  ;;  %v317_v31 = vpop.permute.xlu2 %316 }
  0x8b   : > { %v368_v33 = vpop.permute.xlu1 %367  ;;  %v587_v34 = vsel %vm578_vm3, %v573_v25, %v1736_v30  ;;  %v1849_v25 = vpack.i.bf16 %v1663_v12, %v1696_v16 }
  0x8c   : > { %v396_v35 = vsel %vm395_vm0, %v366_v27, %v368_v33  ;;  %1282 = vmatpush.msk.msra.mxu2 %vm1732_vm1, %v587_v34  ;;  %v1460_v34 = vpack.i.bf16 %v1696_v16, %v1625_v7 }
  0x8d   : > { %1238 = vmatpush.msk.msra.mxu0 %vm1738_vm2, %v396_v35 }
  0x8e   : > { %1284 = vmatpush.msk.msra.mxu2 %vm1732_vm1, %v585_v36 }
  0x90   : > { %1431 = vrot.lane.b32.xlu2 %v1415_v20, %s1534_s30  ;;  %511 = vrot.lane.b32.xlu0 %v1586_v0, %s1531_s27 }
  0x91   : > { %513 = vrot.lane.b32.xlu1 %v1601_v3, %s1531_s27 }
  0x92   : > { %v329_v38 = vpop.permute.xlu0 %328  ;;  %v1758_v39 = vpop.permute.xlu2 %550 }
  0x93   : > { %v331_v40 = vpop.permute.xlu1 %330 }
  0x94   : > { %v343_v41 = vsel %vm334_vm4, %v329_v38, %v331_v40 }
  0x95   : > { %1240 = vmatpush.msk.msra.mxu0 %vm1732_vm1, %v343_v41 }
  0x98   : > { %505 = vrot.lane.b32.xlu2 %v1589_v1, %s1531_s27  ;;  %428 = vrot.lane.b32.xlu0 %v1607_v5, %s1533_s29 }
  0x99   : > { %430 = vrot.lane.b32.xlu1 %v1652_v10, %s1533_s29 }
  0x9a   : > { %v1773_v44 = vpop.permute.xlu0 %562  ;;  %v370_v45 = vpop.permute.xlu2 %369 }
  0x9b   : > { %v323_v46 = vpop.permute.xlu1 %322  ;;  %v583_v47 = vsel %vm578_vm3, %v561_v21, %v1773_v44  ;;  %v397_v48 = vsel %vm395_vm0, %v368_v33, %v370_v45  ;;  %v1465_v45 = vpack.i.bf16 %v1663_v12, %v1637_v9 }
  0x9c   : > { %1286 = vmatpush.msk.msra.mxu2 %vm1732_vm1, %v583_v47  ;;  %1300 = vmatpush.msk.msra.mxu3 %vm1769_vm5, %v397_v48  ;;  %v341_v49 = vsel %vm334_vm4, %v323_v46, %v1724_v26 }
  0x9d   : > { %1242 = vmatpush.msk.msra.mxu0 %vm1732_vm1, %v341_v49 }
  0xa0   : > { %1441 = vrot.lane.b32.xlu2 %v1786_v50, %s1534_s30  ;;  %507 = vrot.lane.b32.xlu0 %v1604_v4, %s1531_s27 }
  0xa1   : > { %1436 = vrot.lane.b32.xlu1 %v1425_v22, %s1534_s30 }
  0xa2   : > { %v555_v51 = vpop.permute.xlu0 %554  ;;  %v1795_v52 = vpop.permute.xlu2 %1391 }
  0xa3   : > { %v1797_v53 = vpop.permute.xlu1 %556  ;;  %v1394_v55 = vunpack.i.h.bf16 %v1795_v52  ;;  %v1393_v56 = vunpack.i.l.bf16 %v1795_v52 }
  0xa4   : > { %v581_v54 = vsel %vm578_vm3, %v555_v51, %v1797_v53 }
  0xa5   : > { %1288 = vmatpush.msk.msra.mxu2 %vm1732_vm1, %v581_v54  ;;  %v750_v11 = vsel %vm741_vm7, %v1393_v56, %v1394_v55  ;;  %v1470_v54 = vpack.i.bf16 %v1652_v10, %v1607_v5 }
  0xa8   : > { %501 = vrot.lane.b32.xlu2 %v1625_v7, %s1531_s27  ;;  %493 = vrot.lane.b32.xlu0 %v1634_v8, %s1531_s27 }
  0xa9   : > { %499 = vrot.lane.b32.xlu1 %v1616_v6, %s1531_s27 }
  0xaa   : > { %v319_v58 = vpop.permute.xlu0 %318  ;;  %v333_v59 = vpop.permute.xlu2 %332 }
  0xab   : > { %v549_v60 = vpop.permute.xlu1 %548  ;;  %v339_v61 = vsel %vm334_vm4, %v317_v31, %v319_v58  ;;  %v344_v62 = vsel %vm334_vm4, %v331_v40, %v333_v59 }
  0xac   : > { %1244 = vmatpush.msk.msra.mxu0 %vm1732_vm1, %v339_v61  ;;  %1302 = vmatpush.msk.msra.mxu3 %vm1811_vm6, %v344_v62  ;;  %v579_v63 = vsel %vm578_vm3, %v549_v60, %v1758_v39 }
  0xad   : > { %1290 = vmatpush.msk.msra.mxu2 %vm1732_vm1, %v579_v63 }
  0xaf   : > { %829 = vmatpush.msra.mxu2 %v750_v11 }
  0xb0   : > { %487 = vrot.lane.b32.xlu2 %v1592_v2, %s1531_s27  ;;  %576 = vrot.lane.b32.xlu0 %v1671_v13, %s1528_s24 }
  0xb1   : > { %1446 = vrot.lane.b32.xlu1 %v1445_v14, %s1535_s6 }
  0xb2   : > { %v311_v17 = vpop.permute.xlu0 %310  ;;  %v1835_v18 = vpop.permute.xlu2 %1396 }
  0xb3   : > { %v1399_v20 = vunpack.i.h.bf16 %v1835_v18  ;;  %v1398_v21 = vunpack.i.l.bf16 %v1835_v18  ;;  %v1839_v22 = vpop.permute.xlu1 %312 }
  0xb4   : > { %v337_v23 = vsel %vm334_vm4, %v311_v17, %v1839_v22 }
  0xb5   : > { %1246 = vmatpush.msk.msra.mxu0 %vm1732_vm1, %v337_v23  ;;  %v748_v27 = vsel %vm741_vm7, %v1398_v21, %v1399_v20 }
  0xb6   : > { %830 = vmatpush.msra.mxu2 %v748_v27 }
  0xb8   : > { %1456 = vrot.lane.b32.xlu2 %v1455_v24, %s1535_s6  ;;  %570 = vrot.lane.b32.xlu0 %v1687_v15, %s1528_s24 }
  0xb9   : > { %1451 = vrot.lane.b32.xlu1 %v1849_v25, %s1534_s30 }
  0xba   : > { %v1859_v28 = vpop.permute.xlu0 %495  ;;  %v1861_v31 = vpop.permute.xlu2 %454 }
  0xbb   : > { %v1863_v33 = vpop.permute.xlu1 %497 }
  0xc0   : > { %1461 = vrot.lane.b32.xlu2 %v1460_v34, %s1535_s6  ;;  %450 = vrot.lane.b32.xlu0 %v1586_v0, %s1533_s29 }
  0xc1   : > { %564 = vrot.lane.b32.xlu1 %v1696_v16, %s1528_s24 }
  0xc2   : > { %v321_v35 = vpop.permute.xlu2 %320  ;;  %v305_v36 = vpop.permute.xlu0 %304 }
  0xc3   : > { %v1872_v37 = vpop.permute.xlu1 %306  ;;  %v340_v56 = vsel %vm334_vm4, %v319_v58, %v321_v35 }
  0xc4   : > { %v335_v38 = vsel %vm334_vm4, %v305_v36, %v1872_v37 }
  0xc5   : > { %1248 = vmatpush.msk.msra.mxu0 %vm1732_vm1, %v335_v38 }
  0xc8   : > { %613 = vrot.lane.b32.xlu2 %v1652_v10, %s1534_s30  ;;  %444 = vrot.lane.b32.xlu0 %v1589_v1, %s1533_s29 }
  0xc9   : > { %558 = vrot.lane.b32.xlu1 %v1663_v12, %s1528_s24 }
  0xca   : > { %v1884_v40 = vpop.permute.xlu2 %1411  ;;  %v1886_v41 = vpop.permute.xlu0 %489 }
  0xcb   : > { %v492_v42 = vpop.permute.xlu1 %491  ;;  %v1413_v59 = vunpack.i.l.bf16 %v1884_v40 }
  0xcc   : > { %v1892_v46 = vsel %vm517_vm8, %v1886_v41, %v492_v42 }
  0xd0   : > { %552 = vrot.lane.b32.xlu2 %v1652_v10, %s1528_s24  ;;  %1466 = vrot.lane.b32.xlu0 %v1465_v45, %s1535_s6 }
  0xd1   : > { %438 = vrot.lane.b32.xlu1 %v1616_v6, %s1533_s29 }
  0xd2   : > { %v1899_v47 = vpop.permute.xlu2 %440  ;;  %v327_v48 = vpop.permute.xlu0 %326 }
  0xd3   : > { %v1901_v49 = vpop.permute.xlu1 %452  ;;  %v342_v51 = vsel %vm334_vm4, %v1724_v26, %v327_v48  ;;  %v1414_v26 = vunpack.i.h.bf16 %v1884_v40 }
  0xd4   : > { %1304 = vmatpush.msk.msra.mxu3 %vm1811_vm6, %v342_v51 }
  0xd5   : > { %v646_v23 = vsel %vm639_vm9, %v1413_v59, %v1414_v26 }
  0xd6   : > { %1306 = vmatpush.msk.msra.mxu3 %vm1811_vm6, %v340_v56  ;;  %v1480_v56 = vpack.i.bf16 %v1589_v1, %v1586_v0 }
  0xd8   : > { %393 = vrot.lane.b32.xlu2 %v1671_v13, %s1529_s25  ;;  %1471 = vrot.lane.b32.xlu0 %v1470_v54, %s1535_s6 }
  0xd9   : > { %391 = vrot.lane.b32.xlu1 %v1601_v3, %s1529_s25 }
  0xda   : > { %v1919_v60 = vpop.permute.xlu2 %1426  ;;  %v1921_v61 = vpop.permute.xlu0 %1401 }
  0xdb   : > { %v1404_v58 = vunpack.i.h.bf16 %v1921_v61  ;;  %v1403_v62 = vunpack.i.l.bf16 %v1921_v61  ;;  %v1925_v63 = vpop.permute.xlu1 %1406  ;;  %v1429_v35 = vunpack.i.h.bf16 %v1919_v60 }
  0xdc   : > { %v1409_v11 = vunpack.i.h.bf16 %v1925_v63  ;;  %v1408_v14 = vunpack.i.l.bf16 %v1925_v63 }
  0xdd   : > { %v648_v17 = vsel %vm639_vm9, %v1403_v62, %v1404_v58 }
  0xde   : > { %781 = vmatpush.msra.mxu0 %v648_v17  ;;  %v746_v21 = vsel %vm741_vm7, %v1408_v14, %v1409_v11 }
  0xdf   : > { %831 = vmatpush.msra.mxu2 %v746_v21 }
  0xe0   : > { %385 = vrot.lane.b32.xlu2 %v1604_v4, %s1529_s25  ;;  %432 = vrot.lane.b32.xlu0 %v1634_v8, %s1533_s29 }
  0xe1   : > { %1476 = vrot.lane.b32.xlu1 %v1786_v50, %s1532_s28  ;;  %782 = vmatpush.msra.mxu0 %v646_v23  ;;  %v1428_v50 = vunpack.i.l.bf16 %v1919_v60 }
  0xe2   : > { %v1942_v24 = vpop.permute.xlu2 %436  ;;  %v1944_v27 = vpop.permute.xlu0 %446 }
  0xe3   : > { %v1946_v34 = vpop.permute.xlu1 %448  ;;  %v742_v59 = vsel %vm741_vm7, %v1428_v50, %v1429_v35 }
  0xe8   : > { %379 = vrot.lane.b32.xlu2 %v1625_v7, %s1529_s25  ;;  %387 = vrot.lane.b32.xlu0 %v1687_v15, %s1529_s25 }
  0xe9   : > { %426 = vrot.lane.b32.xlu1 %v1592_v2, %s1533_s29 }
  0xea   : > { %v1956_v36 = vpop.permute.xlu2 %1431  ;;  %v1958_v38 = vpop.permute.xlu0 %1416 }
  0xeb   : > { %v1419_v42 = vunpack.i.h.bf16 %v1958_v38  ;;  %v1418_v45 = vunpack.i.l.bf16 %v1958_v38  ;;  %v315_v48 = vpop.permute.xlu1 %314  ;;  %v1433_v61 = vunpack.i.l.bf16 %v1956_v36 }
  0xec   : > { %v338_v51 = vsel %vm334_vm4, %v1839_v22, %v315_v48  ;;  %v1434_v22 = vunpack.i.h.bf16 %v1956_v36 }
  0xed   : > { %1308 = vmatpush.msk.msra.mxu3 %vm1811_vm6, %v338_v51  ;;  %v744_v54 = vsel %vm741_vm7, %v1418_v45, %v1419_v42 }
  0xee   : > { %832 = vmatpush.msra.mxu2 %v744_v54  ;;  %v642_v45 = vsel %vm639_vm9, %v1433_v61, %v1434_v22 }
  0xf0   : > { %1486 = vrot.lane.b32.xlu2 %v1849_v25, %s1532_s28  ;;  %381 = vrot.lane.b32.xlu0 %v1696_v16, %s1529_s25  ;;  %v1490_v25 = vpack.i.bf16 %v1634_v8, %v1616_v6 }
  0xf1   : > { %1481 = vrot.lane.b32.xlu1 %v1480_v56, %s1535_s6  ;;  %833 = vmatpush.msra.mxu2 %v742_v59 }
  0xf2   : > { %v506_v62 = vpop.permute.xlu2 %505  ;;  %v1981_v14 = vpop.permute.xlu0 %442 }
  0xf3   : > { %v1983_v17 = vpop.permute.xlu1 %1421 }
  0xf4   : > { %v1424_v21 = vunpack.i.h.bf16 %v1983_v17  ;;  %v1423_v23 = vunpack.i.l.bf16 %v1983_v17 }
  0xf6   : > { %v644_v50 = vsel %vm639_vm9, %v1423_v23, %v1424_v21 }
  0xf7   : > { %783 = vmatpush.msra.mxu0 %v644_v50 }
  0xf8   : > { %1491 = vrot.lane.b32.xlu2 %v1490_v25, %s1535_s6  ;;  %373 = vrot.lane.b32.xlu0 %v1637_v9, %s1529_s25 }
  0xf9   : > { %375 = vrot.lane.b32.xlu1 %v1663_v12, %s1529_s25  ;;  %784 = vmatpush.msra.mxu0 %v642_v45 }
  0xfa   : > { %v1442_v48 = vpop.permute.xlu2 %1441  ;;  %v309_v51 = vpop.permute.xlu0 %308 }
  0xfb   : > { %v1443_v54 = vunpack.i.l.bf16 %v1442_v48  ;;  %v2000_v56 = vpop.permute.xlu1 %434  ;;  %v336_v59 = vsel %vm334_vm4, %v1872_v37, %v309_v51  ;;  %v1444_v23 = vunpack.i.h.bf16 %v1442_v48 }
  0xfc   : > { %1310 = vmatpush.msk.msra.mxu3 %vm1811_vm6, %v336_v59 }
  0xfd   : > { %v649_v61 = vsel %vm639_vm9, %v1404_v58, %v1443_v54  ;;  %v647_v12 = vsel %vm639_vm9, %v1414_v26, %v1444_v23 }
  0xfe   : > { %850 = vmatpush.msra.mxu3 %v649_v61 }
 0x100   : > { %509 = vrot.lane.b32.xlu2 %v1687_v15, %s1531_s27  ;;  %715 = vrot.lane.b32.xlu0 %v1652_v10, %s1532_s28 }
 0x101   : > { %515 = vrot.lane.b32.xlu1 %v1671_v13, %s1531_s27  ;;  %851 = vmatpush.msra.mxu3 %v647_v12 }
 0x102   : > { %v2016_v37 = vpop.permute.xlu2 %501  ;;  %v512_v25 = vpop.permute.xlu0 %511 }
 0x103   : > { %v2018_v50 = vpop.permute.xlu1 %513 }
 0x104   : > { %v526_v58 = vsel %vm517_vm8, %v512_v25, %v2018_v50 }
 0x105   : > { %1292 = vmatpush.msk.msra.mxu2 %vm1738_vm2, %v526_v58 }
 0x108   : > { %503 = vrot.lane.b32.xlu2 %v1696_v16, %s1531_s27  ;;  %660 = vrot.lane.b32.xlu0 %v1592_v2, %s1535_s6  ;;  %s1365_s6 = sshll.u32 %s2388_s19, 3 }
 0x109   : > { %389 = vrot.lane.b32.xlu1 %v1586_v0, %s1529_s25  ;;  %s224_s9 = scalar_lea.vmem %s2378_s5, %s1365_s6 }
 0x10a   : > { %v488_v10 = vpop.permute.xlu2 %487  ;;  %v2030_v13 = vpop.permute.xlu0 %428 }
 0x10b   : > { %v431_v15 = vpop.permute.xlu1 %430  ;;  %v518_v25 = vsel %vm517_vm8, %v488_v10, %v1886_v41 }
 0x110   : > { %371 = vrot.lane.b32.xlu2 %v1634_v8, %s1529_s25  ;;  %383 = vrot.lane.b32.xlu0 %v1589_v1, %s1529_s25 }
 0x111   : > { %377 = vrot.lane.b32.xlu1 %v1616_v6, %s1529_s25 }
 0x112   : > { %v2038_v16 = vpop.permute.xlu2 %1456  ;;  %v2040_v40 = vpop.permute.xlu0 %507 }
 0x113   : > { %v2042_v26 = vpop.permute.xlu1 %1436  ;;  %v524_v45 = vsel %vm517_vm8, %v506_v62, %v2040_v40 }
 0x114   : > { %v1439_v48 = vunpack.i.h.bf16 %v2042_v26  ;;  %v1438_v51 = vunpack.i.l.bf16 %v2042_v26  ;;  %1294 = vmatpush.msk.msra.mxu2 %vm1738_vm2, %v524_v45  ;;  %v458_v45 = vsel %vm456_vm10, %v2030_v13, %v431_v15 }
 0x116   : > { %v640_v54 = vsel %vm639_vm9, %v1438_v51, %v1439_v48 }
 0x117   : > { %785 = vmatpush.msra.mxu0 %v640_v54 }
 0x119   : > { %1250 = vmatpush.msk.msra.mxu0 %vm1738_vm2, %v1586_v0  ;;  %v521_v0 = vsel %vm517_vm8, %v1859_v28, %v1863_v33 }
 0x11a   : > { %v2056_v59 = vpop.permute.xlu2 %1461  ;;  %v494_v23 = vpop.permute.xlu0 %493 }
 0x11b   : > { %v500_v62 = vpop.permute.xlu1 %499  ;;  %v520_v61 = vsel %vm517_vm8, %v494_v23, %v1859_v28  ;;  %1252 = vmatpush.msk.msra.mxu0 %vm1738_vm2, %v1589_v1  ;;  %v466_v1 = vsel %vm456_vm10, %v1901_v49, %v1861_v31  ;;  %v460_v31 = vsel %vm456_vm10, %v2000_v56, %v1942_v24  ;;  %v1463_v10 = vunpack.i.l.bf16 %v2056_v59 }
 0x11c   : > { %1260 = vmatpush.msk.msra.mxu1 %vm1738_vm2, %v520_v61  ;;  %v522_v12 = vsel %vm517_vm8, %v500_v62, %v2016_v37 }
 0x11d   : > { %1296 = vmatpush.msk.msra.mxu2 %vm1738_vm2, %v522_v12  ;;  %1254 = vmatpush.msk.msra.mxu0 %vm1738_vm2, %v1616_v6 }
 0x11e   : > { %1262 = vmatpush.msk.msra.mxu1 %vm1738_vm2, %v518_v25 }
 0x11f   : > { %1322 = vmatpush.msk.msrb.mxu2 %vm1769_vm5, %v521_v0  ;;  %1256 = vmatpush.msk.msra.mxu0 %vm1738_vm2, %v1634_v8  ;;  %v464_v8 = vsel %vm456_vm10, %v1944_v27, %v1946_v34 }
 0x121   : > { %1324 = vmatpush.msk.msrb.mxu2 %vm1769_vm5, %v1892_v46  ;;  %1258 = vmatpush.msk.msra.mxu0 %vm1738_vm2, %v1592_v2  ;;  %v462_v2 = vsel %vm456_vm10, %v1899_v47, %v1981_v14  ;;  %v1459_v46 = vunpack.i.h.bf16 %v2038_v16  ;;  %v1464_v14 = vunpack.i.h.bf16 %v2056_v59  ;;  %v986_v59 = vld [vmem:[%s2375_s2] sm:$0xff] }
 0x122   : > { %v614_v6 = vpop.permute.xlu2 %613  ;;  %v577_v28 = vpop.permute.xlu0 %576 }
 0x123   : > { %1326 = vmatpush.msk.msrb.mxu2 %vm1811_vm6, %v466_v1  ;;  %v2095_v33 = vpop.permute.xlu1 %1446  ;;  %v588_v41 = vsel %vm578_vm3, %v1736_v30, %v577_v28  ;;  %v1458_v30 = vunpack.i.l.bf16 %v2038_v16  ;;  %v696_v15 = vsel %vm690_vm11, %v1463_v10, %v1464_v14  ;;  %v641_v28 = vsel %vm639_vm9, %v1439_v48, %v614_v6  ;;  %v2192_v48 = vld [vmem:[%s2374_s1 + $0x10] sm:$0xff] }
 0x124   : > { %1344 = vmatpush.msk.msrb.mxu0 %vm1811_vm6, %v588_v41  ;;  %v1449_v34 = vunpack.i.h.bf16 %v2095_v33  ;;  %v1448_v58 = vunpack.i.l.bf16 %v2095_v33  ;;  %1297 = vmatmul.msk.f32.vlgmr.msra.gmra.mxu2 %vm768_vm12, %v2192_v48  ;;  %v763_v33 = vld [vmem:[%s2374_s1 + $0x8] sm:$0xff] }
 0x125   : > { %1328 = vmatpush.msk.msrb.mxu2 %vm1811_vm6, %v464_v8  ;;  %v698_v61 = vsel %vm690_vm11, %v1458_v30, %v1459_v46  ;;  %v2217_v46 = vld [vmem:[%s2374_s1 + $0x28] sm:$0xff] }
 0x126   : > { %v700_v23 = vsel %vm690_vm11, %v1448_v58, %v1449_v34 }
 0x127   : > { %1330 = vmatpush.msk.msrb.mxu2 %vm1811_vm6, %v462_v2 }
 0x129   : > { %1332 = vmatpush.msk.msrb.mxu2 %vm1811_vm6, %v460_v31  ;;  %v762_v31 = vld [vmem:[%s2374_s1] sm:$0xff] }
 0x12a   : > { %v571_v24 = vpop.permute.xlu0 %570  ;;  %v553_v51 = vpop.permute.xlu2 %552  ;;  %791 = vmatmul.f32.vlgmr.msra.gmra.mxu0 %v762_v31 }
 0x12b   : > { %1334 = vmatpush.msk.msrb.mxu2 %vm1811_vm6, %v458_v45  ;;  %v1452_v54 = vpop.permute.xlu1 %1451  ;;  %v586_v62 = vsel %vm578_vm3, %v1709_v19, %v571_v24 }
 0x12c   : > { %v1454_v12 = vunpack.i.h.bf16 %v1452_v54  ;;  %v1453_v0 = vunpack.i.l.bf16 %v1452_v54  ;;  %1346 = vmatpush.msk.msrb.mxu0 %vm1811_vm6, %v586_v62  ;;  %1298 = vmatmul.msk.f32.gmra.mxu2 %vm768_vm12, %v2217_v46 }
 0x12d   : > { %874 = vmatpush.msrb.mxu2 %v700_v23  ;;  %v765_v23 = vld [vmem:[%s2374_s1 + $0x18] sm:$0xff] }
 0x12e   : > { %v645_v25 = vsel %vm639_vm9, %v1424_v21, %v1453_v0  ;;  %v643_v19 = vsel %vm639_vm9, %v1434_v22, %v1454_v12  ;;  %vm1170_vm9 = vcmask 1043456  }
 0x12f   : > { %875 = vmatpush.msrb.mxu2 %v698_v61  ;;  %852 = vmatpush.msra.mxu3 %v645_v25 }
 0x131   : > { %876 = vmatpush.msrb.mxu2 %v696_v15  ;;  %853 = vmatpush.msra.mxu3 %v643_v19 }
 0x132   : > { %v451_v1 = vpop.permute.xlu0 %450  ;;  %v394_v21 = vpop.permute.xlu2 %393  ;;  %794 = vmatmul.f32.gmra.mxu0 %v765_v23 }
 0x133   : > { %v565_v8 = vpop.permute.xlu1 %564  ;;  %854 = vmatpush.msra.mxu3 %v641_v28  ;;  %v465_v17 = vsel %vm456_vm10, %v451_v1, %v1901_v49 }
 0x134   : > { %1264 = vmatpush.msk.msra.mxu1 %vm1732_vm1, %v465_v17  ;;  %v584_v36 = vsel %vm578_vm3, %v1773_v44, %v565_v8 }
 0x135   : > { %1348 = vmatpush.msk.msrb.mxu0 %vm1811_vm6, %v584_v36  ;;  %1312 = vmatpush.msk.msra.mxu3 %vm1769_vm5, %v1601_v3 }
 0x137   : > { %1314 = vmatpush.msk.msra.mxu3 %vm1769_vm5, %v1604_v4  ;;  %v580_v4 = vsel %vm578_vm3, %v1758_v39, %v553_v51 }
 0x139   : > { %1316 = vmatpush.msk.msra.mxu3 %vm1769_vm5, %v1625_v7 }
 0x13a   : > { %v445_v49 = vpop.permute.xlu0 %444  ;;  %v2181_v7 = vpop.permute.xlu2 %385 }
 0x13b   : > { %v559_v22 = vpop.permute.xlu1 %558  ;;  %v463_v44 = vsel %vm456_vm10, %v445_v49, %v1944_v27  ;;  %1318 = vmatpush.msk.msra.mxu3 %vm1769_vm5, %v1637_v9 }
 0x13c   : > { %1266 = vmatpush.msk.msra.mxu1 %vm1732_vm1, %v463_v44  ;;  %v582_v3 = vsel %vm578_vm3, %v1797_v53, %v559_v22  ;;  %v1536_v44 = vmov 0  }
 0x13d   : > { %1350 = vmatpush.msk.msrb.mxu0 %vm1811_vm6, %v582_v3  ;;  %1320 = vmatpush.msk.msra.mxu3 %vm1769_vm5, %v1607_v5  ;;  %v1003_v3 = vld [vmem:[%s2376_s3 + $0x8] sm:$0xff] }
 0x13e   : > { %860 = vmatmul.f32.vlgmr.msra.gmra.mxu3 %v762_v31  ;;  %1496 = vset.pattern.permute.xlu1 %v1536_v44 }
 0x13f   : > { %1352 = vmatpush.msk.msrb.mxu0 %vm1811_vm6, %v580_v4  ;;  %1495 = vset.pattern.permute.xlu0 %v1536_v44  ;;  %vm1123_vm6 = vcmask 130048  }
 0x140   : > { %990 = vperm.xlu1 %1496, %v986_v59   ;;  %1497 = vset.pattern.permute.xlu2 %v1536_v44 }
 0x141   : > { %1011 = vperm.xlu2 %1497, %v1003_v3  }
 0x142   : > { %v2185_v9 = vpop.permute.xlu0 %1466  ;;  %v2203_v57 = vpop.permute.xlu2 %379 }
 0x143   : > { %v1469_v27 = vunpack.i.h.bf16 %v2185_v9  ;;  %v1468_v53 = vunpack.i.l.bf16 %v2185_v9  ;;  %v439_v26 = vpop.permute.xlu1 %438 }
 0x144   : > { %v461_v5 = vsel %vm456_vm10, %v439_v26, %v1899_v47 }
 0x145   : > { %1268 = vmatpush.msk.msra.mxu1 %vm1732_vm1, %v461_v5  ;;  %v694_v39 = vsel %vm690_vm11, %v1468_v53, %v1469_v27  ;;  %v766_v27 = vld [vmem:[%s2374_s1 + $0x20] sm:$0xff] }
 0x146   : > { %877 = vmatpush.msrb.mxu2 %v694_v39  ;;  %863 = vmatmul.f32.gmra.mxu3 %v765_v23 }
 0x14a   : > { %v2205_v6 = vpop.permute.xlu0 %1471  ;;  %v1487_v24 = vpop.permute.xlu2 %1486 }
 0x14b   : > { %v1474_v41 = vunpack.i.h.bf16 %v2205_v6  ;;  %v1473_v2 = vunpack.i.l.bf16 %v2205_v6  ;;  %v2209_v47 = vpop.permute.xlu1 %391  ;;  %v1488_v12 = vunpack.i.l.bf16 %v1487_v24  ;;  %v1489_v15 = vunpack.i.h.bf16 %v1487_v24 }
 0x14c   : > { %v405_v14 = vsel %vm395_vm0, %v2209_v47, %v394_v21  ;;  %v1537_v24 = vmov 16.0  }
 0x14d   : > { %v692_v34 = vsel %vm690_vm11, %v1473_v2, %v1474_v41  ;;  %v747_v19 = vsel %vm741_vm7, %v1409_v11, %v1488_v12  ;;  %1498 = vrcp.f32 %v1537_v24 }
 0x14e   : > { %878 = vmatpush.msrb.mxu2 %v692_v34 }
 0x150   : > { %1336 = vmatpush.msk.msrb.mxu2 %vm1769_vm5, %v405_v14 }
 0x152   : > { %v433_v45 = vpop.permute.xlu0 %432  ;;  %v1492_v18 = vpop.permute.xlu2 %1491 }
 0x153   : > { %v1477_v51 = vpop.permute.xlu1 %1476  ;;  %v459_v54 = vsel %vm456_vm10, %v433_v45, %v2000_v56  ;;  %v1494_v29 = vunpack.i.h.bf16 %v1492_v18  ;;  %v1499_v23 = vpop.eup %1498 }
 0x154   : > { %v1479_v62 = vunpack.i.h.bf16 %v1477_v51  ;;  %v1478_v61 = vunpack.i.l.bf16 %v1477_v51  ;;  %1270 = vmatpush.msk.msra.mxu1 %vm1732_vm1, %v459_v54  ;;  %v928_v12 = vmul.f32 16.0, %v1499_v23  ;;  %vm932_vm13 = vweird.f32 %v1499_v23 }
 0x156   : > { %v751_v0 = vsel %vm741_vm7, %v1394_v55, %v1478_v61  ;;  %v749_v56 = vsel %vm741_vm7, %v1399_v20, %v1479_v62  ;;  %v745_v55 = vsel %vm741_vm7, %v1419_v42, %v1489_v15 }
 0x157   : > { %898 = vmatpush.msrb.mxu0 %v751_v0 }
 0x159   : > { %899 = vmatpush.msrb.mxu0 %v749_v56  ;;  %v929_v56 = vsub.f32 1.0, %v928_v12 }
 0x15a   : > { %v388_v25 = vpop.permute.xlu0 %387  ;;  %v510_v22 = vpop.permute.xlu2 %509 }
 0x15b   : > { %v427_v1 = vpop.permute.xlu1 %426  ;;  %900 = vmatpush.msrb.mxu0 %v747_v19  ;;  %v403_v28 = vsel %vm395_vm0, %v2181_v7, %v388_v25  ;;  %v525_v60 = vsel %vm517_vm8, %v2040_v40, %v510_v22 }
 0x15c   : > { %v457_v52 = vsel %vm456_vm10, %v427_v1, %v2030_v13  ;;  %1338 = vmatpush.msk.msrb.mxu2 %vm1769_vm5, %v403_v28  ;;  %v1493_v13 = vunpack.i.l.bf16 %v1492_v18  ;;  %v930_v1 = vmul.f32 %v1499_v23, %v929_v56 }
 0x15d   : > { %1272 = vmatpush.msk.msra.mxu1 %vm1732_vm1, %v457_v52  ;;  %901 = vmatpush.msrb.mxu0 %v745_v55 }
 0x15e   : > { %v695_v21 = vsel %vm690_vm11, %v1493_v13, %v1463_v10  ;;  %v931_v18 = vadd.f32 %v1499_v23, %v930_v1 }
 0x162   : > { %v382_v20 = vpop.permute.xlu0 %381  ;;  %v504_v26 = vpop.permute.xlu2 %503 }
 0x163   : > { %v1482_v63 = vpop.permute.xlu1 %1481  ;;  %v401_v11 = vsel %vm395_vm0, %v2203_v57, %v382_v20  ;;  %v523_v5 = vsel %vm517_vm8, %v2016_v37, %v504_v26 }
 0x164   : > { %v1484_v8 = vunpack.i.h.bf16 %v1482_v63  ;;  %v1483_v17 = vunpack.i.l.bf16 %v1482_v63  ;;  %1340 = vmatpush.msk.msrb.mxu2 %vm1769_vm5, %v401_v11 }
 0x166   : > { %v699_v38 = vsel %vm690_vm11, %v1483_v17, %v1448_v58  ;;  %v697_v42 = vsel %vm690_vm11, %v1484_v8, %v1458_v30  ;;  %v693_v58 = vsel %vm690_vm11, %v1494_v29, %v1468_v53  ;;  %v987_v30 = vld [vmem:[%s2375_s2 + $0x8] sm:$0xff]  ;;  %v933_v8 = vsel %vm932_vm13, %v1499_v23, %v931_v18 }
 0x167   : > { %805 = vmatpush.msra.mxu1 %v699_v38  ;;  %995 = vperm.xlu0 %1495, %v987_v30  }
 0x169   : > { %806 = vmatpush.msra.mxu1 %v697_v42 }
 0x16a   : > { %v374_v36 = vpop.permute.xlu0 %373 }
 0x16b   : > { %v376_v49 = vpop.permute.xlu1 %375  ;;  %807 = vmatpush.msra.mxu1 %v695_v21 }
 0x16c   : > { %v399_v16 = vsel %vm395_vm0, %v374_v36, %v376_v49 }
 0x16d   : > { %808 = vmatpush.msra.mxu1 %v693_v58  ;;  %1342 = vmatpush.msk.msrb.mxu2 %vm1769_vm5, %v399_v16 }
 0x16e   : > { %883 = vmatmul.f32.vlgmr.msrb.gmra.mxu2 %v763_v33 }
 0x172   : > { %v716_v10 = vpop.permute.xlu0 %715 }
 0x173   : > { %v516_v4 = vpop.permute.xlu1 %515  ;;  %v743_v9 = vsel %vm741_vm7, %v1429_v35, %v716_v10  ;;  %v1002_v35 = vld [vmem:[%s2376_s3] sm:$0xff] }
 0x174   : > { %902 = vmatpush.msrb.mxu0 %v743_v9  ;;  %v527_v53 = vsel %vm517_vm8, %v2018_v50, %v516_v4  ;;  %1006 = vperm.xlu1 %1496, %v1002_v35  }
 0x176   : > { %1354 = vmatpush.msk.msrb.mxu0 %vm1769_vm5, %v527_v53  ;;  %886 = vmatmul.f32.gmra.mxu2 %v766_v27 }
 0x178   : > { %1356 = vmatpush.msk.msrb.mxu0 %vm1769_vm5, %v525_v60 }
 0x17a   : > { %v661_v50 = vpop.permute.xlu0 %660  ;;  %1358 = vmatpush.msk.msrb.mxu0 %vm1769_vm5, %v523_v5 }
 0x17b   : > { %v390_v39 = vpop.permute.xlu1 %389  ;;  %1359 = vmatmul.msk.f32.vlgmr.msrb.gmra.mxu0 %vm768_vm12, %v2192_v48  ;;  %v691_v40 = vsel %vm690_vm11, %v661_v50, %v1473_v2  ;;  %v372_v48 = vpop.permute.xlu2 %371 }
 0x17c   : > { %809 = vmatpush.msra.mxu1 %v691_v40  ;;  %v404_v41 = vsel %vm395_vm0, %v390_v39, %v2209_v47  ;;  %v398_v2 = vsel %vm395_vm0, %v372_v48, %v374_v36 }
 0x17e   : > { %1274 = vmatpush.msk.msra.mxu1 %vm1738_vm2, %v404_v41 }
 0x182   : > { %v384_v37 = vpop.permute.xlu0 %383 }
 0x183   : > { %v378_v31 = vpop.permute.xlu1 %377  ;;  %1360 = vmatmul.msk.f32.gmra.mxu0 %vm768_vm12, %v2217_v46  ;;  %v402_v43 = vsel %vm395_vm0, %v384_v37, %v2181_v7 }
 0x184   : > { %1276 = vmatpush.msk.msra.mxu1 %vm1738_vm2, %v402_v43  ;;  %v400_v6 = vsel %vm395_vm0, %v378_v31, %v2203_v57 }
 0x186   : > { %1278 = vmatpush.msk.msra.mxu1 %vm1738_vm2, %v400_v6 }
 0x188   : > { %1280 = vmatpush.msk.msra.mxu1 %vm1738_vm2, %v398_v2 }
 0x189   : > { %814 = vmatmul.f32.vlgmr.msra.gmra.mxu1 %v763_v33 }
 0x191   : > { %817 = vmatmul.f32.gmra.mxu1 %v766_v27 }
 0x1a7   : > { %v838_v47 = vpop.f32.mrf.mxu2  ;;  %v792_v46 = vpop.f32.mrf.mxu0 }
 0x1af   : > { %v841_v7 = vpop.f32.mrf.mxu2  ;;  %v795_v34 = vpop.f32.mrf.mxu0 }
 0x1c1   : > { %v861_v14 = vpop.f32.mrf.mxu3 }
 0x1c9   : > { %v864_v57 = vpop.f32.mrf.mxu3 }
 0x1d9   : > { %v996_v12 = vpop.permute.xlu0 %995 }
 0x1f1   : > { %v884_v45 = vpop.f32.mrf.mxu2 }
 0x1f2   : > { %v885_v62 = vadd.f32 %v884_v45, %v861_v14  ;;  %v991_v14 = vpop.permute.xlu1 %990 }
 0x1f8   : > { %v907_v51 = vpop.f32.mrf.mxu0 }
 0x1f9   : > { %v887_v54 = vpop.f32.mrf.mxu2  ;;  %v908_v0 = vadd.f32 %v907_v51, %v885_v62 }
 0x1fa   : > { %v888_v61 = vadd.f32 %v887_v54, %v864_v57  ;;  %v1007_v56 = vpop.permute.xlu1 %1006 }
 0x200   : > { %v910_v32 = vpop.f32.mrf.mxu0 }
 0x201   : > { %v911_v15 = vadd.f32 %v910_v32, %v888_v61 }
 0x203   : > { %v920_v25 = vadd.f32 %v911_v15, %v908_v0 }
 0x205   : > { %v921_v19 = vrot.slane %v920_v25, 4 }
 0x206   : > { %v815_v28 = vpop.f32.mrf.mxu1 }
 0x207   : > { %v922_v52 = vadd.f32 %v921_v19, %v920_v25  ;;  %v816_v11 = vadd.f32 %v815_v28, %v792_v46 }
 0x209   : > { %v923_v55 = vrot.slane %v922_v52, 2  ;;  %v839_v42 = vadd.f32 %v838_v47, %v816_v11 }
 0x20b   : > { %v924_v20 = vadd.f32 %v923_v55, %v922_v52 }
 0x20d   : > { %v925_v63 = vrot.slane %v924_v20, 1 }
 0x20e   : > { %v818_v17 = vpop.f32.mrf.mxu1 }
 0x20f   : > { %v926_v13 = vadd.f32 %v925_v63, %v924_v20  ;;  %v819_v38 = vadd.f32 %v818_v17, %v795_v34 }
 0x211   : > { %v935_v29 = vmul.f32 %v933_v8, %v926_v13  ;;  %v842_v36 = vadd.f32 %v841_v7, %v819_v38 }
 0x213   : > { %v939_v21 = vsub.f32 %v911_v15, %v935_v29  ;;  %v913_v49 = vadd.f32 %v842_v36, %v839_v42  ;;  %v937_v33 = vsub.f32 %v908_v0, %v935_v29  ;;  %v1012_v15 = vpop.permute.xlu2 %1011 }
 0x215   : > { %v943_v22 = vmul.f32 %v939_v21, %v939_v21  ;;  %v914_v58 = vrot.slane %v913_v49, 4  ;;  %v941_v16 = vmul.f32 %v937_v33, %v937_v33 }
 0x217   : > { %v915_v59 = vadd.f32 %v914_v58, %v913_v49  ;;  %v951_v30 = vadd.f32 %v943_v22, %v941_v16 }
 0x219   : > { %v916_v10 = vrot.slane %v915_v59, 2  ;;  %v952_v44 = vrot.slane %v951_v30, 4 }
 0x21b   : > { %v917_v3 = vadd.f32 %v916_v10, %v915_v59  ;;  %v953_v4 = vadd.f32 %v952_v44, %v951_v30 }
 0x21d   : > { %v918_v9 = vrot.slane %v917_v3, 1  ;;  %v954_v27 = vrot.slane %v953_v4, 2 }
 0x21f   : > { %v919_v53 = vadd.f32 %v918_v9, %v917_v3  ;;  %v955_v26 = vadd.f32 %v954_v27, %v953_v4 }
 0x221   : > { %v934_v60 = vmul.f32 %v933_v8, %v919_v53  ;;  %v956_v35 = vrot.slane %v955_v26, 1 }
 0x223   : > { %v938_v5 = vsub.f32 %v842_v36, %v934_v60  ;;  %v936_v50 = vsub.f32 %v839_v42, %v934_v60  ;;  %v957_v39 = vadd.f32 %v956_v35, %v955_v26 }
 0x225   : > { %v942_v40 = vmul.f32 %v938_v5, %v938_v5  ;;  %v940_v41 = vmul.f32 %v936_v50, %v936_v50  ;;  %v959_v37 = vmul.f32 %v957_v39, %v933_v8 }
 0x227   : > { %v944_v31 = vadd.f32 %v942_v40, %v940_v41  ;;  %v961_v43 = vadd.f32 1e-05, %v959_v37 }
 0x229   : > { %v945_v48 = vrot.slane %v944_v31, 4  ;;  %1500 = vrsqrt.f32 %v961_v43  ;;  %vm978_vm15 = vweird.f32 %v961_v43 }
 0x22b   : > { %v946_v6 = vadd.f32 %v945_v48, %v944_v31 }
 0x22d   : > { %v947_v2 = vrot.slane %v946_v6, 2 }
 0x22f   : > { %v1501_v47 = vpop.eup %1500  ;;  %v948_v46 = vadd.f32 %v947_v2, %v946_v6 }
 0x230   : > { %v973_v7 = vmul.f32 %v1501_v47, %v961_v43  ;;  %vm979_vm14 = vweird.f32 %v1501_v47 }
 0x231   : > { %v949_v34 = vrot.slane %v948_v46, 1  ;;  %vm980_vm0 = vmor %vm978_vm15, %vm979_vm14 }
 0x232   : > { %v974_v45 = vmul.f32 %v1501_v47, %v973_v7 }
 0x233   : > { %v950_v24 = vadd.f32 %v949_v34, %v948_v46 }
 0x234   : > { %v975_v51 = vmul.f32 0.5, %v974_v45 }
 0x235   : > { %v958_v57 = vmul.f32 %v950_v24, %v933_v8 }
 0x236   : > { %v976_v54 = vsub.f32 1.5, %v975_v51 }
 0x237   : > { %v960_v23 = vadd.f32 1e-05, %v958_v57 }
 0x238   : > { %v977_v62 = vmul.f32 %v1501_v47, %v976_v54 }
 0x239   : > { %1502 = vrsqrt.f32 %v960_v23  ;;  %vm968_vm2 = vweird.f32 %v960_v23 }
 0x23a   : > { %v981_v61 = vsel %vm980_vm0, %v1501_v47, %v977_v62 }
 0x23b   : > { %v983_v0 = vmul.f32 %v981_v61, %v937_v33  ;;  %v985_v32 = vmul.f32 %v981_v61, %v939_v21 }
 0x23d   : > { %v999_v25 = vmul.f32 %v991_v14, %v983_v0  ;;  %v1001_v19 = vmul.f32 %v996_v12, %v985_v32 }
 0x23f   : > { %v1503_v1 = vpop.eup %1502  ;;  %v2329_v28 = vadd.f32 %v1012_v15, %v1001_v19  ;;  %v2331_v52 = vadd.f32 %v1007_v56, %v999_v25 }
 0x240   : > { %v963_v55 = vmul.f32 %v1503_v1, %v960_v23  ;;  %vm969_vm1 = vweird.f32 %v1503_v1 }
 0x241   : > { %v2334_v18 = vmul.f32 0.70710677, %v2329_v28  ;;  %v2337_v20 = vmul.f32 0.70710677, %v2331_v52  ;;  %vm970_vm3 = vmor %vm968_vm2, %vm969_vm1 }
 0x242   : > { %v964_v63 = vmul.f32 %v1503_v1, %v963_v55 }
 0x243   : > { %v1037_v11 = vand.u32 2147483647, %v2334_v18  ;;  %v1035_v8 = vand.u32 2147483647, %v2337_v20  ;;  %vm1029_vm4 = vcmp.lt.f32.partialorder %v2334_v18, 0.0  ;;  %vm1027_vm5 = vcmp.lt.f32.partialorder %v2337_v20, 0.0 }
 0x244   : > { %v965_v17 = vmul.f32 0.5, %v964_v63  ;;  %v1021_v18 = vmul.f32 0.5, %v2329_v28  ;;  %v1122_v28 = vld [vmem:[%s2377_s4] sm:$0xf] }
 0x245   : > { %v1041_v13 = vmul.f32 0.3275911, %v1037_v11  ;;  %v1039_v38 = vmul.f32 0.3275911, %v1035_v8  ;;  %v1089_v10 = vsub.f32 0.0, %v1037_v11  ;;  %v1087_v53 = vsub.f32 0.0, %v1035_v8 }
 0x246   : > { %v966_v29 = vsub.f32 1.5, %v965_v17 }
 0x247   : > { %v1045_v42 = vadd.f32 1.0, %v1041_v13  ;;  %v1043_v36 = vadd.f32 1.0, %v1039_v38  ;;  %v1091_v31 = vmul.f32 %v1087_v53, %v1035_v8 }
 0x248   : > { %v967_v21 = vmul.f32 %v1503_v1, %v966_v29 }
 0x249   : > { %1504 = vrcp.f32 %v1045_v42  ;;  %v1096_v34 = vmul.f32 1.442695, %v1091_v31  ;;  %v1538_v42 = vmov 1.0  }
 0x24a   : > { %v971_v49 = vsel %vm970_vm3, %v1503_v1, %v967_v21  ;;  %1506 = vrcp.f32 %v1043_v36  ;;  %v1033_v36 = vsel %vm1029_vm4, -1.0, %v1538_v42 }
 0x24b   : > { %v982_v33 = vmul.f32 %v971_v49, %v936_v50  ;;  %v984_v22 = vmul.f32 %v971_v49, %v938_v5  ;;  %v1093_v5 = vmul.f32 %v1089_v10, %v1037_v11 }
 0x24d   : > { %v998_v58 = vmul.f32 %v991_v14, %v982_v33  ;;  %v1000_v16 = vmul.f32 %v996_v12, %v984_v22  ;;  %v1100_v2 = vmul.f32 1.442695, %v1093_v5 }
 0x24f   : > { %v1505_v59 = vpop.eup %1504  ;;  %v2341_v30 = vadd.f32 %v1012_v15, %v1000_v16  ;;  %v2343_v44 = vadd.f32 %v1007_v56, %v998_v58  ;;  %v1031_v16 = vsel %vm1027_vm5, -1.0, %v1538_v42 }
 0x250   : > { %v1507_v3 = vpop.eup %1506  ;;  %v1053_v4 = vmul.f32 1.0614054, %v1505_v59 }
 0x251   : > { %v2346_v9 = vmul.f32 0.70710677, %v2341_v30  ;;  %v2349_v27 = vmul.f32 0.70710677, %v2343_v44  ;;  %v1051_v60 = vmul.f32 1.0614054, %v1507_v3 }
 0x252   : > { %v1057_v26 = vadd.f32 -1.4531521, %v1053_v4 }
 0x253   : > { %v1036_v35 = vand.u32 2147483647, %v2346_v9  ;;  %v1034_v50 = vand.u32 2147483647, %v2349_v27  ;;  %v1055_v40 = vadd.f32 -1.4531521, %v1051_v60 }
 0x254   : > { %v1061_v39 = vmul.f32 %v1505_v59, %v1057_v26  ;;  %v1019_v26 = vmul.f32 0.5, %v2331_v52  ;;  %vm1028_vm7 = vcmp.lt.f32.partialorder %v2346_v9, 0.0  ;;  %vm1026_vm8 = vcmp.lt.f32.partialorder %v2349_v27, 0.0 }
 0x255   : > { %v1040_v41 = vmul.f32 0.3275911, %v1036_v35  ;;  %v1038_v37 = vmul.f32 0.3275911, %v1034_v50  ;;  %v1059_v48 = vmul.f32 %v1507_v3, %v1055_v40  ;;  %v1088_v62 = vsub.f32 0.0, %v1036_v35 }
 0x256   : > { %v1065_v43 = vadd.f32 1.4214138, %v1061_v39  ;;  %v1086_v12 = vsub.f32 0.0, %v1034_v50 }
 0x257   : > { %v1044_v6 = vadd.f32 1.0, %v1040_v41  ;;  %v1042_v47 = vadd.f32 1.0, %v1038_v37  ;;  %v1063_v7 = vadd.f32 1.4214138, %v1059_v48  ;;  %v1092_v11 = vmul.f32 %v1088_v62, %v1036_v35 }
 0x258   : > { %v1069_v46 = vmul.f32 %v1505_v59, %v1065_v43  ;;  %v1090_v17 = vmul.f32 %v1086_v12, %v1034_v50 }
 0x259   : > { %1508 = vrcp.f32 %v1044_v6  ;;  %v1067_v45 = vmul.f32 %v1507_v3, %v1063_v7  ;;  %v1098_v58 = vmul.f32 1.442695, %v1092_v11  ;;  %v1032_v7 = vsel %vm1028_vm7, -1.0, %v1538_v42 }
 0x25a   : > { %1510 = vrcp.f32 %v1042_v47  ;;  %v1073_v14 = vadd.f32 -0.28449672, %v1069_v46  ;;  %v1094_v10 = vmul.f32 1.442695, %v1090_v17 }
 0x25b   : > { %1512 = vpow2.f32 %v1100_v2  ;;  %v1071_v51 = vadd.f32 -0.28449672, %v1067_v45  ;;  %v1030_v45 = vsel %vm1026_vm8, -1.0, %v1538_v42 }
 0x25c   : > { %v1077_v24 = vmul.f32 %v1505_v59, %v1073_v14  ;;  %1514 = vpow2.f32 %v1096_v34 }
 0x25d   : > { %v1075_v54 = vmul.f32 %v1507_v3, %v1071_v51  ;;  %1516 = vpow2.f32 %v1098_v58  ;;  %v1020_v51 = vmul.f32 0.5, %v2341_v30 }
 0x25e   : > { %v1081_v57 = vadd.f32 0.2548296, %v1077_v24  ;;  %1518 = vpow2.f32 %v1094_v10 }
 0x25f   : > { %v1509_v23 = vpop.eup %1508  ;;  %v1079_v32 = vadd.f32 0.2548296, %v1075_v54 }
 0x260   : > { %v1511_v61 = vpop.eup %1510  ;;  %v1085_v0 = vmul.f32 %v1505_v59, %v1081_v57  ;;  %v1052_v15 = vmul.f32 1.0614054, %v1509_v23 }
 0x261   : > { %v1513_v56 = vpop.eup %1512  ;;  %v1050_v25 = vmul.f32 1.0614054, %v1511_v61  ;;  %v1083_v1 = vmul.f32 %v1507_v3, %v1079_v32 }
 0x262   : > { %v1105_v19 = vmul.f32 %v1513_v56, %v1085_v0  ;;  %v1056_v55 = vadd.f32 -1.4531521, %v1052_v15  ;;  %v1515_v63 = vpop.eup %1514 }
 0x263   : > { %v1054_v8 = vadd.f32 -1.4531521, %v1050_v25  ;;  %v1103_v38 = vmul.f32 %v1515_v63, %v1083_v1  ;;  %v1517_v43 = vpop.eup %1516 }
 0x264   : > { %v1109_v13 = vsub.f32 1.0, %v1105_v19  ;;  %v1060_v29 = vmul.f32 %v1509_v23, %v1056_v55  ;;  %v1519_v6 = vpop.eup %1518 }
 0x265   : > { %v1058_v21 = vmul.f32 %v1511_v61, %v1054_v8  ;;  %v1107_v33 = vsub.f32 1.0, %v1103_v38 }
 0x266   : > { %v1113_v49 = vmul.f32 %v1109_v13, %v1033_v36  ;;  %v1064_v22 = vadd.f32 1.4214138, %v1060_v29 }
 0x267   : > { %v1062_v59 = vadd.f32 1.4214138, %v1058_v21  ;;  %v1111_v4 = vmul.f32 %v1107_v33, %v1031_v16 }
 0x268   : > { %v1117_v3 = vadd.f32 1.0, %v1113_v49  ;;  %v1068_v20 = vmul.f32 %v1509_v23, %v1064_v22 }
 0x269   : > { %v1066_v53 = vmul.f32 %v1511_v61, %v1062_v59  ;;  %v1115_v35 = vadd.f32 1.0, %v1111_v4 }
 0x26a   : > { %v1121_v60 = vmul.f32 %v1117_v3, %v1021_v18  ;;  %v1072_v5 = vadd.f32 -0.28449672, %v1068_v20 }
 0x26b   : > { %v1070_v50 = vadd.f32 -0.28449672, %v1066_v53  ;;  %v1119_v39 = vmul.f32 %v1115_v35, %v1019_v26 }
 0x26c   : > { %1161 = vmatpush.msrb.mxu3 %v1121_v60  ;;  %v1076_v40 = vmul.f32 %v1509_v23, %v1072_v5 }
 0x26d   : > { %v1074_v41 = vmul.f32 %v1511_v61, %v1070_v50 }
 0x26e   : > { %1162 = vmatpush.msrb.mxu3 %v1119_v39  ;;  %v1080_v37 = vadd.f32 0.2548296, %v1076_v40 }
 0x26f   : > { %v1078_v31 = vadd.f32 0.2548296, %v1074_v41  ;;  %1362 = vmatmul.msk.f32.vlgmr.msrb.gmra.mxu3 %vm1123_vm6, %v1122_v28 }
 0x270   : > { %v1084_v52 = vmul.f32 %v1509_v23, %v1080_v37  ;;  %v1018_v23 = vmul.f32 0.5, %v2343_v44 }
 0x271   : > { %v1082_v48 = vmul.f32 %v1511_v61, %v1078_v31 }
 0x272   : > { %v1104_v2 = vmul.f32 %v1517_v43, %v1084_v52 }
 0x273   : > { %v1102_v47 = vmul.f32 %v1519_v6, %v1082_v48 }
 0x274   : > { %v1108_v46 = vsub.f32 1.0, %v1104_v2 }
 0x275   : > { %v1106_v34 = vsub.f32 1.0, %v1102_v47 }
 0x276   : > { %v1112_v14 = vmul.f32 %v1108_v46, %v1032_v7 }
 0x277   : > { %v1110_v24 = vmul.f32 %v1106_v34, %v1030_v45 }
 0x278   : > { %v1116_v57 = vadd.f32 1.0, %v1112_v14 }
 0x279   : > { %v1114_v54 = vadd.f32 1.0, %v1110_v24 }
 0x27a   : > { %v1120_v62 = vmul.f32 %v1116_v57, %v1020_v51 }
 0x27b   : > { %v1118_v9 = vmul.f32 %v1114_v54, %v1018_v23 }
 0x27c   : > { %1141 = vmatpush.msrb.mxu1 %v1120_v62 }
 0x27e   : > { %1142 = vmatpush.msrb.mxu1 %v1118_v9 }
 0x27f   : > { %1361 = vmatmul.msk.f32.vlgmr.msrb.gmra.mxu1 %vm1123_vm6, %v1122_v28 }
 0x2f2   : > { %v1164_v27 = vpop.f32.mrf.mxu3 }
 0x2f3   : > { %v1169_v61 = vrot.slane %v1164_v27, 4 }
 0x2fc   : > { %v1144_v12 = vpop.f32.mrf.mxu1 }
 0x2fd   : > { %v1171_v30 = vsel %vm1170_vm9, %v1144_v12, %v1169_v61 }
 0x2fe   : > { %1173 = vst [vmem:[%s224_s9] sm:$0xff] %v1171_v30 }
 0x2ff PF: > { %s15_s18 = sadd.s32 1, %s1526_s18  }
 0x300   : > { %p12_p4 = scmp.ge.s32.totalorder %s15_s18, 4  }
 0x302   :  { %14 = sbr.rel (!%p12_p4) target bundleno = 1 (0x1), region = 70 }

</bundles_post_ra>
